<compile_context>
chip_gen: v6e
topology: v6e:2x2x1
jax: 0.10.0
libtpu: 0.0.40
codegen_flags: <defaults>
</compile_context>

<pallas_src>
import functools

import jax
import jax.numpy as jnp
from jax.experimental import pallas as pl
from jax.experimental.pallas import tpu as pltpu

LANES = 128          # every channel count in this model pads to one lane-tile
NEG_BIG = -1e30      # finite "-inf" for maxpool padding (avoids inf*0 NaNs)

# Scaled-down ResNet-18-style config (full ResNet-18 would use
# widths=(64,128,256,512), blocks=(2,2,2,2), input 3x224x224).
WIDTHS = (8, 16, 32, 64)
BLOCKS = (1, 1, 1, 1)


def _round_up(x, m):
    return (x + m - 1) // m * m


# ----------------------------- Pallas kernels ------------------------------

def _conv_bn_kernel(x_ref, w_ref, s_ref, b_ref, o_ref, *, relu):
    """bf16 matmul on the MXU + folded-BN affine epilogue (+ optional ReLU)."""
    acc = jnp.dot(x_ref[...], w_ref[...], preferred_element_type=jnp.float32)
    y = acc * s_ref[...] + b_ref[...]
    if relu:
        y = jnp.maximum(y, 0.0)
    o_ref[...] = y.astype(o_ref.dtype)


def _conv_bn_res_kernel(x_ref, w_ref, s_ref, b_ref, r_ref, o_ref):
    """Same as above, plus residual add before the ReLU (BasicBlock tail)."""
    acc = jnp.dot(x_ref[...], w_ref[...], preferred_element_type=jnp.float32)
    y = acc * s_ref[...] + b_ref[...] + r_ref[...].astype(jnp.float32)
    o_ref[...] = jnp.maximum(y, 0.0).astype(o_ref.dtype)


def _maxpool9_kernel(x0, x1, x2, x3, x4, x5, x6, x7, x8, o_ref):
    """Elementwise max over the 9 taps of a 3x3 pooling window."""
    m = x0[...]
    for r in (x1, x2, x3, x4, x5, x6, x7, x8):
        m = jnp.maximum(m, r[...])
    o_ref[...] = m


def _avgpool_heads_kernel(x_ref, w_ref, o_ref, *, inv_hw):
    """Global average pool over H*W + fused bias-free heads matmul."""
    feats = jnp.sum(x_ref[...].astype(jnp.float32), axis=1) * inv_hw
    o_ref[...] = jnp.dot(feats.astype(jnp.bfloat16), w_ref[...],
                         preferred_element_type=jnp.float32)


# ----------------------------- XLA glue (layout) ----------------------------

def _im2col(x_nhwc, kh, kw, stride, pad):
    """NHWC -> (N*Ho*Wo, kh*kw*C) patches, tap-major / channel-minor K order."""
    N, H, W, C = x_nhwc.shape
    if pad:
        x_nhwc = jnp.pad(x_nhwc, ((0, 0), (pad, pad), (pad, pad), (0, 0)))
    Ho = (H + 2 * pad - kh) // stride + 1
    Wo = (W + 2 * pad - kw) // stride + 1
    taps = []
    for i in range(kh):
        for j in range(kw):
            taps.append(x_nhwc[:, i:i + stride * (Ho - 1) + 1:stride,
                               j:j + stride * (Wo - 1) + 1:stride, :])
    patches = taps[0] if len(taps) == 1 else jnp.concatenate(taps, axis=-1)
    return patches.reshape(N * Ho * Wo, kh * kw * C), Ho, Wo


# ----------------------------- layers (Pallas-backed) ----------------------

def conv_bn_act(x_nhwc, layer, *, kh, kw, stride, pad, residual=None,
                relu=True):
    """Conv (im2col matmul) fused with folded-BN affine, optional residual add
    and optional ReLU.  Returns bf16 channels-last rows (N*Ho*Wo, 128)."""
    N = x_nhwc.shape[0]
    wmat, scale, bias = layer["w"], layer["s"], layer["b"]
    patches, Ho, Wo = _im2col(x_nhwc, kh, kw, stride, pad)
    M, K = patches.shape
    Kp, Cout_p = wmat.shape                          # (round_up(K,128), 128)

    tile_m = min(256, _round_up(M, 8))
    Mp = _round_up(M, tile_m)
    if (Mp, Kp) != (M, K):
        patches = jnp.zeros((Mp, Kp), patches.dtype).at[:M, :K].set(patches)

    grid = (Mp // tile_m,)
    x_spec = pl.BlockSpec((tile_m, Kp), lambda i: (i, 0))
    w_spec = pl.BlockSpec((Kp, Cout_p), lambda i: (0, 0))
    v_spec = pl.BlockSpec((1, Cout_p), lambda i: (0, 0))
    o_spec = pl.BlockSpec((tile_m, Cout_p), lambda i: (i, 0))
    out_shape = jax.ShapeDtypeStruct((Mp, Cout_p), jnp.bfloat16)
    cparams = pltpu.CompilerParams(dimension_semantics=("parallel",))

    if residual is not None:
        r = residual
        if r.shape[0] != Mp:
            r = jnp.pad(r, ((0, Mp - r.shape[0]), (0, 0)))
        y = pl.pallas_call(
            _conv_bn_res_kernel, out_shape=out_shape, grid=grid,
            in_specs=[x_spec, w_spec, v_spec, v_spec, o_spec],
            out_specs=o_spec, compiler_params=cparams,
        )(patches, wmat, scale, bias, r)
    else:
        y = pl.pallas_call(
            functools.partial(_conv_bn_kernel, relu=relu),
            out_shape=out_shape, grid=grid,
            in_specs=[x_spec, w_spec, v_spec, v_spec],
            out_specs=o_spec, compiler_params=cparams,
        )(patches, wmat, scale, bias)
    return y[:M], (N, Ho, Wo)


def maxpool2d(x_nhwc, *, k=3, stride=2, pad=1):
    """MaxPool2d(3, 2, 1): 9 shifted strided views reduced inside one kernel."""
    assert k == 3, "this model only uses the 3x3 stem maxpool"
    N, H, W, C = x_nhwc.shape
    xp = jnp.pad(x_nhwc, ((0, 0), (pad, pad), (pad, pad), (0, 0)),
                 constant_values=NEG_BIG)
    Ho = (H + 2 * pad - k) // stride + 1
    Wo = (W + 2 * pad - k) // stride + 1
    M = N * Ho * Wo
    taps = []
    for i in range(k):
        for j in range(k):
            t = xp[:, i:i + stride * (Ho - 1) + 1:stride,
                   j:j + stride * (Wo - 1) + 1:stride, :]
            taps.append(t.reshape(M, C))
    tile_m = min(256, _round_up(M, 8))
    Mp = _round_up(M, tile_m)
    if Mp != M:
        taps = [jnp.pad(t, ((0, Mp - M), (0, 0)), constant_values=NEG_BIG)
                for t in taps]
    spec = pl.BlockSpec((tile_m, C), lambda i: (i, 0))
    out = pl.pallas_call(
        _maxpool9_kernel,
        out_shape=jax.ShapeDtypeStruct((Mp, C), x_nhwc.dtype),
        grid=(Mp // tile_m,),
        in_specs=[spec] * (k * k),
        out_specs=spec,
        compiler_params=pltpu.CompilerParams(dimension_semantics=("parallel",)),
    )(*taps)
    return out[:M], (N, Ho, Wo)


def global_avgpool_heads(x_nhwc, w_heads):
    """AdaptiveAvgPool2d((1,1)) + flatten + both bias-free linear heads fused
    into a single kernel.  Output lanes 0:3 = position, 3:7 = rotation."""
    N, H, W, C = x_nhwc.shape
    HW = H * W
    HWp = _round_up(HW, 8)
    Np = _round_up(N, 8)
    x3 = x_nhwc.reshape(N, HW, C)
    if (Np, HWp) != (N, HW):
        x3 = jnp.pad(x3, ((0, Np - N), (0, HWp - HW), (0, 0)))
    out = pl.pallas_call(
        functools.partial(_avgpool_heads_kernel, inv_hw=1.0 / HW),
        out_shape=jax.ShapeDtypeStruct((Np, C), jnp.float32),
        grid=(1,),
        in_specs=[pl.BlockSpec((Np, HWp, C), lambda i: (0, 0, 0)),
                  pl.BlockSpec((C, C), lambda i: (0, 0))],
        out_specs=pl.BlockSpec((Np, C), lambda i: (0, 0)),
    )(x3, w_heads)
    return out[:N, :3], out[:N, 3:7]


# ----------------------------- parameters ----------------------------------

def _prep_conv(w, cin_used):
    """(Cout, Cin, kh, kw) f32 -> bf16 (round_up(kh*kw*cin_used,128), 128)
    matmul weight matching im2col's tap-major / channel-minor K ordering.
    Rows for padded input channels and cols for padded output channels are 0."""
    cout, cin, kh, kw = w.shape
    wt = jnp.transpose(w, (2, 3, 1, 0))                      # (kh, kw, Cin, Cout)
    wt = jnp.pad(wt, ((0, 0), (0, 0), (0, cin_used - cin), (0, LANES - cout)))
    wmat = wt.reshape(kh * kw * cin_used, LANES)
    Kp = _round_up(wmat.shape[0], 128)
    if Kp != wmat.shape[0]:
        wmat = jnp.pad(wmat, ((0, Kp - wmat.shape[0]), (0, 0)))
    return wmat.astype(jnp.bfloat16)


def _prep_bn(gamma, beta, mean, var, eps=1e-5):
    """Fold eval-mode BN into a per-channel affine, lane-padded to 128."""
    scale = gamma / jnp.sqrt(var + eps)
    bias = beta - mean * scale
    c = scale.shape[0]
    s = jnp.zeros((1, LANES), jnp.float32).at[0, :c].set(scale)
    b = jnp.zeros((1, LANES), jnp.float32).at[0, :c].set(bias)
    return s, b


def init_params(key, in_ch=3, widths=WIDTHS, blocks=BLOCKS):
    keys = iter(jax.random.split(key, 256))

    def conv_w(cout, cin, kh, kw):
        fan_in = cin * kh * kw
        return (jax.random.normal(next(keys), (cout, cin, kh, kw), jnp.float32)
                * jnp.sqrt(2.0 / fan_in))

    def bn_raw(c):
        gamma = 1.0 + 0.1 * jax.random.normal(next(keys), (c,), jnp.float32)
        beta = 0.1 * jax.random.normal(next(keys), (c,), jnp.float32)
        mean = 0.1 * jax.random.normal(next(keys), (c,), jnp.float32)
        var = 1.0 + 0.1 * jax.random.uniform(next(keys), (c,), jnp.float32)
        return gamma, beta, mean, var

    def layer(cout, cin, kh, kw, cin_used):
        s, b = _prep_bn(*bn_raw(cout))
        return {"w": _prep_conv(conv_w(cout, cin, kh, kw), cin_used),
                "s": s, "b": b}

    params = {"conv1": layer(widths[0], in_ch, 7, 7, in_ch)}
    stages = []
    cin = widths[0]
    for s_i, (w_, nb) in enumerate(zip(widths, blocks)):
        stage = []
        for b_i in range(nb):
            stride = 2 if (s_i > 0 and b_i == 0) else 1
            blk = {"conv1": layer(w_, cin, 3, 3, LANES),
                   "conv2": layer(w_, w_, 3, 3, LANES)}
            if stride != 1 or cin != w_:
                blk["ds"] = layer(w_, cin, 1, 1, LANES)
            stage.append(blk)
            cin = w_
        stages.append(stage)
    params["stages"] = stages

    feat_in = widths[-1]
    # kaiming_normal (fan_in, relu gain), no bias — as in ResNetSimple.__init__
    fc_pos = (jax.random.normal(next(keys), (3, feat_in), jnp.float32)
              * jnp.sqrt(2.0 / feat_in))
    fc_rot = (jax.random.normal(next(keys), (4, feat_in), jnp.float32)
              * jnp.sqrt(2.0 / feat_in))
    heads = jnp.zeros((LANES, LANES), jnp.float32)
    heads = heads.at[:feat_in, :3].set(fc_pos.T).at[:feat_in, 3:7].set(fc_rot.T)
    params["fc_heads"] = heads.astype(jnp.bfloat16)
    return params


# ----------------------------- forward --------------------------------------

def resnet_simple_forward(params, x):
    # base_model (ResNet with final fc removed); NCHW -> channels-last once.
    x_nhwc = jnp.transpose(x, (0, 2, 3, 1)).astype(jnp.bfloat16)

    rows, (N, H, W) = conv_bn_act(x_nhwc, params["conv1"],
                                  kh=7, kw=7, stride=2, pad=3, relu=True)
    rows, (N, H, W) = maxpool2d(rows.reshape(N, H, W, LANES),
                                k=3, stride=2, pad=1)

    for s_i, stage in enumerate(params["stages"]):
        for b_i, blk in enumerate(stage):
            stride = 2 if (s_i > 0 and b_i == 0) else 1
            x_in = rows.reshape(N, H, W, LANES)
            out_rows, (N, Ho, Wo) = conv_bn_act(
                x_in, blk["conv1"], kh=3, kw=3, stride=stride, pad=1, relu=True)
            if "ds" in blk:
                sc_rows, _ = conv_bn_act(
                    x_in, blk["ds"], kh=1, kw=1, stride=stride, pad=0,
                    relu=False)
            else:
                sc_rows = rows                       # identity shortcut
            rows, (N, H, W) = conv_bn_act(
                out_rows.reshape(N, Ho, Wo, LANES), blk["conv2"],
                kh=3, kw=3, stride=1, pad=1, residual=sc_rows, relu=True)

    # x.view(x.size(0), -1) + fc_position / fc_rotation, fused in one kernel.
    position, rotation = global_avgpool_heads(rows.reshape(N, H, W, LANES),
                                              params["fc_heads"])
    # dropout_rate is declared in __init__ but never applied in forward.
    return position, rotation


# ----------------------------- main ------------------------------------------

if __name__ == "__main__":
    key = jax.random.PRNGKey(0)
    pkey, xkey = jax.random.split(key)
    params = init_params(pkey)
    x = jax.random.normal(xkey, (2, 3, 32, 32), jnp.float32)  # NCHW input

    fwd = jax.jit(resnet_simple_forward)
    position, rotation = fwd(params, x)
    jax.block_until_ready((position, rotation))

    assert position.shape == (2, 3) and rotation.shape == (2, 4)
    assert bool(jnp.all(jnp.isfinite(position))) and bool(
        jnp.all(jnp.isfinite(rotation)))
    print("KERNEL_OK")
</pallas_src>

<mosaic_0001>
module attributes {stable_mosaic.version = 11 : i64} {
  func.func @_conv_bn_kernel(%arg0: i32, %arg1: memref<256x256xbf16, #tpu.memory_space<vmem>>, %arg2: memref<256x128xbf16, #tpu.memory_space<vmem>>, %arg3: memref<1x128xf32, #tpu.memory_space<vmem>>, %arg4: memref<1x128xf32, #tpu.memory_space<vmem>>, %arg5: memref<256x128xbf16, #tpu.memory_space<vmem>>) attributes {dimension_semantics = [#tpu.dimension_semantics<parallel>], iteration_bounds = array<i64: 2>, scalar_prefetch = 0 : i64, scratch_operands = 0 : i64, tpu.core_type = #tpu.core_type<tc>, window_params = [{transform_indices = @transform_0, window_bounds = array<i64: 256, 256>}, {pipeline_mode = #tpu.pipeline_mode<synchronous>, transform_indices = @transform_1, window_bounds = array<i64: 256, 128>}, {pipeline_mode = #tpu.pipeline_mode<synchronous>, transform_indices = @transform_2, window_bounds = array<i64: 1, 128>}, {pipeline_mode = #tpu.pipeline_mode<synchronous>, transform_indices = @transform_3, window_bounds = array<i64: 1, 128>}, {transform_indices = @transform_4, window_bounds = array<i64: 256, 128>}]} {
    %c0 = arith.constant 0 : index
    %c0_0 = arith.constant 0 : index
    %0 = vector.load %arg1[%c0, %c0_0] : memref<256x256xbf16, #tpu.memory_space<vmem>>, vector<256x256xbf16>
    %c0_1 = arith.constant 0 : index
    %c0_2 = arith.constant 0 : index
    %1 = vector.load %arg2[%c0_1, %c0_2] : memref<256x128xbf16, #tpu.memory_space<vmem>>, vector<256x128xbf16>
    %cst = arith.constant dense<0.000000e+00> : vector<256x128xf32>
    %2 = tpu.matmul %0, %1, %cst {dimension_numbers = #tpu.dot_dimension_numbers<[1], [0], [0], [1], [0, 0, 1, 1], [], []>} : vector<256x256xbf16>, vector<256x128xbf16>, vector<256x128xf32> -> vector<256x128xf32>
    %c0_3 = arith.constant 0 : index
    %c0_4 = arith.constant 0 : index
    %3 = vector.load %arg3[%c0_3, %c0_4] : memref<1x128xf32, #tpu.memory_space<vmem>>, vector<1x128xf32>
    %4 = vector.broadcast %3 : vector<1x128xf32> to vector<256x128xf32>
    %5 = arith.mulf %2, %4 : vector<256x128xf32>
    %c0_5 = arith.constant 0 : index
    %c0_6 = arith.constant 0 : index
    %6 = vector.load %arg4[%c0_5, %c0_6] : memref<1x128xf32, #tpu.memory_space<vmem>>, vector<1x128xf32>
    %7 = vector.broadcast %6 : vector<1x128xf32> to vector<256x128xf32>
    %8 = arith.addf %5, %7 : vector<256x128xf32>
    %cst_7 = arith.constant 0.000000e+00 : f32
    %9 = vector.broadcast %cst_7 : f32 to vector<256x128xf32>
    %10 = arith.maximumf %8, %9 : vector<256x128xf32>
    %11 = arith.truncf %10 : vector<256x128xf32> to vector<256x128xbf16>
    %c0_8 = arith.constant 0 : index
    %c0_9 = arith.constant 0 : index
    %12 = vector.load %arg5[%c0_8, %c0_9] : memref<256x128xbf16, #tpu.memory_space<vmem>>, vector<256x128xbf16>
    tpu.vector_store %arg5[%c0_8, %c0_9], %11 {strides = array<i32>} : memref<256x128xbf16, #tpu.memory_space<vmem>>, vector<256x128xbf16>,
    return
  }
  func.func @transform_0(%arg0: i32) -> (i32, i32) {
    %c0_i32 = arith.constant 0 : i32
    %c0_i32_0 = arith.constant 0 : i32
    return %arg0, %c0_i32 : i32, i32
  }
  func.func @transform_1(%arg0: i32) -> (i32, i32) {
    %c0_i32 = arith.constant 0 : i32
    %c0_i32_0 = arith.constant 0 : i32
    %c0_i32_1 = arith.constant 0 : i32
    return %c0_i32, %c0_i32_0 : i32, i32
  }
  func.func @transform_2(%arg0: i32) -> (i32, i32) {
    %c0_i32 = arith.constant 0 : i32
    %c0_i32_0 = arith.constant 0 : i32
    %c0_i32_1 = arith.constant 0 : i32
    return %c0_i32, %c0_i32_0 : i32, i32
  }
  func.func @transform_3(%arg0: i32) -> (i32, i32) {
    %c0_i32 = arith.constant 0 : i32
    %c0_i32_0 = arith.constant 0 : i32
    %c0_i32_1 = arith.constant 0 : i32
    return %c0_i32, %c0_i32_0 : i32, i32
  }
  func.func @transform_4(%arg0: i32) -> (i32, i32) {
    %c0_i32 = arith.constant 0 : i32
    %c0_i32_0 = arith.constant 0 : i32
    return %arg0, %c0_i32 : i32, i32
  }
}

module attributes {stable_mosaic.version = 11 : i64} {
  func.func @_maxpool9_kernel(%arg0: i32, %arg1: memref<128x128xbf16, #tpu.memory_space<vmem>>, %arg2: memref<128x128xbf16, #tpu.memory_space<vmem>>, %arg3: memref<128x128xbf16, #tpu.memory_space<vmem>>, %arg4: memref<128x128xbf16, #tpu.memory_space<vmem>>, %arg5: memref<128x128xbf16, #tpu.memory_space<vmem>>, %arg6: memref<128x128xbf16, #tpu.memory_space<vmem>>, %arg7: memref<128x128xbf16, #tpu.memory_space<vmem>>, %arg8: memref<128x128xbf16, #tpu.memory_space<vmem>>, %arg9: memref<128x128xbf16, #tpu.memory_space<vmem>>, %arg10: memref<128x128xbf16, #tpu.memory_space<vmem>>) attributes {dimension_semantics = [#tpu.dimension_semantics<parallel>], iteration_bounds = array<i64: 1>, scalar_prefetch = 0 : i64, scratch_operands = 0 : i64, tpu.core_type = #tpu.core_type<tc>, window_params = [{transform_indices = @transform_0, window_bounds = array<i64: 128, 128>}, {transform_indices = @transform_1, window_bounds = array<i64: 128, 128>}, {transform_indices = @transform_2, window_bounds = array<i64: 128, 128>}, {transform_indices = @transform_3, window_bounds = array<i64: 128, 128>}, {transform_indices = @transform_4, window_bounds = array<i64: 128, 128>}, {transform_indices = @transform_5, window_bounds = array<i64: 128, 128>}, {transform_indices = @transform_6, window_bounds = array<i64: 128, 128>}, {transform_indices = @transform_7, window_bounds = array<i64: 128, 128>}, {transform_indices = @transform_8, window_bounds = array<i64: 128, 128>}, {transform_indices = @transform_9, window_bounds = array<i64: 128, 128>}]} {
    %c0 = arith.constant 0 : index
    %c0_0 = arith.constant 0 : index
    %0 = vector.load %arg1[%c0, %c0_0] : memref<128x128xbf16, #tpu.memory_space<vmem>>, vector<128x128xbf16>
    %c0_1 = arith.constant 0 : index
    %c0_2 = arith.constant 0 : index
    %1 = vector.load %arg2[%c0_1, %c0_2] : memref<128x128xbf16, #tpu.memory_space<vmem>>, vector<128x128xbf16>
    %2 = arith.maximumf %0, %1 : vector<128x128xbf16>
    %c0_3 = arith.constant 0 : index
    %c0_4 = arith.constant 0 : index
    %3 = vector.load %arg3[%c0_3, %c0_4] : memref<128x128xbf16, #tpu.memory_space<vmem>>, vector<128x128xbf16>
    %4 = arith.maximumf %2, %3 : vector<128x128xbf16>
    %c0_5 = arith.constant 0 : index
    %c0_6 = arith.constant 0 : index
    %5 = vector.load %arg4[%c0_5, %c0_6] : memref<128x128xbf16, #tpu.memory_space<vmem>>, vector<128x128xbf16>
    %6 = arith.maximumf %4, %5 : vector<128x128xbf16>
    %c0_7 = arith.constant 0 : index
    %c0_8 = arith.constant 0 : index
    %7 = vector.load %arg5[%c0_7, %c0_8] : memref<128x128xbf16, #tpu.memory_space<vmem>>, vector<128x128xbf16>
    %8 = arith.maximumf %6, %7 : vector<128x128xbf16>
    %c0_9 = arith.constant 0 : index
    %c0_10 = arith.constant 0 : index
    %9 = vector.load %arg6[%c0_9, %c0_10] : memref<128x128xbf16, #tpu.memory_space<vmem>>, vector<128x128xbf16>
    %10 = arith.maximumf %8, %9 : vector<128x128xbf16>
    %c0_11 = arith.constant 0 : index
    %c0_12 = arith.constant 0 : index
    %11 = vector.load %arg7[%c0_11, %c0_12] : memref<128x128xbf16, #tpu.memory_space<vmem>>, vector<128x128xbf16>
    %12 = arith.maximumf %10, %11 : vector<128x128xbf16>
    %c0_13 = arith.constant 0 : index
    %c0_14 = arith.constant 0 : index
    %13 = vector.load %arg8[%c0_13, %c0_14] : memref<128x128xbf16, #tpu.memory_space<vmem>>, vector<128x128xbf16>
    %14 = arith.maximumf %12, %13 : vector<128x128xbf16>
    %c0_15 = arith.constant 0 : index
    %c0_16 = arith.constant 0 : index
    %15 = vector.load %arg9[%c0_15, %c0_16] : memref<128x128xbf16, #tpu.memory_space<vmem>>, vector<128x128xbf16>
    %16 = arith.maximumf %14, %15 : vector<128x128xbf16>
    %c0_17 = arith.constant 0 : index
    %c0_18 = arith.constant 0 : index
    %17 = vector.load %arg10[%c0_17, %c0_18] : memref<128x128xbf16, #tpu.memory_space<vmem>>, vector<128x128xbf16>
    tpu.vector_store %arg10[%c0_17, %c0_18], %16 {strides = array<i32>} : memref<128x128xbf16, #tpu.memory_space<vmem>>, vector<128x128xbf16>,
    return
  }
  func.func @transform_0(%arg0: i32) -> (i32, i32) {
    %c0_i32 = arith.constant 0 : i32
    %c0_i32_0 = arith.constant 0 : i32
    return %arg0, %c0_i32 : i32, i32
  }
  func.func @transform_1(%arg0: i32) -> (i32, i32) {
    %c0_i32 = arith.constant 0 : i32
    %c0_i32_0 = arith.constant 0 : i32
    return %arg0, %c0_i32 : i32, i32
  }
  func.func @transform_2(%arg0: i32) -> (i32, i32) {
    %c0_i32 = arith.constant 0 : i32
    %c0_i32_0 = arith.constant 0 : i32
    return %arg0, %c0_i32 : i32, i32
  }
  func.func @transform_3(%arg0: i32) -> (i32, i32) {
    %c0_i32 = arith.constant 0 : i32
    %c0_i32_0 = arith.constant 0 : i32
    return %arg0, %c0_i32 : i32, i32
  }
  func.func @transform_4(%arg0: i32) -> (i32, i32) {
    %c0_i32 = arith.constant 0 : i32
    %c0_i32_0 = arith.constant 0 : i32
    return %arg0, %c0_i32 : i32, i32
  }
  func.func @transform_5(%arg0: i32) -> (i32, i32) {
    %c0_i32 = arith.constant 0 : i32
    %c0_i32_0 = arith.constant 0 : i32
    return %arg0, %c0_i32 : i32, i32
  }
  func.func @transform_6(%arg0: i32) -> (i32, i32) {
    %c0_i32 = arith.constant 0 : i32
    %c0_i32_0 = arith.constant 0 : i32
    return %arg0, %c0_i32 : i32, i32
  }
  func.func @transform_7(%arg0: i32) -> (i32, i32) {
    %c0_i32 = arith.constant 0 : i32
    %c0_i32_0 = arith.constant 0 : i32
    return %arg0, %c0_i32 : i32, i32
  }
  func.func @transform_8(%arg0: i32) -> (i32, i32) {
    %c0_i32 = arith.constant 0 : i32
    %c0_i32_0 = arith.constant 0 : i32
    return %arg0, %c0_i32 : i32, i32
  }
  func.func @transform_9(%arg0: i32) -> (i32, i32) {
    %c0_i32 = arith.constant 0 : i32
    %c0_i32_0 = arith.constant 0 : i32
    return %arg0, %c0_i32 : i32, i32
  }
}

module attributes {stable_mosaic.version = 11 : i64} {
  func.func @_conv_bn_res_kernel(%arg0: i32, %arg1: memref<128x1152xbf16, #tpu.memory_space<vmem>>, %arg2: memref<1152x128xbf16, #tpu.memory_space<vmem>>, %arg3: memref<1x128xf32, #tpu.memory_space<vmem>>, %arg4: memref<1x128xf32, #tpu.memory_space<vmem>>, %arg5: memref<128x128xbf16, #tpu.memory_space<vmem>>, %arg6: memref<128x128xbf16, #tpu.memory_space<vmem>>) attributes {dimension_semantics = [#tpu.dimension_semantics<parallel>], iteration_bounds = array<i64: 1>, scalar_prefetch = 0 : i64, scratch_operands = 0 : i64, tpu.core_type = #tpu.core_type<tc>, window_params = [{transform_indices = @transform_0, window_bounds = array<i64: 128, 1152>}, {pipeline_mode = #tpu.pipeline_mode<synchronous>, transform_indices = @transform_1, window_bounds = array<i64: 1152, 128>}, {pipeline_mode = #tpu.pipeline_mode<synchronous>, transform_indices = @transform_2, window_bounds = array<i64: 1, 128>}, {pipeline_mode = #tpu.pipeline_mode<synchronous>, transform_indices = @transform_3, window_bounds = array<i64: 1, 128>}, {transform_indices = @transform_4, window_bounds = array<i64: 128, 128>}, {transform_indices = @transform_5, window_bounds = array<i64: 128, 128>}]} {
    %c0 = arith.constant 0 : index
    %c0_0 = arith.constant 0 : index
    %0 = vector.load %arg1[%c0, %c0_0] : memref<128x1152xbf16, #tpu.memory_space<vmem>>, vector<128x1152xbf16>
    %c0_1 = arith.constant 0 : index
    %c0_2 = arith.constant 0 : index
    %1 = vector.load %arg2[%c0_1, %c0_2] : memref<1152x128xbf16, #tpu.memory_space<vmem>>, vector<1152x128xbf16>
    %cst = arith.constant dense<0.000000e+00> : vector<128x128xf32>
    %2 = tpu.matmul %0, %1, %cst {dimension_numbers = #tpu.dot_dimension_numbers<[1], [0], [0], [1], [0, 0, 1, 1], [], []>} : vector<128x1152xbf16>, vector<1152x128xbf16>, vector<128x128xf32> -> vector<128x128xf32>
    %c0_3 = arith.constant 0 : index
    %c0_4 = arith.constant 0 : index
    %3 = vector.load %arg3[%c0_3, %c0_4] : memref<1x128xf32, #tpu.memory_space<vmem>>, vector<1x128xf32>
    %4 = vector.broadcast %3 : vector<1x128xf32> to vector<128x128xf32>
    %5 = arith.mulf %2, %4 : vector<128x128xf32>
    %c0_5 = arith.constant 0 : index
    %c0_6 = arith.constant 0 : index
    %6 = vector.load %arg4[%c0_5, %c0_6] : memref<1x128xf32, #tpu.memory_space<vmem>>, vector<1x128xf32>
    %7 = vector.broadcast %6 : vector<1x128xf32> to vector<128x128xf32>
    %8 = arith.addf %5, %7 : vector<128x128xf32>
    %c0_7 = arith.constant 0 : index
    %c0_8 = arith.constant 0 : index
    %9 = vector.load %arg5[%c0_7, %c0_8] : memref<128x128xbf16, #tpu.memory_space<vmem>>, vector<128x128xbf16>
    %10 = arith.extf %9 : vector<128x128xbf16> to vector<128x128xf32>
    %11 = arith.addf %8, %10 : vector<128x128xf32>
    %cst_9 = arith.constant 0.000000e+00 : f32
    %12 = vector.broadcast %cst_9 : f32 to vector<128x128xf32>
    %13 = arith.maximumf %11, %12 : vector<128x128xf32>
    %14 = arith.truncf %13 : vector<128x128xf32> to vector<128x128xbf16>
    %c0_10 = arith.constant 0 : index
    %c0_11 = arith.constant 0 : index
    %15 = vector.load %arg6[%c0_10, %c0_11] : memref<128x128xbf16, #tpu.memory_space<vmem>>, vector<128x128xbf16>
    tpu.vector_store %arg6[%c0_10, %c0_11], %14 {strides = array<i32>} : memref<128x128xbf16, #tpu.memory_space<vmem>>, vector<128x128xbf16>,
    return
  }
  func.func @transform_0(%arg0: i32) -> (i32, i32) {
    %c0_i32 = arith.constant 0 : i32
    %c0_i32_0 = arith.constant 0 : i32
    return %arg0, %c0_i32 : i32, i32
  }
  func.func @transform_1(%arg0: i32) -> (i32, i32) {
    %c0_i32 = arith.constant 0 : i32
    %c0_i32_0 = arith.constant 0 : i32
    %c0_i32_1 = arith.constant 0 : i32
    return %c0_i32, %c0_i32_0 : i32, i32
  }
  func.func @transform_2(%arg0: i32) -> (i32, i32) {
    %c0_i32 = arith.constant 0 : i32
    %c0_i32_0 = arith.constant 0 : i32
    %c0_i32_1 = arith.constant 0 : i32
    return %c0_i32, %c0_i32_0 : i32, i32
  }
  func.func @transform_3(%arg0: i32) -> (i32, i32) {
    %c0_i32 = arith.constant 0 : i32
    %c0_i32_0 = arith.constant 0 : i32
    %c0_i32_1 = arith.constant 0 : i32
    return %c0_i32, %c0_i32_0 : i32, i32
  }
  func.func @transform_4(%arg0: i32) -> (i32, i32) {
    %c0_i32 = arith.constant 0 : i32
    %c0_i32_0 = arith.constant 0 : i32
    return %arg0, %c0_i32 : i32, i32
  }
  func.func @transform_5(%arg0: i32) -> (i32, i32) {
    %c0_i32 = arith.constant 0 : i32
    %c0_i32_0 = arith.constant 0 : i32
    return %arg0, %c0_i32 : i32, i32
  }
}

module attributes {stable_mosaic.version = 11 : i64} {
  func.func @_conv_bn_kernel(%arg0: i32, %arg1: memref<128x1152xbf16, #tpu.memory_space<vmem>>, %arg2: memref<1152x128xbf16, #tpu.memory_space<vmem>>, %arg3: memref<1x128xf32, #tpu.memory_space<vmem>>, %arg4: memref<1x128xf32, #tpu.memory_space<vmem>>, %arg5: memref<128x128xbf16, #tpu.memory_space<vmem>>) attributes {dimension_semantics = [#tpu.dimension_semantics<parallel>], iteration_bounds = array<i64: 1>, scalar_prefetch = 0 : i64, scratch_operands = 0 : i64, tpu.core_type = #tpu.core_type<tc>, window_params = [{transform_indices = @transform_0, window_bounds = array<i64: 128, 1152>}, {pipeline_mode = #tpu.pipeline_mode<synchronous>, transform_indices = @transform_1, window_bounds = array<i64: 1152, 128>}, {pipeline_mode = #tpu.pipeline_mode<synchronous>, transform_indices = @transform_2, window_bounds = array<i64: 1, 128>}, {pipeline_mode = #tpu.pipeline_mode<synchronous>, transform_indices = @transform_3, window_bounds = array<i64: 1, 128>}, {transform_indices = @transform_4, window_bounds = array<i64: 128, 128>}]} {
    %c0 = arith.constant 0 : index
    %c0_0 = arith.constant 0 : index
    %0 = vector.load %arg1[%c0, %c0_0] : memref<128x1152xbf16, #tpu.memory_space<vmem>>, vector<128x1152xbf16>
    %c0_1 = arith.constant 0 : index
    %c0_2 = arith.constant 0 : index
    %1 = vector.load %arg2[%c0_1, %c0_2] : memref<1152x128xbf16, #tpu.memory_space<vmem>>, vector<1152x128xbf16>
    %cst = arith.constant dense<0.000000e+00> : vector<128x128xf32>
    %2 = tpu.matmul %0, %1, %cst {dimension_numbers = #tpu.dot_dimension_numbers<[1], [0], [0], [1], [0, 0, 1, 1], [], []>} : vector<128x1152xbf16>, vector<1152x128xbf16>, vector<128x128xf32> -> vector<128x128xf32>
    %c0_3 = arith.constant 0 : index
    %c0_4 = arith.constant 0 : index
    %3 = vector.load %arg3[%c0_3, %c0_4] : memref<1x128xf32, #tpu.memory_space<vmem>>, vector<1x128xf32>
    %4 = vector.broadcast %3 : vector<1x128xf32> to vector<128x128xf32>
    %5 = arith.mulf %2, %4 : vector<128x128xf32>
    %c0_5 = arith.constant 0 : index
    %c0_6 = arith.constant 0 : index
    %6 = vector.load %arg4[%c0_5, %c0_6] : memref<1x128xf32, #tpu.memory_space<vmem>>, vector<1x128xf32>
    %7 = vector.broadcast %6 : vector<1x128xf32> to vector<128x128xf32>
    %8 = arith.addf %5, %7 : vector<128x128xf32>
    %cst_7 = arith.constant 0.000000e+00 : f32
    %9 = vector.broadcast %cst_7 : f32 to vector<128x128xf32>
    %10 = arith.maximumf %8, %9 : vector<128x128xf32>
    %11 = arith.truncf %10 : vector<128x128xf32> to vector<128x128xbf16>
    %c0_8 = arith.constant 0 : index
    %c0_9 = arith.constant 0 : index
    %12 = vector.load %arg5[%c0_8, %c0_9] : memref<128x128xbf16, #tpu.memory_space<vmem>>, vector<128x128xbf16>
    tpu.vector_store %arg5[%c0_8, %c0_9], %11 {strides = array<i32>} : memref<128x128xbf16, #tpu.memory_space<vmem>>, vector<128x128xbf16>,
    return
  }
  func.func @transform_0(%arg0: i32) -> (i32, i32) {
    %c0_i32 = arith.constant 0 : i32
    %c0_i32_0 = arith.constant 0 : i32
    return %arg0, %c0_i32 : i32, i32
  }
  func.func @transform_1(%arg0: i32) -> (i32, i32) {
    %c0_i32 = arith.constant 0 : i32
    %c0_i32_0 = arith.constant 0 : i32
    %c0_i32_1 = arith.constant 0 : i32
    return %c0_i32, %c0_i32_0 : i32, i32
  }
  func.func @transform_2(%arg0: i32) -> (i32, i32) {
    %c0_i32 = arith.constant 0 : i32
    %c0_i32_0 = arith.constant 0 : i32
    %c0_i32_1 = arith.constant 0 : i32
    return %c0_i32, %c0_i32_0 : i32, i32
  }
  func.func @transform_3(%arg0: i32) -> (i32, i32) {
    %c0_i32 = arith.constant 0 : i32
    %c0_i32_0 = arith.constant 0 : i32
    %c0_i32_1 = arith.constant 0 : i32
    return %c0_i32, %c0_i32_0 : i32, i32
  }
  func.func @transform_4(%arg0: i32) -> (i32, i32) {
    %c0_i32 = arith.constant 0 : i32
    %c0_i32_0 = arith.constant 0 : i32
    return %arg0, %c0_i32 : i32, i32
  }
}

module attributes {stable_mosaic.version = 11 : i64} {
  func.func @_conv_bn_kernel(%arg0: i32, %arg1: memref<32x1152xbf16, #tpu.memory_space<vmem>>, %arg2: memref<1152x128xbf16, #tpu.memory_space<vmem>>, %arg3: memref<1x128xf32, #tpu.memory_space<vmem>>, %arg4: memref<1x128xf32, #tpu.memory_space<vmem>>, %arg5: memref<32x128xbf16, #tpu.memory_space<vmem>>) attributes {dimension_semantics = [#tpu.dimension_semantics<parallel>], iteration_bounds = array<i64: 1>, scalar_prefetch = 0 : i64, scratch_operands = 0 : i64, tpu.core_type = #tpu.core_type<tc>, window_params = [{transform_indices = @transform_0, window_bounds = array<i64: 32, 1152>}, {pipeline_mode = #tpu.pipeline_mode<synchronous>, transform_indices = @transform_1, window_bounds = array<i64: 1152, 128>}, {pipeline_mode = #tpu.pipeline_mode<synchronous>, transform_indices = @transform_2, window_bounds = array<i64: 1, 128>}, {pipeline_mode = #tpu.pipeline_mode<synchronous>, transform_indices = @transform_3, window_bounds = array<i64: 1, 128>}, {transform_indices = @transform_4, window_bounds = array<i64: 32, 128>}]} {
    %c0 = arith.constant 0 : index
    %c0_0 = arith.constant 0 : index
    %0 = vector.load %arg1[%c0, %c0_0] : memref<32x1152xbf16, #tpu.memory_space<vmem>>, vector<32x1152xbf16>
    %c0_1 = arith.constant 0 : index
    %c0_2 = arith.constant 0 : index
    %1 = vector.load %arg2[%c0_1, %c0_2] : memref<1152x128xbf16, #tpu.memory_space<vmem>>, vector<1152x128xbf16>
    %cst = arith.constant dense<0.000000e+00> : vector<32x128xf32>
    %2 = tpu.matmul %0, %1, %cst {dimension_numbers = #tpu.dot_dimension_numbers<[1], [0], [0], [1], [0, 0, 1, 1], [], []>} : vector<32x1152xbf16>, vector<1152x128xbf16>, vector<32x128xf32> -> vector<32x128xf32>
    %c0_3 = arith.constant 0 : index
    %c0_4 = arith.constant 0 : index
    %3 = vector.load %arg3[%c0_3, %c0_4] : memref<1x128xf32, #tpu.memory_space<vmem>>, vector<1x128xf32>
    %4 = vector.broadcast %3 : vector<1x128xf32> to vector<32x128xf32>
    %5 = arith.mulf %2, %4 : vector<32x128xf32>
    %c0_5 = arith.constant 0 : index
    %c0_6 = arith.constant 0 : index
    %6 = vector.load %arg4[%c0_5, %c0_6] : memref<1x128xf32, #tpu.memory_space<vmem>>, vector<1x128xf32>
    %7 = vector.broadcast %6 : vector<1x128xf32> to vector<32x128xf32>
    %8 = arith.addf %5, %7 : vector<32x128xf32>
    %cst_7 = arith.constant 0.000000e+00 : f32
    %9 = vector.broadcast %cst_7 : f32 to vector<32x128xf32>
    %10 = arith.maximumf %8, %9 : vector<32x128xf32>
    %11 = arith.truncf %10 : vector<32x128xf32> to vector<32x128xbf16>
    %c0_8 = arith.constant 0 : index
    %c0_9 = arith.constant 0 : index
    %12 = vector.load %arg5[%c0_8, %c0_9] : memref<32x128xbf16, #tpu.memory_space<vmem>>, vector<32x128xbf16>
    tpu.vector_store %arg5[%c0_8, %c0_9], %11 {strides = array<i32>} : memref<32x128xbf16, #tpu.memory_space<vmem>>, vector<32x128xbf16>,
    return
  }
  func.func @transform_0(%arg0: i32) -> (i32, i32) {
    %c0_i32 = arith.constant 0 : i32
    %c0_i32_0 = arith.constant 0 : i32
    return %arg0, %c0_i32 : i32, i32
  }
  func.func @transform_1(%arg0: i32) -> (i32, i32) {
    %c0_i32 = arith.constant 0 : i32
    %c0_i32_0 = arith.constant 0 : i32
    %c0_i32_1 = arith.constant 0 : i32
    return %c0_i32, %c0_i32_0 : i32, i32
  }
  func.func @transform_2(%arg0: i32) -> (i32, i32) {
    %c0_i32 = arith.constant 0 : i32
    %c0_i32_0 = arith.constant 0 : i32
    %c0_i32_1 = arith.constant 0 : i32
    return %c0_i32, %c0_i32_0 : i32, i32
  }
  func.func @transform_3(%arg0: i32) -> (i32, i32) {
    %c0_i32 = arith.constant 0 : i32
    %c0_i32_0 = arith.constant 0 : i32
    %c0_i32_1 = arith.constant 0 : i32
    return %c0_i32, %c0_i32_0 : i32, i32
  }
  func.func @transform_4(%arg0: i32) -> (i32, i32) {
    %c0_i32 = arith.constant 0 : i32
    %c0_i32_0 = arith.constant 0 : i32
    return %arg0, %c0_i32 : i32, i32
  }
}

module attributes {stable_mosaic.version = 11 : i64} {
  func.func @_conv_bn_kernel(%arg0: i32, %arg1: memref<32x128xbf16, #tpu.memory_space<vmem>>, %arg2: memref<128x128xbf16, #tpu.memory_space<vmem>>, %arg3: memref<1x128xf32, #tpu.memory_space<vmem>>, %arg4: memref<1x128xf32, #tpu.memory_space<vmem>>, %arg5: memref<32x128xbf16, #tpu.memory_space<vmem>>) attributes {dimension_semantics = [#tpu.dimension_semantics<parallel>], iteration_bounds = array<i64: 1>, scalar_prefetch = 0 : i64, scratch_operands = 0 : i64, tpu.core_type = #tpu.core_type<tc>, window_params = [{transform_indices = @transform_0, window_bounds = array<i64: 32, 128>}, {pipeline_mode = #tpu.pipeline_mode<synchronous>, transform_indices = @transform_1, window_bounds = array<i64: 128, 128>}, {pipeline_mode = #tpu.pipeline_mode<synchronous>, transform_indices = @transform_2, window_bounds = array<i64: 1, 128>}, {pipeline_mode = #tpu.pipeline_mode<synchronous>, transform_indices = @transform_3, window_bounds = array<i64: 1, 128>}, {transform_indices = @transform_4, window_bounds = array<i64: 32, 128>}]} {
    %c0 = arith.constant 0 : index
    %c0_0 = arith.constant 0 : index
    %0 = vector.load %arg1[%c0, %c0_0] : memref<32x128xbf16, #tpu.memory_space<vmem>>, vector<32x128xbf16>
    %c0_1 = arith.constant 0 : index
    %c0_2 = arith.constant 0 : index
    %1 = vector.load %arg2[%c0_1, %c0_2] : memref<128x128xbf16, #tpu.memory_space<vmem>>, vector<128x128xbf16>
    %cst = arith.constant dense<0.000000e+00> : vector<32x128xf32>
    %2 = tpu.matmul %0, %1, %cst {dimension_numbers = #tpu.dot_dimension_numbers<[1], [0], [0], [1], [0, 0, 1, 1], [], []>} : vector<32x128xbf16>, vector<128x128xbf16>, vector<32x128xf32> -> vector<32x128xf32>
    %c0_3 = arith.constant 0 : index
    %c0_4 = arith.constant 0 : index
    %3 = vector.load %arg3[%c0_3, %c0_4] : memref<1x128xf32, #tpu.memory_space<vmem>>, vector<1x128xf32>
    %4 = vector.broadcast %3 : vector<1x128xf32> to vector<32x128xf32>
    %5 = arith.mulf %2, %4 : vector<32x128xf32>
    %c0_5 = arith.constant 0 : index
    %c0_6 = arith.constant 0 : index
    %6 = vector.load %arg4[%c0_5, %c0_6] : memref<1x128xf32, #tpu.memory_space<vmem>>, vector<1x128xf32>
    %7 = vector.broadcast %6 : vector<1x128xf32> to vector<32x128xf32>
    %8 = arith.addf %5, %7 : vector<32x128xf32>
    %9 = arith.truncf %8 : vector<32x128xf32> to vector<32x128xbf16>
    %c0_7 = arith.constant 0 : index
    %c0_8 = arith.constant 0 : index
    %10 = vector.load %arg5[%c0_7, %c0_8] : memref<32x128xbf16, #tpu.memory_space<vmem>>, vector<32x128xbf16>
    tpu.vector_store %arg5[%c0_7, %c0_8], %9 {strides = array<i32>} : memref<32x128xbf16, #tpu.memory_space<vmem>>, vector<32x128xbf16>,
    return
  }
  func.func @transform_0(%arg0: i32) -> (i32, i32) {
    %c0_i32 = arith.constant 0 : i32
    %c0_i32_0 = arith.constant 0 : i32
    return %arg0, %c0_i32 : i32, i32
  }
  func.func @transform_1(%arg0: i32) -> (i32, i32) {
    %c0_i32 = arith.constant 0 : i32
    %c0_i32_0 = arith.constant 0 : i32
    %c0_i32_1 = arith.constant 0 : i32
    return %c0_i32, %c0_i32_0 : i32, i32
  }
  func.func @transform_2(%arg0: i32) -> (i32, i32) {
    %c0_i32 = arith.constant 0 : i32
    %c0_i32_0 = arith.constant 0 : i32
    %c0_i32_1 = arith.constant 0 : i32
    return %c0_i32, %c0_i32_0 : i32, i32
  }
  func.func @transform_3(%arg0: i32) -> (i32, i32) {
    %c0_i32 = arith.constant 0 : i32
    %c0_i32_0 = arith.constant 0 : i32
    %c0_i32_1 = arith.constant 0 : i32
    return %c0_i32, %c0_i32_0 : i32, i32
  }
  func.func @transform_4(%arg0: i32) -> (i32, i32) {
    %c0_i32 = arith.constant 0 : i32
    %c0_i32_0 = arith.constant 0 : i32
    return %arg0, %c0_i32 : i32, i32
  }
}

module attributes {stable_mosaic.version = 11 : i64} {
  func.func @_conv_bn_res_kernel(%arg0: i32, %arg1: memref<32x1152xbf16, #tpu.memory_space<vmem>>, %arg2: memref<1152x128xbf16, #tpu.memory_space<vmem>>, %arg3: memref<1x128xf32, #tpu.memory_space<vmem>>, %arg4: memref<1x128xf32, #tpu.memory_space<vmem>>, %arg5: memref<32x128xbf16, #tpu.memory_space<vmem>>, %arg6: memref<32x128xbf16, #tpu.memory_space<vmem>>) attributes {dimension_semantics = [#tpu.dimension_semantics<parallel>], iteration_bounds = array<i64: 1>, scalar_prefetch = 0 : i64, scratch_operands = 0 : i64, tpu.core_type = #tpu.core_type<tc>, window_params = [{transform_indices = @transform_0, window_bounds = array<i64: 32, 1152>}, {pipeline_mode = #tpu.pipeline_mode<synchronous>, transform_indices = @transform_1, window_bounds = array<i64: 1152, 128>}, {pipeline_mode = #tpu.pipeline_mode<synchronous>, transform_indices = @transform_2, window_bounds = array<i64: 1, 128>}, {pipeline_mode = #tpu.pipeline_mode<synchronous>, transform_indices = @transform_3, window_bounds = array<i64: 1, 128>}, {transform_indices = @transform_4, window_bounds = array<i64: 32, 128>}, {transform_indices = @transform_5, window_bounds = array<i64: 32, 128>}]} {
    %c0 = arith.constant 0 : index
    %c0_0 = arith.constant 0 : index
    %0 = vector.load %arg1[%c0, %c0_0] : memref<32x1152xbf16, #tpu.memory_space<vmem>>, vector<32x1152xbf16>
    %c0_1 = arith.constant 0 : index
    %c0_2 = arith.constant 0 : index
    %1 = vector.load %arg2[%c0_1, %c0_2] : memref<1152x128xbf16, #tpu.memory_space<vmem>>, vector<1152x128xbf16>
    %cst = arith.constant dense<0.000000e+00> : vector<32x128xf32>
    %2 = tpu.matmul %0, %1, %cst {dimension_numbers = #tpu.dot_dimension_numbers<[1], [0], [0], [1], [0, 0, 1, 1], [], []>} : vector<32x1152xbf16>, vector<1152x128xbf16>, vector<32x128xf32> -> vector<32x128xf32>
    %c0_3 = arith.constant 0 : index
    %c0_4 = arith.constant 0 : index
    %3 = vector.load %arg3[%c0_3, %c0_4] : memref<1x128xf32, #tpu.memory_space<vmem>>, vector<1x128xf32>
    %4 = vector.broadcast %3 : vector<1x128xf32> to vector<32x128xf32>
    %5 = arith.mulf %2, %4 : vector<32x128xf32>
    %c0_5 = arith.constant 0 : index
    %c0_6 = arith.constant 0 : index
    %6 = vector.load %arg4[%c0_5, %c0_6] : memref<1x128xf32, #tpu.memory_space<vmem>>, vector<1x128xf32>
    %7 = vector.broadcast %6 : vector<1x128xf32> to vector<32x128xf32>
    %8 = arith.addf %5, %7 : vector<32x128xf32>
    %c0_7 = arith.constant 0 : index
    %c0_8 = arith.constant 0 : index
    %9 = vector.load %arg5[%c0_7, %c0_8] : memref<32x128xbf16, #tpu.memory_space<vmem>>, vector<32x128xbf16>
    %10 = arith.extf %9 : vector<32x128xbf16> to vector<32x128xf32>
    %11 = arith.addf %8, %10 : vector<32x128xf32>
    %cst_9 = arith.constant 0.000000e+00 : f32
    %12 = vector.broadcast %cst_9 : f32 to vector<32x128xf32>
    %13 = arith.maximumf %11, %12 : vector<32x128xf32>
    %14 = arith.truncf %13 : vector<32x128xf32> to vector<32x128xbf16>
    %c0_10 = arith.constant 0 : index
    %c0_11 = arith.constant 0 : index
    %15 = vector.load %arg6[%c0_10, %c0_11] : memref<32x128xbf16, #tpu.memory_space<vmem>>, vector<32x128xbf16>
    tpu.vector_store %arg6[%c0_10, %c0_11], %14 {strides = array<i32>} : memref<32x128xbf16, #tpu.memory_space<vmem>>, vector<32x128xbf16>,
    return
  }
  func.func @transform_0(%arg0: i32) -> (i32, i32) {
    %c0_i32 = arith.constant 0 : i32
    %c0_i32_0 = arith.constant 0 : i32
    return %arg0, %c0_i32 : i32, i32
  }
  func.func @transform_1(%arg0: i32) -> (i32, i32) {
    %c0_i32 = arith.constant 0 : i32
    %c0_i32_0 = arith.constant 0 : i32
    %c0_i32_1 = arith.constant 0 : i32
    return %c0_i32, %c0_i32_0 : i32, i32
  }
  func.func @transform_2(%arg0: i32) -> (i32, i32) {
    %c0_i32 = arith.constant 0 : i32
    %c0_i32_0 = arith.constant 0 : i32
    %c0_i32_1 = arith.constant 0 : i32
    return %c0_i32, %c0_i32_0 : i32, i32
  }
  func.func @transform_3(%arg0: i32) -> (i32, i32) {
    %c0_i32 = arith.constant 0 : i32
    %c0_i32_0 = arith.constant 0 : i32
    %c0_i32_1 = arith.constant 0 : i32
    return %c0_i32, %c0_i32_0 : i32, i32
  }
  func.func @transform_4(%arg0: i32) -> (i32, i32) {
    %c0_i32 = arith.constant 0 : i32
    %c0_i32_0 = arith.constant 0 : i32
    return %arg0, %c0_i32 : i32, i32
  }
  func.func @transform_5(%arg0: i32) -> (i32, i32) {
    %c0_i32 = arith.constant 0 : i32
    %c0_i32_0 = arith.constant 0 : i32
    return %arg0, %c0_i32 : i32, i32
  }
}

module attributes {stable_mosaic.version = 11 : i64} {
  func.func @_conv_bn_kernel(%arg0: i32, %arg1: memref<8x1152xbf16, #tpu.memory_space<vmem>>, %arg2: memref<1152x128xbf16, #tpu.memory_space<vmem>>, %arg3: memref<1x128xf32, #tpu.memory_space<vmem>>, %arg4: memref<1x128xf32, #tpu.memory_space<vmem>>, %arg5: memref<8x128xbf16, #tpu.memory_space<vmem>>) attributes {dimension_semantics = [#tpu.dimension_semantics<parallel>], iteration_bounds = array<i64: 1>, scalar_prefetch = 0 : i64, scratch_operands = 0 : i64, tpu.core_type = #tpu.core_type<tc>, window_params = [{transform_indices = @transform_0, window_bounds = array<i64: 8, 1152>}, {pipeline_mode = #tpu.pipeline_mode<synchronous>, transform_indices = @transform_1, window_bounds = array<i64: 1152, 128>}, {pipeline_mode = #tpu.pipeline_mode<synchronous>, transform_indices = @transform_2, window_bounds = array<i64: 1, 128>}, {pipeline_mode = #tpu.pipeline_mode<synchronous>, transform_indices = @transform_3, window_bounds = array<i64: 1, 128>}, {transform_indices = @transform_4, window_bounds = array<i64: 8, 128>}]} {
    %c0 = arith.constant 0 : index
    %c0_0 = arith.constant 0 : index
    %0 = vector.load %arg1[%c0, %c0_0] : memref<8x1152xbf16, #tpu.memory_space<vmem>>, vector<8x1152xbf16>
    %c0_1 = arith.constant 0 : index
    %c0_2 = arith.constant 0 : index
    %1 = vector.load %arg2[%c0_1, %c0_2] : memref<1152x128xbf16, #tpu.memory_space<vmem>>, vector<1152x128xbf16>
    %cst = arith.constant dense<0.000000e+00> : vector<8x128xf32>
    %2 = tpu.matmul %0, %1, %cst {dimension_numbers = #tpu.dot_dimension_numbers<[1], [0], [0], [1], [0, 0, 1, 1], [], []>} : vector<8x1152xbf16>, vector<1152x128xbf16>, vector<8x128xf32> -> vector<8x128xf32>
    %c0_3 = arith.constant 0 : index
    %c0_4 = arith.constant 0 : index
    %3 = vector.load %arg3[%c0_3, %c0_4] : memref<1x128xf32, #tpu.memory_space<vmem>>, vector<1x128xf32>
    %4 = vector.broadcast %3 : vector<1x128xf32> to vector<8x128xf32>
    %5 = arith.mulf %2, %4 : vector<8x128xf32>
    %c0_5 = arith.constant 0 : index
    %c0_6 = arith.constant 0 : index
    %6 = vector.load %arg4[%c0_5, %c0_6] : memref<1x128xf32, #tpu.memory_space<vmem>>, vector<1x128xf32>
    %7 = vector.broadcast %6 : vector<1x128xf32> to vector<8x128xf32>
    %8 = arith.addf %5, %7 : vector<8x128xf32>
    %cst_7 = arith.constant 0.000000e+00 : f32
    %9 = vector.broadcast %cst_7 : f32 to vector<8x128xf32>
    %10 = arith.maximumf %8, %9 : vector<8x128xf32>
    %11 = arith.truncf %10 : vector<8x128xf32> to vector<8x128xbf16>
    %c0_8 = arith.constant 0 : index
    %c0_9 = arith.constant 0 : index
    %12 = vector.load %arg5[%c0_8, %c0_9] : memref<8x128xbf16, #tpu.memory_space<vmem>>, vector<8x128xbf16>
    tpu.vector_store %arg5[%c0_8, %c0_9], %11 {strides = array<i32>} : memref<8x128xbf16, #tpu.memory_space<vmem>>, vector<8x128xbf16>,
    return
  }
  func.func @transform_0(%arg0: i32) -> (i32, i32) {
    %c0_i32 = arith.constant 0 : i32
    %c0_i32_0 = arith.constant 0 : i32
    return %arg0, %c0_i32 : i32, i32
  }
  func.func @transform_1(%arg0: i32) -> (i32, i32) {
    %c0_i32 = arith.constant 0 : i32
    %c0_i32_0 = arith.constant 0 : i32
    %c0_i32_1 = arith.constant 0 : i32
    return %c0_i32, %c0_i32_0 : i32, i32
  }
  func.func @transform_2(%arg0: i32) -> (i32, i32) {
    %c0_i32 = arith.constant 0 : i32
    %c0_i32_0 = arith.constant 0 : i32
    %c0_i32_1 = arith.constant 0 : i32
    return %c0_i32, %c0_i32_0 : i32, i32
  }
  func.func @transform_3(%arg0: i32) -> (i32, i32) {
    %c0_i32 = arith.constant 0 : i32
    %c0_i32_0 = arith.constant 0 : i32
    %c0_i32_1 = arith.constant 0 : i32
    return %c0_i32, %c0_i32_0 : i32, i32
  }
  func.func @transform_4(%arg0: i32) -> (i32, i32) {
    %c0_i32 = arith.constant 0 : i32
    %c0_i32_0 = arith.constant 0 : i32
    return %arg0, %c0_i32 : i32, i32
  }
}

module attributes {stable_mosaic.version = 11 : i64} {
  func.func @_conv_bn_kernel(%arg0: i32, %arg1: memref<8x128xbf16, #tpu.memory_space<vmem>>, %arg2: memref<128x128xbf16, #tpu.memory_space<vmem>>, %arg3: memref<1x128xf32, #tpu.memory_space<vmem>>, %arg4: memref<1x128xf32, #tpu.memory_space<vmem>>, %arg5: memref<8x128xbf16, #tpu.memory_space<vmem>>) attributes {dimension_semantics = [#tpu.dimension_semantics<parallel>], iteration_bounds = array<i64: 1>, scalar_prefetch = 0 : i64, scratch_operands = 0 : i64, tpu.core_type = #tpu.core_type<tc>, window_params = [{transform_indices = @transform_0, window_bounds = array<i64: 8, 128>}, {pipeline_mode = #tpu.pipeline_mode<synchronous>, transform_indices = @transform_1, window_bounds = array<i64: 128, 128>}, {pipeline_mode = #tpu.pipeline_mode<synchronous>, transform_indices = @transform_2, window_bounds = array<i64: 1, 128>}, {pipeline_mode = #tpu.pipeline_mode<synchronous>, transform_indices = @transform_3, window_bounds = array<i64: 1, 128>}, {transform_indices = @transform_4, window_bounds = array<i64: 8, 128>}]} {
    %c0 = arith.constant 0 : index
    %c0_0 = arith.constant 0 : index
    %0 = vector.load %arg1[%c0, %c0_0] : memref<8x128xbf16, #tpu.memory_space<vmem>>, vector<8x128xbf16>
    %c0_1 = arith.constant 0 : index
    %c0_2 = arith.constant 0 : index
    %1 = vector.load %arg2[%c0_1, %c0_2] : memref<128x128xbf16, #tpu.memory_space<vmem>>, vector<128x128xbf16>
    %cst = arith.constant dense<0.000000e+00> : vector<8x128xf32>
    %2 = tpu.matmul %0, %1, %cst {dimension_numbers = #tpu.dot_dimension_numbers<[1], [0], [0], [1], [0, 0, 1, 1], [], []>} : vector<8x128xbf16>, vector<128x128xbf16>, vector<8x128xf32> -> vector<8x128xf32>
    %c0_3 = arith.constant 0 : index
    %c0_4 = arith.constant 0 : index
    %3 = vector.load %arg3[%c0_3, %c0_4] : memref<1x128xf32, #tpu.memory_space<vmem>>, vector<1x128xf32>
    %4 = vector.broadcast %3 : vector<1x128xf32> to vector<8x128xf32>
    %5 = arith.mulf %2, %4 : vector<8x128xf32>
    %c0_5 = arith.constant 0 : index
    %c0_6 = arith.constant 0 : index
    %6 = vector.load %arg4[%c0_5, %c0_6] : memref<1x128xf32, #tpu.memory_space<vmem>>, vector<1x128xf32>
    %7 = vector.broadcast %6 : vector<1x128xf32> to vector<8x128xf32>
    %8 = arith.addf %5, %7 : vector<8x128xf32>
    %9 = arith.truncf %8 : vector<8x128xf32> to vector<8x128xbf16>
    %c0_7 = arith.constant 0 : index
    %c0_8 = arith.constant 0 : index
    %10 = vector.load %arg5[%c0_7, %c0_8] : memref<8x128xbf16, #tpu.memory_space<vmem>>, vector<8x128xbf16>
    tpu.vector_store %arg5[%c0_7, %c0_8], %9 {strides = array<i32>} : memref<8x128xbf16, #tpu.memory_space<vmem>>, vector<8x128xbf16>,
    return
  }
  func.func @transform_0(%arg0: i32) -> (i32, i32) {
    %c0_i32 = arith.constant 0 : i32
    %c0_i32_0 = arith.constant 0 : i32
    return %arg0, %c0_i32 : i32, i32
  }
  func.func @transform_1(%arg0: i32) -> (i32, i32) {
    %c0_i32 = arith.constant 0 : i32
    %c0_i32_0 = arith.constant 0 : i32
    %c0_i32_1 = arith.constant 0 : i32
    return %c0_i32, %c0_i32_0 : i32, i32
  }
  func.func @transform_2(%arg0: i32) -> (i32, i32) {
    %c0_i32 = arith.constant 0 : i32
    %c0_i32_0 = arith.constant 0 : i32
    %c0_i32_1 = arith.constant 0 : i32
    return %c0_i32, %c0_i32_0 : i32, i32
  }
  func.func @transform_3(%arg0: i32) -> (i32, i32) {
    %c0_i32 = arith.constant 0 : i32
    %c0_i32_0 = arith.constant 0 : i32
    %c0_i32_1 = arith.constant 0 : i32
    return %c0_i32, %c0_i32_0 : i32, i32
  }
  func.func @transform_4(%arg0: i32) -> (i32, i32) {
    %c0_i32 = arith.constant 0 : i32
    %c0_i32_0 = arith.constant 0 : i32
    return %arg0, %c0_i32 : i32, i32
  }
}

module attributes {stable_mosaic.version = 11 : i64} {
  func.func @_conv_bn_res_kernel(%arg0: i32, %arg1: memref<8x1152xbf16, #tpu.memory_space<vmem>>, %arg2: memref<1152x128xbf16, #tpu.memory_space<vmem>>, %arg3: memref<1x128xf32, #tpu.memory_space<vmem>>, %arg4: memref<1x128xf32, #tpu.memory_space<vmem>>, %arg5: memref<8x128xbf16, #tpu.memory_space<vmem>>, %arg6: memref<8x128xbf16, #tpu.memory_space<vmem>>) attributes {dimension_semantics = [#tpu.dimension_semantics<parallel>], iteration_bounds = array<i64: 1>, scalar_prefetch = 0 : i64, scratch_operands = 0 : i64, tpu.core_type = #tpu.core_type<tc>, window_params = [{transform_indices = @transform_0, window_bounds = array<i64: 8, 1152>}, {pipeline_mode = #tpu.pipeline_mode<synchronous>, transform_indices = @transform_1, window_bounds = array<i64: 1152, 128>}, {pipeline_mode = #tpu.pipeline_mode<synchronous>, transform_indices = @transform_2, window_bounds = array<i64: 1, 128>}, {pipeline_mode = #tpu.pipeline_mode<synchronous>, transform_indices = @transform_3, window_bounds = array<i64: 1, 128>}, {transform_indices = @transform_4, window_bounds = array<i64: 8, 128>}, {transform_indices = @transform_5, window_bounds = array<i64: 8, 128>}]} {
    %c0 = arith.constant 0 : index
    %c0_0 = arith.constant 0 : index
    %0 = vector.load %arg1[%c0, %c0_0] : memref<8x1152xbf16, #tpu.memory_space<vmem>>, vector<8x1152xbf16>
    %c0_1 = arith.constant 0 : index
    %c0_2 = arith.constant 0 : index
    %1 = vector.load %arg2[%c0_1, %c0_2] : memref<1152x128xbf16, #tpu.memory_space<vmem>>, vector<1152x128xbf16>
    %cst = arith.constant dense<0.000000e+00> : vector<8x128xf32>
    %2 = tpu.matmul %0, %1, %cst {dimension_numbers = #tpu.dot_dimension_numbers<[1], [0], [0], [1], [0, 0, 1, 1], [], []>} : vector<8x1152xbf16>, vector<1152x128xbf16>, vector<8x128xf32> -> vector<8x128xf32>
    %c0_3 = arith.constant 0 : index
    %c0_4 = arith.constant 0 : index
    %3 = vector.load %arg3[%c0_3, %c0_4] : memref<1x128xf32, #tpu.memory_space<vmem>>, vector<1x128xf32>
    %4 = vector.broadcast %3 : vector<1x128xf32> to vector<8x128xf32>
    %5 = arith.mulf %2, %4 : vector<8x128xf32>
    %c0_5 = arith.constant 0 : index
    %c0_6 = arith.constant 0 : index
    %6 = vector.load %arg4[%c0_5, %c0_6] : memref<1x128xf32, #tpu.memory_space<vmem>>, vector<1x128xf32>
    %7 = vector.broadcast %6 : vector<1x128xf32> to vector<8x128xf32>
    %8 = arith.addf %5, %7 : vector<8x128xf32>
    %c0_7 = arith.constant 0 : index
    %c0_8 = arith.constant 0 : index
    %9 = vector.load %arg5[%c0_7, %c0_8] : memref<8x128xbf16, #tpu.memory_space<vmem>>, vector<8x128xbf16>
    %10 = arith.extf %9 : vector<8x128xbf16> to vector<8x128xf32>
    %11 = arith.addf %8, %10 : vector<8x128xf32>
    %cst_9 = arith.constant 0.000000e+00 : f32
    %12 = vector.broadcast %cst_9 : f32 to vector<8x128xf32>
    %13 = arith.maximumf %11, %12 : vector<8x128xf32>
    %14 = arith.truncf %13 : vector<8x128xf32> to vector<8x128xbf16>
    %c0_10 = arith.constant 0 : index
    %c0_11 = arith.constant 0 : index
    %15 = vector.load %arg6[%c0_10, %c0_11] : memref<8x128xbf16, #tpu.memory_space<vmem>>, vector<8x128xbf16>
    tpu.vector_store %arg6[%c0_10, %c0_11], %14 {strides = array<i32>} : memref<8x128xbf16, #tpu.memory_space<vmem>>, vector<8x128xbf16>,
    return
  }
  func.func @transform_0(%arg0: i32) -> (i32, i32) {
    %c0_i32 = arith.constant 0 : i32
    %c0_i32_0 = arith.constant 0 : i32
    return %arg0, %c0_i32 : i32, i32
  }
  func.func @transform_1(%arg0: i32) -> (i32, i32) {
    %c0_i32 = arith.constant 0 : i32
    %c0_i32_0 = arith.constant 0 : i32
    %c0_i32_1 = arith.constant 0 : i32
    return %c0_i32, %c0_i32_0 : i32, i32
  }
  func.func @transform_2(%arg0: i32) -> (i32, i32) {
    %c0_i32 = arith.constant 0 : i32
    %c0_i32_0 = arith.constant 0 : i32
    %c0_i32_1 = arith.constant 0 : i32
    return %c0_i32, %c0_i32_0 : i32, i32
  }
  func.func @transform_3(%arg0: i32) -> (i32, i32) {
    %c0_i32 = arith.constant 0 : i32
    %c0_i32_0 = arith.constant 0 : i32
    %c0_i32_1 = arith.constant 0 : i32
    return %c0_i32, %c0_i32_0 : i32, i32
  }
  func.func @transform_4(%arg0: i32) -> (i32, i32) {
    %c0_i32 = arith.constant 0 : i32
    %c0_i32_0 = arith.constant 0 : i32
    return %arg0, %c0_i32 : i32, i32
  }
  func.func @transform_5(%arg0: i32) -> (i32, i32) {
    %c0_i32 = arith.constant 0 : i32
    %c0_i32_0 = arith.constant 0 : i32
    return %arg0, %c0_i32 : i32, i32
  }
}

module attributes {stable_mosaic.version = 11 : i64} {
  func.func @_avgpool_heads_kernel(%arg0: i32, %arg1: memref<8x8x128xbf16, #tpu.memory_space<vmem>>, %arg2: memref<128x128xbf16, #tpu.memory_space<vmem>>, %arg3: memref<8x128xf32, #tpu.memory_space<vmem>>) attributes {dimension_semantics = [#tpu.dimension_semantics<arbitrary>], iteration_bounds = array<i64: 1>, scalar_prefetch = 0 : i64, scratch_operands = 0 : i64, tpu.core_type = #tpu.core_type<tc>, window_params = [{pipeline_mode = #tpu.pipeline_mode<synchronous>, transform_indices = @transform_0, window_bounds = array<i64: 8, 8, 128>}, {pipeline_mode = #tpu.pipeline_mode<synchronous>, transform_indices = @transform_1, window_bounds = array<i64: 128, 128>}, {pipeline_mode = #tpu.pipeline_mode<synchronous>, transform_indices = @transform_2, window_bounds = array<i64: 8, 128>}]} {
    %c0 = arith.constant 0 : index
    %c0_0 = arith.constant 0 : index
    %c0_1 = arith.constant 0 : index
    %0 = vector.load %arg1[%c0, %c0_0, %c0_1] : memref<8x8x128xbf16, #tpu.memory_space<vmem>>, vector<8x8x128xbf16>
    %1 = arith.extf %0 : vector<8x8x128xbf16> to vector<8x8x128xf32>
    %cst = arith.constant dense<0.000000e+00> : vector<8x128xf32>
    %2 = vector.multi_reduction <add>, %1, %cst [1] : vector<8x8x128xf32> to vector<8x128xf32>
    %cst_2 = arith.constant 1.000000e+00 : f32
    %3 = vector.broadcast %cst_2 : f32 to vector<8x128xf32>
    %4 = arith.mulf %2, %3 : vector<8x128xf32>
    %5 = arith.truncf %4 : vector<8x128xf32> to vector<8x128xbf16>
    %c0_3 = arith.constant 0 : index
    %c0_4 = arith.constant 0 : index
    %6 = vector.load %arg2[%c0_3, %c0_4] : memref<128x128xbf16, #tpu.memory_space<vmem>>, vector<128x128xbf16>
    %cst_5 = arith.constant dense<0.000000e+00> : vector<8x128xf32>
    %7 = tpu.matmul %5, %6, %cst_5 {dimension_numbers = #tpu.dot_dimension_numbers<[1], [0], [0], [1], [0, 0, 1, 1], [], []>} : vector<8x128xbf16>, vector<128x128xbf16>, vector<8x128xf32> -> vector<8x128xf32>
    %c0_6 = arith.constant 0 : index
    %c0_7 = arith.constant 0 : index
    %8 = vector.load %arg3[%c0_6, %c0_7] : memref<8x128xf32, #tpu.memory_space<vmem>>, vector<8x128xf32>
    tpu.vector_store %arg3[%c0_6, %c0_7], %7 {strides = array<i32>} : memref<8x128xf32, #tpu.memory_space<vmem>>, vector<8x128xf32>,
    return
  }
  func.func @transform_0(%arg0: i32) -> (i32, i32, i32) {
    %c0_i32 = arith.constant 0 : i32
    %c0_i32_0 = arith.constant 0 : i32
    %c0_i32_1 = arith.constant 0 : i32
    %c0_i32_2 = arith.constant 0 : i32
    return %c0_i32, %c0_i32_0, %c0_i32_1 : i32, i32, i32
  }
  func.func @transform_1(%arg0: i32) -> (i32, i32) {
    %c0_i32 = arith.constant 0 : i32
    %c0_i32_0 = arith.constant 0 : i32
    %c0_i32_1 = arith.constant 0 : i32
    return %c0_i32, %c0_i32_0 : i32, i32
  }
  func.func @transform_2(%arg0: i32) -> (i32, i32) {
    %c0_i32 = arith.constant 0 : i32
    %c0_i32_0 = arith.constant 0 : i32
    %c0_i32_1 = arith.constant 0 : i32
    return %c0_i32, %c0_i32_0 : i32, i32
  }
}

</mosaic_0001>

<bundles_post_ra>
// kernel: resnet_simple_forward.14
= control target key start
LH: loop header
LB: loop body
LE: loop exit
PB: predicated region body
PF: predicated region fallthrough
CT: control target
= control target key end

     0   :  { %s1467_s15 = smov 0   ;;  %s1662_s0 = inlined_call_operand.vmem [shape: bf16[512,256], index: 0, kind: input, shape index: {}]   ;;  %s1663_s1 = inlined_call_operand.vmem [shape: bf16[256,128], index: 1, kind: input, shape index: {}]   ;;  %s1664_s2 = inlined_call_operand.vmem [shape: f32[1,128], index: 2, kind: input, shape index: {}]   ;;  %s1665_s3 = inlined_call_operand.vmem [shape: f32[1,128], index: 3, kind: input, shape index: {}]   ;;  %s1666_s4 = inlined_call_operand.vmem [shape: bf16[512,128], index: 4, kind: output, shape index: {}]  }
   0x1 LB: > { %s1012_s16 = sadd.s32 4294967295, %s1440_s15   ;;  %p1016_p0 = scmp.ge.s32.totalorder %s1440_s15, 1  ;;  %s1440_s15 = sphi %s1467_s15, %s14_s15  }
   0x2   : > { %p164_p1 = scmp.lt.s32.totalorder %s1440_s15, 3 }
   0x4   : > { %p165_p2 = pnand %p1016_p0, %p164_p1 }
   0x5   : > { %s1017_s19 = sshll.u32 (!%p165_p2), %s1012_s16, 5 }
   0x6   : > { %168 = sbr.rel (%p165_p2) target bundleno = 310 (0x136), region = 36  ;;  %p192_p3 = scmp.lt.s32.totalorder (!%p165_p2), %s1017_s19, 63 }
   0xb   : > { %v1370_v0 = vld [vmem:[%s1663_s1 + $0x78] sm:$0xff]   ;;  %v1372_v2 = vld [vmem:[%s1663_s1 + $0x70] sm:$0xff]   ;;  %v1374_v4 = vld [vmem:[%s1663_s1 + $0x68] sm:$0xff]   ;;  %s1668_s19 = smov (!%p192_p3, %s1017_s19), 63 }
   0xc   : > { %v1371_v1 = vld [vmem:[%s1663_s1 + $0x38] sm:$0xff]   ;;  %1234 = vmatprep.subr.bf16.mxu0 %v1370_v0  ;;  %1346 = vmatprep.subr.bf16.mxu1 %v1370_v0  ;;  %v1373_v3 = vld [vmem:[%s1663_s1 + $0x30] sm:$0xff]   ;;  %v1375_v5 = vld [vmem:[%s1663_s1 + $0x28] sm:$0xff]   ;;  %s1106_s8 = sshll.u32 %s1668_s19, 3 }
   0xd   : > { %1235 = vmatpush3.bf16.msra.mxu0 %v1371_v1  ;;  %1354 = vmatpush3.bf16.msra.mxu1 %v1371_v1  ;;  %v1376_v6 = vld [vmem:[%s1663_s1 + $0x60] sm:$0xff]   ;;  %v1378_v8 = vld [vmem:[%s1663_s1 + $0x58] sm:$0xff]   ;;  %s1508_s13 = scalar_lea.vmem %s1662_s0, %s1106_s8  ;;  %v1380_v10 = vld [vmem:[%s1663_s1 + $0x50] sm:$0xff]   ;;  %s1021_s8 = sshll.u32 %s1668_s19, 2 }
   0xe   : > { %1236 = vmatprep.subr.bf16.mxu0 %v1372_v2  ;;  %1347 = vmatprep.subr.bf16.mxu1 %v1372_v2  ;;  %v1377_v7 = vld [vmem:[%s1663_s1 + $0x20] sm:$0xff]   ;;  %v1379_v9 = vld [vmem:[%s1663_s1 + $0x18] sm:$0xff]   ;;  %v1381_v13 = vld [vmem:[%s1663_s1 + $0x10] sm:$0xff]   ;;  %s1585_s11 = scalar_lea.vmem %s1666_s4, %s1021_s8 }
   0xf   : > { %v1388_v11 = vld [vmem:[%s1508_s13 + $0x4] ss:$8 sps:$4 sm:$0xff]   ;;  %v1386_v18 = vld [vmem:[%s1508_s13] ss:$8 sps:$4 sm:$0xff]   ;;  %v1392_v20 = vld [vmem:[%s1508_s13 + $0x14] ss:$8 sps:$4 sm:$0xff]  }
  0x10   : > { %v1391_v12 = vld [vmem:[%s1508_s13 + $0x84] ss:$8 sps:$4 sm:$0xff]   ;;  %557 = vmatprep.mubr.bf16.mxu0 %v1388_v11  ;;  %v1389_v19 = vld [vmem:[%s1508_s13 + $0x80] ss:$8 sps:$4 sm:$0xff]   ;;  %v1394_v21 = vld [vmem:[%s1508_s13 + $0x94] ss:$8 sps:$4 sm:$0xff]  }
  0x11   : > { %1237 = vmatpush3.bf16.msra.mxu0 %v1373_v3  ;;  %1355 = vmatpush3.bf16.msra.mxu1 %v1373_v3  ;;  %v1382_v14 = vld [vmem:[%s1663_s1 + $0x48] sm:$0xff]   ;;  %v1384_v16 = vld [vmem:[%s1663_s1 + $0x40] sm:$0xff]   ;;  %v1396_v22 = vld [vmem:[%s1508_s13 + $0x10] ss:$8 sps:$4 sm:$0xff]  }
  0x12   : > { %1238 = vmatprep.subr.bf16.mxu0 %v1374_v4  ;;  %1348 = vmatprep.subr.bf16.mxu1 %v1374_v4  ;;  %v1383_v15 = vld [vmem:[%s1663_s1 + $0x8] sm:$0xff]   ;;  %v1385_v17 = vld [vmem:[%s1663_s1] sm:$0xff]   ;;  %v1397_v23 = vld [vmem:[%s1508_s13 + $0x90] ss:$8 sps:$4 sm:$0xff]  }
  0x13   : > { %621 = vmatprep.mubr.bf16.mxu1 %v1391_v12  ;;  %v1398_v24 = vld [vmem:[%s1508_s13 + $0x24] ss:$8 sps:$4 sm:$0xff]   ;;  %v1402_v26 = vld [vmem:[%s1508_s13 + $0x20] ss:$8 sps:$4 sm:$0xff]   ;;  %v1404_v28 = vld [vmem:[%s1508_s13 + $0x34] ss:$8 sps:$4 sm:$0xff]  }
  0x14   : > { %v1400_v25 = vld [vmem:[%s1508_s13 + $0xa4] ss:$8 sps:$4 sm:$0xff]   ;;  %v1403_v27 = vld [vmem:[%s1508_s13 + $0xa0] ss:$8 sps:$4 sm:$0xff]   ;;  %v1406_v29 = vld [vmem:[%s1508_s13 + $0xb4] ss:$8 sps:$4 sm:$0xff]  }
  0x15   : > { %1239 = vmatpush3.bf16.msra.mxu0 %v1375_v5  ;;  %1356 = vmatpush3.bf16.msra.mxu1 %v1375_v5  ;;  %v1408_v30 = vld [vmem:[%s1508_s13 + $0x30] ss:$8 sps:$4 sm:$0xff]   ;;  %v1410_v32 = vld [vmem:[%s1508_s13 + $0x44] ss:$8 sps:$4 sm:$0xff]   ;;  %v1414_v34 = vld [vmem:[%s1508_s13 + $0x40] ss:$8 sps:$4 sm:$0xff]  }
  0x16   : > { %1240 = vmatprep.subr.bf16.mxu0 %v1376_v6  ;;  %1349 = vmatprep.subr.bf16.mxu1 %v1376_v6  ;;  %v1409_v31 = vld [vmem:[%s1508_s13 + $0xb0] ss:$8 sps:$4 sm:$0xff]   ;;  %v1412_v33 = vld [vmem:[%s1508_s13 + $0xc4] ss:$8 sps:$4 sm:$0xff]   ;;  %v1415_v35 = vld [vmem:[%s1508_s13 + $0xc0] ss:$8 sps:$4 sm:$0xff]  }
  0x17   : > { %v1416_v36 = vld [vmem:[%s1508_s13 + $0x54] ss:$8 sps:$4 sm:$0xff]   ;;  %v1420_v38 = vld [vmem:[%s1508_s13 + $0x50] ss:$8 sps:$4 sm:$0xff]   ;;  %v1422_v40 = vld [vmem:[%s1508_s13 + $0x64] ss:$8 sps:$4 sm:$0xff]  }
  0x18   : > { %v1418_v37 = vld [vmem:[%s1508_s13 + $0xd4] ss:$8 sps:$4 sm:$0xff]   ;;  %v1421_v39 = vld [vmem:[%s1508_s13 + $0xd0] ss:$8 sps:$4 sm:$0xff]   ;;  %v1424_v41 = vld [vmem:[%s1508_s13 + $0xe4] ss:$8 sps:$4 sm:$0xff]  }
  0x19   : > { %1241 = vmatpush3.bf16.msra.mxu0 %v1377_v7  ;;  %1357 = vmatpush3.bf16.msra.mxu1 %v1377_v7  ;;  %v1426_v42 = vld [vmem:[%s1508_s13 + $0x60] ss:$8 sps:$4 sm:$0xff]   ;;  %v1428_v44 = vld [vmem:[%s1508_s13 + $0x74] ss:$8 sps:$4 sm:$0xff]   ;;  %v1432_v46 = vld [vmem:[%s1508_s13 + $0x70] ss:$8 sps:$4 sm:$0xff]  }
  0x1a   : > { %1242 = vmatprep.subr.bf16.mxu0 %v1378_v8  ;;  %1350 = vmatprep.subr.bf16.mxu1 %v1378_v8  ;;  %v1427_v43 = vld [vmem:[%s1508_s13 + $0xe0] ss:$8 sps:$4 sm:$0xff]   ;;  %v1430_v45 = vld [vmem:[%s1508_s13 + $0xf4] ss:$8 sps:$4 sm:$0xff]   ;;  %v1433_v47 = vld [vmem:[%s1508_s13 + $0xf0] ss:$8 sps:$4 sm:$0xff]  }
  0x1b   : > { %v1566_v51 = vld [vmem:[%s1664_s2] ss:$0 sm:$0xff] }
  0x1c   : > { %v1573_v59 = vld [vmem:[%s1665_s3] ss:$0 sm:$0xff] }
  0x1d   : > { %1243 = vmatpush3.bf16.msra.mxu0 %v1379_v9  ;;  %1358 = vmatpush3.bf16.msra.mxu1 %v1379_v9 }
  0x1e   : > { %1244 = vmatprep.subr.bf16.mxu0 %v1380_v10  ;;  %1351 = vmatprep.subr.bf16.mxu1 %v1380_v10 }
  0x21   : > { %1245 = vmatpush3.bf16.msra.mxu0 %v1381_v13  ;;  %1359 = vmatpush3.bf16.msra.mxu1 %v1381_v13 }
  0x22   : > { %1246 = vmatprep.subr.bf16.mxu0 %v1382_v14  ;;  %1352 = vmatprep.subr.bf16.mxu1 %v1382_v14 }
  0x25   : > { %1247 = vmatpush3.bf16.msra.mxu0 %v1383_v15  ;;  %1360 = vmatpush3.bf16.msra.mxu1 %v1383_v15 }
  0x26   : > { %1248 = vmatprep.subr.bf16.mxu0 %v1384_v16  ;;  %1353 = vmatprep.subr.bf16.mxu1 %v1384_v16 }
  0x29   : > { %1249 = vmatpush3.bf16.msra.mxu0 %v1385_v17  ;;  %1361 = vmatpush3.bf16.msra.mxu1 %v1385_v17 }
  0x2c   : > { %558 = vmatmul.mubr.bf16.vlgmr.msra.gmra.mxu0 %v1386_v18  ;;  %622 = vmatmul.mubr.bf16.vlgmr.msra.gmra.mxu1 %v1389_v19 }
  0x2d   : > { %565 = vmatprep.mubr.bf16.mxu0 %v1392_v20  ;;  %629 = vmatprep.mubr.bf16.mxu1 %v1394_v21 }
  0x34   : > { %566 = vmatmul.mubr.bf16.gmra.mxu0 %v1396_v22  ;;  %630 = vmatmul.mubr.bf16.gmra.mxu1 %v1397_v23 }
  0x35   : > { %573 = vmatprep.mubr.bf16.mxu0 %v1398_v24  ;;  %637 = vmatprep.mubr.bf16.mxu1 %v1400_v25 }
  0x3c   : > { %574 = vmatmul.mubr.bf16.gmra.mxu0 %v1402_v26  ;;  %638 = vmatmul.mubr.bf16.gmra.mxu1 %v1403_v27 }
  0x3d   : > { %581 = vmatprep.mubr.bf16.mxu0 %v1404_v28  ;;  %645 = vmatprep.mubr.bf16.mxu1 %v1406_v29 }
  0x44   : > { %582 = vmatmul.mubr.bf16.gmra.mxu0 %v1408_v30  ;;  %646 = vmatmul.mubr.bf16.gmra.mxu1 %v1409_v31 }
  0x45   : > { %589 = vmatprep.mubr.bf16.mxu0 %v1410_v32  ;;  %653 = vmatprep.mubr.bf16.mxu1 %v1412_v33 }
  0x4c   : > { %590 = vmatmul.mubr.bf16.gmra.mxu0 %v1414_v34  ;;  %654 = vmatmul.mubr.bf16.gmra.mxu1 %v1415_v35 }
  0x4d   : > { %597 = vmatprep.mubr.bf16.mxu0 %v1416_v36  ;;  %661 = vmatprep.mubr.bf16.mxu1 %v1418_v37 }
  0x54   : > { %598 = vmatmul.mubr.bf16.gmra.mxu0 %v1420_v38  ;;  %662 = vmatmul.mubr.bf16.gmra.mxu1 %v1421_v39 }
  0x55   : > { %605 = vmatprep.mubr.bf16.mxu0 %v1422_v40  ;;  %669 = vmatprep.mubr.bf16.mxu1 %v1424_v41 }
  0x5c   : > { %606 = vmatmul.mubr.bf16.gmra.mxu0 %v1426_v42  ;;  %670 = vmatmul.mubr.bf16.gmra.mxu1 %v1427_v43 }
  0x5d   : > { %613 = vmatprep.mubr.bf16.mxu0 %v1428_v44  ;;  %677 = vmatprep.mubr.bf16.mxu1 %v1430_v45 }
  0x64   : > { %614 = vmatmul.mubr.bf16.gmra.mxu0 %v1432_v46  ;;  %678 = vmatmul.mubr.bf16.gmra.mxu1 %v1433_v47 }
  0xec   : > { %v1250_v48 = vpop.f32.mrf.mxu0  ;;  %v1298_v49 = vpop.f32.mrf.mxu1 }
  0xee   : > { %v1251_v50 = vpop.f32.mrf.mxu0  ;;  %v1299_v52 = vpop.f32.mrf.mxu1 }
  0xef   : > { %v1252_v53 = vadd.f32 %v1251_v50, %v1250_v48  ;;  %v1300_v54 = vadd.f32 %v1299_v52, %v1298_v49 }
  0xf0   : > { %v1253_v55 = vpop.f32.mrf.mxu0  ;;  %v1301_v56 = vpop.f32.mrf.mxu1 }
  0xf1   : > { %v693_v57 = vmul.f32 %v1252_v53, %v1566_v51  ;;  %v709_v58 = vmul.f32 %v1300_v54, %v1566_v51 }
  0xf2   : > { %v1254_v60 = vpop.f32.mrf.mxu0  ;;  %v1302_v61 = vpop.f32.mrf.mxu1 }
  0xf3   : > { %v1255_v62 = vadd.f32 %v1254_v60, %v1253_v55  ;;  %v1303_v63 = vadd.f32 %v1302_v61, %v1301_v56  ;;  %v732_v2 = vadd.f32 %v1573_v59, %v693_v57  ;;  %v748_v3 = vadd.f32 %v1573_v59, %v709_v58 }
  0xf4   : > { %v1256_v0 = vpop.f32.mrf.mxu0  ;;  %v1304_v1 = vpop.f32.mrf.mxu1 }
  0xf5   : > { %v694_v4 = vmul.f32 %v1255_v62, %v1566_v51  ;;  %v710_v5 = vmul.f32 %v1303_v63, %v1566_v51  ;;  %v764_v14 = vmax.f32 %v732_v2, 0.0  ;;  %v780_v15 = vmax.f32 %v748_v3, 0.0 }
  0xf6   : > { %v1257_v6 = vpop.f32.mrf.mxu0  ;;  %v1305_v7 = vpop.f32.mrf.mxu1 }
  0xf7   : > { %v733_v8 = vadd.f32 %v1573_v59, %v694_v4  ;;  %v749_v9 = vadd.f32 %v1573_v59, %v710_v5  ;;  %v1258_v10 = vadd.f32 %v1257_v6, %v1256_v0  ;;  %v1306_v11 = vadd.f32 %v1305_v7, %v1304_v1 }
  0xf8   : > { %v1259_v12 = vpop.f32.mrf.mxu0  ;;  %v1307_v13 = vpop.f32.mrf.mxu1 }
  0xf9   : > { %v765_v16 = vmax.f32 %v733_v8, 0.0  ;;  %v781_v17 = vmax.f32 %v749_v9, 0.0  ;;  %v695_v18 = vmul.f32 %v1258_v10, %v1566_v51  ;;  %v711_v19 = vmul.f32 %v1306_v11, %v1566_v51 }
  0xfa   : > { %v1260_v20 = vpop.f32.mrf.mxu0  ;;  %v1308_v21 = vpop.f32.mrf.mxu1 }
  0xfb   : > { %v1142_v22 = vpack.c.bf16 %v765_v16, %v764_v14  ;;  %v1182_v23 = vpack.c.bf16 %v781_v17, %v780_v15  ;;  %v1261_v24 = vadd.f32 %v1260_v20, %v1259_v12  ;;  %v1309_v25 = vadd.f32 %v1308_v21, %v1307_v13 }
  0xfc   : > { %v1262_v26 = vpop.f32.mrf.mxu0  ;;  %v1310_v27 = vpop.f32.mrf.mxu1  ;;  %v734_v28 = vadd.f32 %v1573_v59, %v695_v18  ;;  %v750_v29 = vadd.f32 %v1573_v59, %v711_v19 }
  0xfd   : > { %1143 = vst [vmem:[%s1585_s11] sm:$0xff] %v1142_v22   ;;  %1226 = vst [vmem:[%s1585_s11 + $0x40] sm:$0xff] %v1182_v23   ;;  %v696_v30 = vmul.f32 %v1261_v24, %v1566_v51  ;;  %v712_v31 = vmul.f32 %v1309_v25, %v1566_v51 }
  0xfe   : > { %v1263_v32 = vpop.f32.mrf.mxu0  ;;  %v1311_v33 = vpop.f32.mrf.mxu1  ;;  %v766_v42 = vmax.f32 %v734_v28, 0.0  ;;  %v782_v43 = vmax.f32 %v750_v29, 0.0 }
  0xff   : > { %v1264_v34 = vadd.f32 %v1263_v32, %v1262_v26  ;;  %v1312_v35 = vadd.f32 %v1311_v33, %v1310_v27  ;;  %v735_v36 = vadd.f32 %v1573_v59, %v696_v30  ;;  %v751_v37 = vadd.f32 %v1573_v59, %v712_v31 }
 0x100   : > { %v1265_v38 = vpop.f32.mrf.mxu0  ;;  %v1313_v39 = vpop.f32.mrf.mxu1 }
 0x101   : > { %v697_v40 = vmul.f32 %v1264_v34, %v1566_v51  ;;  %v713_v41 = vmul.f32 %v1312_v35, %v1566_v51  ;;  %v767_v44 = vmax.f32 %v735_v36, 0.0  ;;  %v783_v45 = vmax.f32 %v751_v37, 0.0 }
 0x102   : > { %v1266_v46 = vpop.f32.mrf.mxu0  ;;  %v1314_v47 = vpop.f32.mrf.mxu1 }
 0x103   : > { %v1267_v48 = vadd.f32 %v1266_v46, %v1265_v38  ;;  %v1315_v49 = vadd.f32 %v1314_v47, %v1313_v39  ;;  %v1147_v50 = vpack.c.bf16 %v767_v44, %v766_v42  ;;  %v1187_v52 = vpack.c.bf16 %v783_v45, %v782_v43 }
 0x104   : > { %v1268_v53 = vpop.f32.mrf.mxu0  ;;  %v1316_v54 = vpop.f32.mrf.mxu1  ;;  %v736_v55 = vadd.f32 %v1573_v59, %v697_v40  ;;  %v752_v56 = vadd.f32 %v1573_v59, %v713_v41 }
 0x105   : > { %v698_v57 = vmul.f32 %v1267_v48, %v1566_v51  ;;  %v714_v58 = vmul.f32 %v1315_v49, %v1566_v51  ;;  %1219 = vst [vmem:[%s1585_s11 + $0x8] sm:$0xff] %v1147_v50   ;;  %1227 = vst [vmem:[%s1585_s11 + $0x48] sm:$0xff] %v1187_v52  }
 0x106   : > { %v1269_v60 = vpop.f32.mrf.mxu0  ;;  %v1317_v61 = vpop.f32.mrf.mxu1  ;;  %v768_v4 = vmax.f32 %v736_v55, 0.0  ;;  %v784_v5 = vmax.f32 %v752_v56, 0.0 }
 0x107   : > { %v737_v62 = vadd.f32 %v1573_v59, %v698_v57  ;;  %v753_v63 = vadd.f32 %v1573_v59, %v714_v58  ;;  %v1270_v0 = vadd.f32 %v1269_v60, %v1268_v53  ;;  %v1318_v1 = vadd.f32 %v1317_v61, %v1316_v54 }
 0x108   : > { %v1271_v2 = vpop.f32.mrf.mxu0  ;;  %v1319_v3 = vpop.f32.mrf.mxu1 }
 0x109   : > { %v769_v6 = vmax.f32 %v737_v62, 0.0  ;;  %v785_v7 = vmax.f32 %v753_v63, 0.0  ;;  %v699_v8 = vmul.f32 %v1270_v0, %v1566_v51  ;;  %v715_v9 = vmul.f32 %v1318_v1, %v1566_v51 }
 0x10a   : > { %v1272_v10 = vpop.f32.mrf.mxu0  ;;  %v1320_v11 = vpop.f32.mrf.mxu1 }
 0x10b   : > { %v1152_v12 = vpack.c.bf16 %v769_v6, %v768_v4  ;;  %v1192_v13 = vpack.c.bf16 %v785_v7, %v784_v5  ;;  %v1273_v14 = vadd.f32 %v1272_v10, %v1271_v2  ;;  %v1321_v15 = vadd.f32 %v1320_v11, %v1319_v3 }
 0x10c   : > { %v1274_v16 = vpop.f32.mrf.mxu0  ;;  %v1322_v17 = vpop.f32.mrf.mxu1  ;;  %v738_v18 = vadd.f32 %v1573_v59, %v699_v8  ;;  %v754_v19 = vadd.f32 %v1573_v59, %v715_v9 }
 0x10d   : > { %1220 = vst [vmem:[%s1585_s11 + $0x10] sm:$0xff] %v1152_v12   ;;  %1228 = vst [vmem:[%s1585_s11 + $0x50] sm:$0xff] %v1192_v13   ;;  %v700_v20 = vmul.f32 %v1273_v14, %v1566_v51  ;;  %v716_v21 = vmul.f32 %v1321_v15, %v1566_v51 }
 0x10e   : > { %v1275_v22 = vpop.f32.mrf.mxu0  ;;  %v1323_v23 = vpop.f32.mrf.mxu1  ;;  %v770_v32 = vmax.f32 %v738_v18, 0.0  ;;  %v786_v33 = vmax.f32 %v754_v19, 0.0 }
 0x10f   : > { %v1276_v24 = vadd.f32 %v1275_v22, %v1274_v16  ;;  %v1324_v25 = vadd.f32 %v1323_v23, %v1322_v17  ;;  %v739_v26 = vadd.f32 %v1573_v59, %v700_v20  ;;  %v755_v27 = vadd.f32 %v1573_v59, %v716_v21 }
 0x110   : > { %v1277_v28 = vpop.f32.mrf.mxu0  ;;  %v1325_v29 = vpop.f32.mrf.mxu1 }
 0x111   : > { %v701_v30 = vmul.f32 %v1276_v24, %v1566_v51  ;;  %v717_v31 = vmul.f32 %v1324_v25, %v1566_v51  ;;  %v771_v34 = vmax.f32 %v739_v26, 0.0  ;;  %v787_v35 = vmax.f32 %v755_v27, 0.0 }
 0x112   : > { %v1278_v36 = vpop.f32.mrf.mxu0  ;;  %v1326_v37 = vpop.f32.mrf.mxu1 }
 0x113   : > { %v1279_v38 = vadd.f32 %v1278_v36, %v1277_v28  ;;  %v1327_v39 = vadd.f32 %v1326_v37, %v1325_v29  ;;  %v1157_v40 = vpack.c.bf16 %v771_v34, %v770_v32  ;;  %v1197_v41 = vpack.c.bf16 %v787_v35, %v786_v33 }
 0x114   : > { %v1280_v42 = vpop.f32.mrf.mxu0  ;;  %v1328_v43 = vpop.f32.mrf.mxu1  ;;  %v740_v44 = vadd.f32 %v1573_v59, %v701_v30  ;;  %v756_v45 = vadd.f32 %v1573_v59, %v717_v31 }
 0x115   : > { %v702_v46 = vmul.f32 %v1279_v38, %v1566_v51  ;;  %v718_v47 = vmul.f32 %v1327_v39, %v1566_v51  ;;  %1221 = vst [vmem:[%s1585_s11 + $0x18] sm:$0xff] %v1157_v40   ;;  %1229 = vst [vmem:[%s1585_s11 + $0x58] sm:$0xff] %v1197_v41  }
 0x116   : > { %v1281_v48 = vpop.f32.mrf.mxu0  ;;  %v1329_v49 = vpop.f32.mrf.mxu1  ;;  %v772_v57 = vmax.f32 %v740_v44, 0.0  ;;  %v788_v58 = vmax.f32 %v756_v45, 0.0 }
 0x117   : > { %v741_v50 = vadd.f32 %v1573_v59, %v702_v46  ;;  %v757_v52 = vadd.f32 %v1573_v59, %v718_v47  ;;  %v1282_v53 = vadd.f32 %v1281_v48, %v1280_v42  ;;  %v1330_v54 = vadd.f32 %v1329_v49, %v1328_v43 }
 0x118   : > { %v1283_v55 = vpop.f32.mrf.mxu0  ;;  %v1331_v56 = vpop.f32.mrf.mxu1 }
 0x119   : > { %v773_v60 = vmax.f32 %v741_v50, 0.0  ;;  %v789_v61 = vmax.f32 %v757_v52, 0.0  ;;  %v703_v62 = vmul.f32 %v1282_v53, %v1566_v51  ;;  %v719_v63 = vmul.f32 %v1330_v54, %v1566_v51 }
 0x11a   : > { %v1284_v0 = vpop.f32.mrf.mxu0  ;;  %v1332_v1 = vpop.f32.mrf.mxu1 }
 0x11b   : > { %v1162_v2 = vpack.c.bf16 %v773_v60, %v772_v57  ;;  %v1202_v3 = vpack.c.bf16 %v789_v61, %v788_v58  ;;  %v1285_v4 = vadd.f32 %v1284_v0, %v1283_v55  ;;  %v1333_v5 = vadd.f32 %v1332_v1, %v1331_v56 }
 0x11c   : > { %v1286_v6 = vpop.f32.mrf.mxu0  ;;  %v1334_v7 = vpop.f32.mrf.mxu1  ;;  %v742_v8 = vadd.f32 %v1573_v59, %v703_v62  ;;  %v758_v9 = vadd.f32 %v1573_v59, %v719_v63 }
 0x11d   : > { %1222 = vst [vmem:[%s1585_s11 + $0x20] sm:$0xff] %v1162_v2   ;;  %1230 = vst [vmem:[%s1585_s11 + $0x60] sm:$0xff] %v1202_v3   ;;  %v704_v10 = vmul.f32 %v1285_v4, %v1566_v51  ;;  %v720_v11 = vmul.f32 %v1333_v5, %v1566_v51 }
 0x11e   : > { %v1287_v12 = vpop.f32.mrf.mxu0  ;;  %v1335_v13 = vpop.f32.mrf.mxu1  ;;  %v774_v22 = vmax.f32 %v742_v8, 0.0  ;;  %v790_v23 = vmax.f32 %v758_v9, 0.0 }
 0x11f   : > { %v1288_v14 = vadd.f32 %v1287_v12, %v1286_v6  ;;  %v1336_v15 = vadd.f32 %v1335_v13, %v1334_v7  ;;  %v743_v16 = vadd.f32 %v1573_v59, %v704_v10  ;;  %v759_v17 = vadd.f32 %v1573_v59, %v720_v11 }
 0x120   : > { %v1289_v18 = vpop.f32.mrf.mxu0  ;;  %v1337_v19 = vpop.f32.mrf.mxu1 }
 0x121   : > { %v705_v20 = vmul.f32 %v1288_v14, %v1566_v51  ;;  %v721_v21 = vmul.f32 %v1336_v15, %v1566_v51  ;;  %v775_v24 = vmax.f32 %v743_v16, 0.0  ;;  %v791_v25 = vmax.f32 %v759_v17, 0.0 }
 0x122   : > { %v1290_v26 = vpop.f32.mrf.mxu0  ;;  %v1338_v27 = vpop.f32.mrf.mxu1 }
 0x123   : > { %v1291_v28 = vadd.f32 %v1290_v26, %v1289_v18  ;;  %v1339_v29 = vadd.f32 %v1338_v27, %v1337_v19  ;;  %v1167_v30 = vpack.c.bf16 %v775_v24, %v774_v22  ;;  %v1207_v31 = vpack.c.bf16 %v791_v25, %v790_v23 }
 0x124   : > { %v1292_v32 = vpop.f32.mrf.mxu0  ;;  %v1340_v33 = vpop.f32.mrf.mxu1  ;;  %v744_v34 = vadd.f32 %v1573_v59, %v705_v20  ;;  %v760_v35 = vadd.f32 %v1573_v59, %v721_v21 }
 0x125   : > { %v706_v36 = vmul.f32 %v1291_v28, %v1566_v51  ;;  %v722_v37 = vmul.f32 %v1339_v29, %v1566_v51  ;;  %1223 = vst [vmem:[%s1585_s11 + $0x28] sm:$0xff] %v1167_v30   ;;  %1231 = vst [vmem:[%s1585_s11 + $0x68] sm:$0xff] %v1207_v31  }
 0x126   : > { %v1293_v38 = vpop.f32.mrf.mxu0  ;;  %v1341_v39 = vpop.f32.mrf.mxu1  ;;  %v776_v46 = vmax.f32 %v744_v34, 0.0  ;;  %v792_v47 = vmax.f32 %v760_v35, 0.0 }
 0x127   : > { %v745_v40 = vadd.f32 %v1573_v59, %v706_v36  ;;  %v761_v41 = vadd.f32 %v1573_v59, %v722_v37  ;;  %v1294_v42 = vadd.f32 %v1293_v38, %v1292_v32  ;;  %v1342_v43 = vadd.f32 %v1341_v39, %v1340_v33 }
 0x128   : > { %v1295_v44 = vpop.f32.mrf.mxu0  ;;  %v1343_v45 = vpop.f32.mrf.mxu1 }
 0x129   : > { %v777_v48 = vmax.f32 %v745_v40, 0.0  ;;  %v793_v49 = vmax.f32 %v761_v41, 0.0  ;;  %v707_v50 = vmul.f32 %v1294_v42, %v1566_v51  ;;  %v723_v52 = vmul.f32 %v1342_v43, %v1566_v51 }
 0x12a   : > { %v1296_v53 = vpop.f32.mrf.mxu0  ;;  %v1344_v54 = vpop.f32.mrf.mxu1 }
 0x12b   : > { %v1172_v55 = vpack.c.bf16 %v777_v48, %v776_v46  ;;  %v1212_v56 = vpack.c.bf16 %v793_v49, %v792_v47  ;;  %v1297_v57 = vadd.f32 %v1296_v53, %v1295_v44  ;;  %v1345_v58 = vadd.f32 %v1344_v54, %v1343_v45 }
 0x12c   : > { %v746_v60 = vadd.f32 %v1573_v59, %v707_v50  ;;  %v762_v61 = vadd.f32 %v1573_v59, %v723_v52 }
 0x12d   : > { %1224 = vst [vmem:[%s1585_s11 + $0x30] sm:$0xff] %v1172_v55   ;;  %1232 = vst [vmem:[%s1585_s11 + $0x70] sm:$0xff] %v1212_v56   ;;  %v708_v62 = vmul.f32 %v1297_v57, %v1566_v51  ;;  %v724_v63 = vmul.f32 %v1345_v58, %v1566_v51 }
 0x12e   : > { %v778_v2 = vmax.f32 %v746_v60, 0.0  ;;  %v794_v3 = vmax.f32 %v762_v61, 0.0 }
 0x12f   : > { %v747_v0 = vadd.f32 %v1573_v59, %v708_v62  ;;  %v763_v1 = vadd.f32 %v1573_v59, %v724_v63 }
 0x131   : > { %v779_v4 = vmax.f32 %v747_v0, 0.0  ;;  %v795_v5 = vmax.f32 %v763_v1, 0.0 }
 0x133   : > { %v1177_v6 = vpack.c.bf16 %v779_v4, %v778_v2  ;;  %v1217_v7 = vpack.c.bf16 %v795_v5, %v794_v3 }
 0x135   : > { %1225 = vst [vmem:[%s1585_s11 + $0x38] sm:$0xff] %v1177_v6   ;;  %1233 = vst [vmem:[%s1585_s11 + $0x78] sm:$0xff] %v1217_v7  }
 0x136 PF: > { %s14_s15 = sadd.s32 1, %s1440_s15  }
 0x137   : > { %p11_p4 = scmp.ge.s32.totalorder %s14_s15, 4  }
 0x139   :  { %13 = sbr.rel (!%p11_p4) target bundleno = 1 (0x1), region = 66 }

// kernel: resnet_simple_forward.15
= control target key start
LH: loop header
LB: loop body
LE: loop exit
PB: predicated region body
PF: predicated region fallthrough
CT: control target
= control target key end

     0   :  { %s885_s0 = inlined_call_operand.vmem [shape: bf16[128,128], index: 0, kind: input, shape index: {}]   ;;  %s886_s1 = inlined_call_operand.vmem [shape: bf16[128,128], index: 1, kind: input, shape index: {}]   ;;  %s887_s2 = inlined_call_operand.vmem [shape: bf16[128,128], index: 2, kind: input, shape index: {}]   ;;  %s888_s3 = inlined_call_operand.vmem [shape: bf16[128,128], index: 3, kind: input, shape index: {}]   ;;  %s889_s4 = inlined_call_operand.vmem [shape: bf16[128,128], index: 4, kind: input, shape index: {}]   ;;  %s890_s5 = inlined_call_operand.vmem [shape: bf16[128,128], index: 5, kind: input, shape index: {}]   ;;  %s891_s6 = inlined_call_operand.vmem [shape: bf16[128,128], index: 6, kind: input, shape index: {}]   ;;  %s892_s7 = inlined_call_operand.vmem [shape: bf16[128,128], index: 7, kind: input, shape index: {}]   ;;  %s893_s8 = inlined_call_operand.vmem [shape: bf16[128,128], index: 8, kind: input, shape index: {}]   ;;  %s894_s9 = inlined_call_operand.vmem [shape: bf16[128,128], index: 9, kind: output, shape index: {}]  }
   0x1   :  { %v32_v0 = vld [vmem:[%s885_s0] sm:$0xf]  ;;  %v33_v1 = vld [vmem:[%s885_s0 + $0x4] sm:$0xf]  ;;  %v34_v18 = vld [vmem:[%s885_s0 + $0x8] sm:$0xf] }
   0x2   :  { %v48_v2 = vld [vmem:[%s886_s1] sm:$0xf]  ;;  %v49_v3 = vld [vmem:[%s886_s1 + $0x4] sm:$0xf]  ;;  %v35_v19 = vld [vmem:[%s885_s0 + $0xc] sm:$0xf] }
   0x3   :  { %v64_v4 = vmax.bf16 %v48_v2, %v32_v0  ;;  %v80_v5 = vld [vmem:[%s887_s2] sm:$0xf]  ;;  %v81_v6 = vld [vmem:[%s887_s2 + $0x4] sm:$0xf]  ;;  %v65_v7 = vmax.bf16 %v49_v3, %v33_v1  ;;  %v50_v20 = vld [vmem:[%s886_s1 + $0x8] sm:$0xf] }
   0x4   :  { %v112_v8 = vld [vmem:[%s888_s3] sm:$0xf]  ;;  %v113_v10 = vld [vmem:[%s888_s3 + $0x4] sm:$0xf]  ;;  %v51_v22 = vld [vmem:[%s886_s1 + $0xc] sm:$0xf]  ;;  %v66_v23 = vmax.bf16 %v50_v20, %v34_v18 }
   0x5   :  { %v96_v9 = vmax.bf16 %v80_v5, %v64_v4  ;;  %v97_v11 = vmax.bf16 %v81_v6, %v65_v7  ;;  %v144_v12 = vld [vmem:[%s889_s4] sm:$0xf]  ;;  %v145_v14 = vld [vmem:[%s889_s4 + $0x4] sm:$0xf]  ;;  %v82_v24 = vld [vmem:[%s887_s2 + $0x8] sm:$0xf]  ;;  %v67_v28 = vmax.bf16 %v51_v22, %v35_v19 }
   0x6   :  { %v176_v15 = vld [vmem:[%s890_s5] sm:$0xf]  ;;  %v177_v16 = vld [vmem:[%s890_s5 + $0x4] sm:$0xf]  ;;  %v83_v25 = vld [vmem:[%s887_s2 + $0xc] sm:$0xf]  ;;  %v98_v33 = vmax.bf16 %v82_v24, %v66_v23 }
   0x7   :  { %v128_v13 = vmax.bf16 %v112_v8, %v96_v9  ;;  %v129_v17 = vmax.bf16 %v113_v10, %v97_v11  ;;  %v208_v27 = vld [vmem:[%s891_s6] sm:$0xf]  ;;  %v114_v29 = vld [vmem:[%s888_s3 + $0x8] sm:$0xf]  ;;  %v209_v31 = vld [vmem:[%s891_s6 + $0x4] sm:$0xf]  ;;  %v99_v38 = vmax.bf16 %v83_v25, %v67_v28 }
   0x8   :  { %v240_v32 = vld [vmem:[%s892_s7] sm:$0xf]  ;;  %v115_v34 = vld [vmem:[%s888_s3 + $0xc] sm:$0xf]  ;;  %v241_v36 = vld [vmem:[%s892_s7 + $0x4] sm:$0xf]  ;;  %v130_v42 = vmax.bf16 %v114_v29, %v98_v33 }
   0x9   :  { %v160_v21 = vmax.bf16 %v144_v12, %v128_v13  ;;  %v161_v26 = vmax.bf16 %v145_v14, %v129_v17  ;;  %v272_v37 = vld [vmem:[%s893_s8] sm:$0xf]  ;;  %v146_v39 = vld [vmem:[%s889_s4 + $0x8] sm:$0xf]  ;;  %v273_v41 = vld [vmem:[%s893_s8 + $0x4] sm:$0xf]  ;;  %v131_v47 = vmax.bf16 %v115_v34, %v99_v38 }
   0xa   :  { %v147_v43 = vld [vmem:[%s889_s4 + $0xc] sm:$0xf]  ;;  %v178_v44 = vld [vmem:[%s890_s5 + $0x8] sm:$0xf]  ;;  %v36_v48 = vld [vmem:[%s885_s0 + $0x10] sm:$0xf]  ;;  %v162_v52 = vmax.bf16 %v146_v39, %v130_v42 }
   0xb   :  { %v192_v30 = vmax.bf16 %v176_v15, %v160_v21  ;;  %v193_v35 = vmax.bf16 %v177_v16, %v161_v26  ;;  %v179_v45 = vld [vmem:[%s890_s5 + $0xc] sm:$0xf]  ;;  %v37_v49 = vld [vmem:[%s885_s0 + $0x14] sm:$0xf]  ;;  %v52_v50 = vld [vmem:[%s886_s1 + $0x10] sm:$0xf]  ;;  %v163_v58 = vmax.bf16 %v147_v43, %v131_v47 }
   0xc   :  { %v53_v53 = vld [vmem:[%s886_s1 + $0x14] sm:$0xf]  ;;  %v68_v54 = vmax.bf16 %v52_v50, %v36_v48  ;;  %v84_v55 = vld [vmem:[%s887_s2 + $0x10] sm:$0xf]  ;;  %v210_v59 = vld [vmem:[%s891_s6 + $0x8] sm:$0xf]  ;;  %v194_v63 = vmax.bf16 %v178_v44, %v162_v52 }
   0xd   :  { %v224_v40 = vmax.bf16 %v208_v27, %v192_v30  ;;  %v225_v46 = vmax.bf16 %v209_v31, %v193_v35  ;;  %v85_v56 = vld [vmem:[%s887_s2 + $0x14] sm:$0xf]  ;;  %v69_v60 = vmax.bf16 %v53_v53, %v37_v49  ;;  %v116_v61 = vld [vmem:[%s888_s3 + $0x10] sm:$0xf]  ;;  %v211_v0 = vld [vmem:[%s891_s6 + $0xc] sm:$0xf]  ;;  %v195_v5 = vmax.bf16 %v179_v45, %v163_v58 }
   0xe   :  { %v242_v1 = vld [vmem:[%s892_s7 + $0x8] sm:$0xf]  ;;  %v100_v2 = vmax.bf16 %v84_v55, %v68_v54  ;;  %v117_v3 = vld [vmem:[%s888_s3 + $0x14] sm:$0xf]  ;;  %v243_v6 = vld [vmem:[%s892_s7 + $0xc] sm:$0xf]  ;;  %v226_v10 = vmax.bf16 %v210_v59, %v194_v63 }
   0xf   :  { %v256_v51 = vmax.bf16 %v240_v32, %v224_v40  ;;  %v257_v57 = vmax.bf16 %v241_v36, %v225_v46  ;;  %v274_v7 = vld [vmem:[%s893_s8 + $0x8] sm:$0xf]  ;;  %v101_v8 = vmax.bf16 %v85_v56, %v69_v60  ;;  %v148_v9 = vld [vmem:[%s889_s4 + $0x10] sm:$0xf]  ;;  %v275_v11 = vld [vmem:[%s893_s8 + $0xc] sm:$0xf]  ;;  %v227_v17 = vmax.bf16 %v211_v0, %v195_v5 }
  0x10   :  { %v132_v12 = vmax.bf16 %v116_v61, %v100_v2  ;;  %v149_v13 = vld [vmem:[%s889_s4 + $0x14] sm:$0xf]  ;;  %v180_v14 = vld [vmem:[%s890_s5 + $0x10] sm:$0xf]  ;;  %v38_v19 = vld [vmem:[%s885_s0 + $0x18] sm:$0xf]  ;;  %v258_v22 = vmax.bf16 %v242_v1, %v226_v10 }
  0x11   :  { %v288_v62 = vmax.bf16 %v272_v37, %v256_v51  ;;  %v289_v4 = vmax.bf16 %v273_v41, %v257_v57  ;;  %v181_v15 = vld [vmem:[%s890_s5 + $0x14] sm:$0xf]  ;;  %v133_v18 = vmax.bf16 %v117_v3, %v101_v8  ;;  %v39_v20 = vld [vmem:[%s885_s0 + $0x1c] sm:$0xf]  ;;  %v54_v21 = vld [vmem:[%s886_s1 + $0x18] sm:$0xf]  ;;  %v259_v28 = vmax.bf16 %v243_v6, %v227_v17 }
  0x12   :  { %v164_v23 = vmax.bf16 %v148_v9, %v132_v12  ;;  %v55_v24 = vld [vmem:[%s886_s1 + $0x1c] sm:$0xf]  ;;  %v70_v25 = vmax.bf16 %v54_v21, %v38_v19  ;;  %v86_v26 = vld [vmem:[%s887_s2 + $0x18] sm:$0xf]  ;;  %v212_v30 = vld [vmem:[%s891_s6 + $0x10] sm:$0xf]  ;;  %v290_v33 = vmax.bf16 %v274_v7, %v258_v22 }
  0x13   :  { %v364_v16 = vcombine.low %v288_v62, %v289_v4  ;;  %v87_v27 = vld [vmem:[%s887_s2 + $0x1c] sm:$0xf]  ;;  %v165_v29 = vmax.bf16 %v149_v13, %v133_v18  ;;  %v71_v31 = vmax.bf16 %v55_v24, %v39_v20  ;;  %v118_v32 = vld [vmem:[%s888_s3 + $0x18] sm:$0xf]  ;;  %v213_v35 = vld [vmem:[%s891_s6 + $0x14] sm:$0xf]  ;;  %v291_v39 = vmax.bf16 %v275_v11, %v259_v28 }
  0x14   :  { %v196_v34 = vmax.bf16 %v180_v14, %v164_v23  ;;  %v244_v36 = vld [vmem:[%s892_s7 + $0x10] sm:$0xf]  ;;  %v102_v37 = vmax.bf16 %v86_v26, %v70_v25  ;;  %v119_v38 = vld [vmem:[%s888_s3 + $0x1c] sm:$0xf]  ;;  %v245_v41 = vld [vmem:[%s892_s7 + $0x14] sm:$0xf] }
  0x15   :  { %328 = vst [vmem:[%s894_s9] sm:$0xff] %v364_v16   ;;  %v197_v40 = vmax.bf16 %v181_v15, %v165_v29  ;;  %v276_v42 = vld [vmem:[%s893_s8 + $0x10] sm:$0xf]  ;;  %v103_v43 = vmax.bf16 %v87_v27, %v71_v31  ;;  %v150_v44 = vld [vmem:[%s889_s4 + $0x18] sm:$0xf]  ;;  %v277_v46 = vld [vmem:[%s893_s8 + $0x14] sm:$0xf]  ;;  %v365_v51 = vcombine.low %v290_v33, %v291_v39 }
  0x16   :  { %v228_v45 = vmax.bf16 %v212_v30, %v196_v34  ;;  %v134_v47 = vmax.bf16 %v118_v32, %v102_v37  ;;  %v151_v48 = vld [vmem:[%s889_s4 + $0x1c] sm:$0xf]  ;;  %v182_v49 = vld [vmem:[%s890_s5 + $0x18] sm:$0xf]  ;;  %v40_v54 = vld [vmem:[%s885_s0 + $0x20] sm:$0xf] }
  0x17   :  { %v183_v50 = vld [vmem:[%s890_s5 + $0x1c] sm:$0xf]  ;;  %v229_v52 = vmax.bf16 %v213_v35, %v197_v40  ;;  %v135_v53 = vmax.bf16 %v119_v38, %v103_v43  ;;  %v41_v55 = vld [vmem:[%s885_s0 + $0x24] sm:$0xf]  ;;  %v56_v56 = vld [vmem:[%s886_s1 + $0x20] sm:$0xf] }
  0x18   :  { %v260_v57 = vmax.bf16 %v244_v36, %v228_v45  ;;  %v166_v58 = vmax.bf16 %v150_v44, %v134_v47  ;;  %v57_v59 = vld [vmem:[%s886_s1 + $0x24] sm:$0xf]  ;;  %v72_v60 = vmax.bf16 %v56_v56, %v40_v54  ;;  %v88_v61 = vld [vmem:[%s887_s2 + $0x20] sm:$0xf]  ;;  %366 = vst [vmem:[%s894_s9 + $0x8] sm:$0xff] %v365_v51  }
  0x19   :  { %v89_v62 = vld [vmem:[%s887_s2 + $0x24] sm:$0xf]  ;;  %v261_v63 = vmax.bf16 %v245_v41, %v229_v52  ;;  %v167_v0 = vmax.bf16 %v151_v48, %v135_v53  ;;  %v214_v1 = vld [vmem:[%s891_s6 + $0x18] sm:$0xf]  ;;  %v73_v2 = vmax.bf16 %v57_v59, %v41_v55  ;;  %v120_v3 = vld [vmem:[%s888_s3 + $0x20] sm:$0xf] }
  0x1a   :  { %v292_v4 = vmax.bf16 %v276_v42, %v260_v57  ;;  %v198_v5 = vmax.bf16 %v182_v49, %v166_v58  ;;  %v215_v6 = vld [vmem:[%s891_s6 + $0x1c] sm:$0xf]  ;;  %v246_v7 = vld [vmem:[%s892_s7 + $0x18] sm:$0xf]  ;;  %v104_v8 = vmax.bf16 %v88_v61, %v72_v60  ;;  %v121_v9 = vld [vmem:[%s888_s3 + $0x24] sm:$0xf] }
  0x1b   :  { %v293_v10 = vmax.bf16 %v277_v46, %v261_v63  ;;  %v199_v11 = vmax.bf16 %v183_v50, %v167_v0  ;;  %v247_v12 = vld [vmem:[%s892_s7 + $0x1c] sm:$0xf]  ;;  %v278_v13 = vld [vmem:[%s893_s8 + $0x18] sm:$0xf]  ;;  %v105_v14 = vmax.bf16 %v89_v62, %v73_v2  ;;  %v152_v15 = vld [vmem:[%s889_s4 + $0x20] sm:$0xf] }
  0x1c   :  { %v230_v16 = vmax.bf16 %v214_v1, %v198_v5  ;;  %v279_v17 = vld [vmem:[%s893_s8 + $0x1c] sm:$0xf]  ;;  %v136_v18 = vmax.bf16 %v120_v3, %v104_v8  ;;  %v153_v19 = vld [vmem:[%s889_s4 + $0x24] sm:$0xf]  ;;  %v184_v20 = vld [vmem:[%s890_s5 + $0x20] sm:$0xf] }
  0x1d   :  { %v185_v21 = vld [vmem:[%s890_s5 + $0x24] sm:$0xf]  ;;  %v367_v22 = vcombine.low %v292_v4, %v293_v10  ;;  %v231_v23 = vmax.bf16 %v215_v6, %v199_v11  ;;  %v137_v24 = vmax.bf16 %v121_v9, %v105_v14  ;;  %v42_v25 = vld [vmem:[%s885_s0 + $0x28] sm:$0xf]  ;;  %v43_v26 = vld [vmem:[%s885_s0 + $0x2c] sm:$0xf] }
  0x1e   :  { %v58_v27 = vld [vmem:[%s886_s1 + $0x28] sm:$0xf]  ;;  %v262_v28 = vmax.bf16 %v246_v7, %v230_v16  ;;  %v168_v29 = vmax.bf16 %v152_v15, %v136_v18  ;;  %v59_v30 = vld [vmem:[%s886_s1 + $0x2c] sm:$0xf]  ;;  %v216_v36 = vld [vmem:[%s891_s6 + $0x20] sm:$0xf] }
  0x1f   :  { %v74_v31 = vmax.bf16 %v58_v27, %v42_v25  ;;  %v90_v32 = vld [vmem:[%s887_s2 + $0x28] sm:$0xf]  ;;  %v91_v33 = vld [vmem:[%s887_s2 + $0x2c] sm:$0xf]  ;;  %368 = vst [vmem:[%s894_s9 + $0x10] sm:$0xff] %v367_v22   ;;  %v263_v34 = vmax.bf16 %v247_v12, %v231_v23  ;;  %v169_v35 = vmax.bf16 %v153_v19, %v137_v24  ;;  %v75_v37 = vmax.bf16 %v59_v30, %v43_v26 }
  0x20   :  { %v122_v38 = vld [vmem:[%s888_s3 + $0x28] sm:$0xf]  ;;  %v294_v39 = vmax.bf16 %v278_v13, %v262_v28  ;;  %v200_v40 = vmax.bf16 %v184_v20, %v168_v29  ;;  %v217_v41 = vld [vmem:[%s891_s6 + $0x24] sm:$0xf]  ;;  %v248_v42 = vld [vmem:[%s892_s7 + $0x20] sm:$0xf] }
  0x21   :  { %v106_v43 = vmax.bf16 %v90_v32, %v74_v31  ;;  %v123_v44 = vld [vmem:[%s888_s3 + $0x2c] sm:$0xf]  ;;  %v295_v45 = vmax.bf16 %v279_v17, %v263_v34  ;;  %v201_v46 = vmax.bf16 %v185_v21, %v169_v35  ;;  %v249_v47 = vld [vmem:[%s892_s7 + $0x24] sm:$0xf]  ;;  %v280_v48 = vld [vmem:[%s893_s8 + $0x20] sm:$0xf]  ;;  %v107_v49 = vmax.bf16 %v91_v33, %v75_v37 }
  0x22   :  { %v154_v50 = vld [vmem:[%s889_s4 + $0x28] sm:$0xf]  ;;  %v232_v51 = vmax.bf16 %v216_v36, %v200_v40  ;;  %v281_v52 = vld [vmem:[%s893_s8 + $0x24] sm:$0xf]  ;;  %v155_v54 = vld [vmem:[%s889_s4 + $0x2c] sm:$0xf] }
  0x23   :  { %v138_v53 = vmax.bf16 %v122_v38, %v106_v43  ;;  %v186_v55 = vld [vmem:[%s890_s5 + $0x28] sm:$0xf]  ;;  %v187_v56 = vld [vmem:[%s890_s5 + $0x2c] sm:$0xf]  ;;  %v369_v57 = vcombine.low %v294_v39, %v295_v45  ;;  %v233_v58 = vmax.bf16 %v217_v41, %v201_v46  ;;  %v139_v59 = vmax.bf16 %v123_v44, %v107_v49  ;;  %v44_v60 = vld [vmem:[%s885_s0 + $0x30] sm:$0xf] }
  0x24   :  { %v45_v61 = vld [vmem:[%s885_s0 + $0x34] sm:$0xf]  ;;  %v60_v62 = vld [vmem:[%s886_s1 + $0x30] sm:$0xf]  ;;  %v264_v63 = vmax.bf16 %v248_v42, %v232_v51  ;;  %v218_v7 = vld [vmem:[%s891_s6 + $0x28] sm:$0xf] }
  0x25   :  { %v170_v0 = vmax.bf16 %v154_v50, %v138_v53  ;;  %v61_v1 = vld [vmem:[%s886_s1 + $0x34] sm:$0xf]  ;;  %v76_v2 = vmax.bf16 %v60_v62, %v44_v60  ;;  %v92_v3 = vld [vmem:[%s887_s2 + $0x30] sm:$0xf]  ;;  %370 = vst [vmem:[%s894_s9 + $0x18] sm:$0xff] %v369_v57   ;;  %v265_v5 = vmax.bf16 %v249_v47, %v233_v58  ;;  %v171_v6 = vmax.bf16 %v155_v54, %v139_v59 }
  0x26   :  { %v93_v4 = vld [vmem:[%s887_s2 + $0x34] sm:$0xf]  ;;  %v77_v8 = vmax.bf16 %v61_v1, %v45_v61  ;;  %v124_v9 = vld [vmem:[%s888_s3 + $0x30] sm:$0xf]  ;;  %v296_v10 = vmax.bf16 %v280_v48, %v264_v63  ;;  %v219_v12 = vld [vmem:[%s891_s6 + $0x2c] sm:$0xf] }
  0x27   :  { %v202_v11 = vmax.bf16 %v186_v55, %v170_v0  ;;  %v250_v13 = vld [vmem:[%s892_s7 + $0x28] sm:$0xf]  ;;  %v108_v14 = vmax.bf16 %v92_v3, %v76_v2  ;;  %v125_v15 = vld [vmem:[%s888_s3 + $0x34] sm:$0xf]  ;;  %v297_v16 = vmax.bf16 %v281_v52, %v265_v5  ;;  %v203_v17 = vmax.bf16 %v187_v56, %v171_v6  ;;  %v251_v18 = vld [vmem:[%s892_s7 + $0x2c] sm:$0xf] }
  0x28   :  { %v282_v19 = vld [vmem:[%s893_s8 + $0x28] sm:$0xf]  ;;  %v109_v20 = vmax.bf16 %v93_v4, %v77_v8  ;;  %v156_v21 = vld [vmem:[%s889_s4 + $0x30] sm:$0xf]  ;;  %v283_v23 = vld [vmem:[%s893_s8 + $0x2c] sm:$0xf] }
  0x29   :  { %v234_v22 = vmax.bf16 %v218_v7, %v202_v11  ;;  %v140_v24 = vmax.bf16 %v124_v9, %v108_v14  ;;  %v157_v25 = vld [vmem:[%s889_s4 + $0x34] sm:$0xf]  ;;  %v188_v26 = vld [vmem:[%s890_s5 + $0x30] sm:$0xf]  ;;  %v371_v28 = vcombine.low %v296_v10, %v297_v16  ;;  %v235_v29 = vmax.bf16 %v219_v12, %v203_v17  ;;  %v46_v31 = vld [vmem:[%s885_s0 + $0x38] sm:$0xf] }
  0x2a   :  { %v189_v27 = vld [vmem:[%s890_s5 + $0x34] sm:$0xf]  ;;  %v141_v30 = vmax.bf16 %v125_v15, %v109_v20  ;;  %v47_v32 = vld [vmem:[%s885_s0 + $0x3c] sm:$0xf]  ;;  %v62_v33 = vld [vmem:[%s886_s1 + $0x38] sm:$0xf] }
  0x2b   :  { %v266_v34 = vmax.bf16 %v250_v13, %v234_v22  ;;  %v172_v35 = vmax.bf16 %v156_v21, %v140_v24  ;;  %v63_v36 = vld [vmem:[%s886_s1 + $0x3c] sm:$0xf]  ;;  %v78_v37 = vmax.bf16 %v62_v33, %v46_v31  ;;  %v94_v38 = vld [vmem:[%s887_s2 + $0x38] sm:$0xf]  ;;  %372 = vst [vmem:[%s894_s9 + $0x20] sm:$0xff] %v371_v28   ;;  %v267_v40 = vmax.bf16 %v251_v18, %v235_v29 }
  0x2c   :  { %v95_v39 = vld [vmem:[%s887_s2 + $0x3c] sm:$0xf]  ;;  %v173_v41 = vmax.bf16 %v157_v25, %v141_v30  ;;  %v220_v42 = vld [vmem:[%s891_s6 + $0x30] sm:$0xf]  ;;  %v79_v43 = vmax.bf16 %v63_v36, %v47_v32  ;;  %v126_v44 = vld [vmem:[%s888_s3 + $0x38] sm:$0xf] }
  0x2d   :  { %v298_v45 = vmax.bf16 %v282_v19, %v266_v34  ;;  %v204_v46 = vmax.bf16 %v188_v26, %v172_v35  ;;  %v221_v47 = vld [vmem:[%s891_s6 + $0x34] sm:$0xf]  ;;  %v110_v48 = vmax.bf16 %v94_v38, %v78_v37  ;;  %v127_v49 = vld [vmem:[%s888_s3 + $0x3c] sm:$0xf]  ;;  %v299_v50 = vmax.bf16 %v283_v23, %v267_v40  ;;  %v252_v52 = vld [vmem:[%s892_s7 + $0x30] sm:$0xf] }
  0x2e   :  { %v205_v51 = vmax.bf16 %v189_v27, %v173_v41  ;;  %v111_v53 = vmax.bf16 %v95_v39, %v79_v43  ;;  %v158_v54 = vld [vmem:[%s889_s4 + $0x38] sm:$0xf]  ;;  %v253_v56 = vld [vmem:[%s892_s7 + $0x34] sm:$0xf]  ;;  %v159_v58 = vld [vmem:[%s889_s4 + $0x3c] sm:$0xf] }
  0x2f   :  { %v236_v55 = vmax.bf16 %v220_v42, %v204_v46  ;;  %v142_v57 = vmax.bf16 %v126_v44, %v110_v48  ;;  %v373_v59 = vcombine.low %v298_v45, %v299_v50  ;;  %v284_v61 = vld [vmem:[%s893_s8 + $0x30] sm:$0xf]  ;;  %v190_v63 = vld [vmem:[%s890_s5 + $0x38] sm:$0xf]  ;;  %v285_v1 = vld [vmem:[%s893_s8 + $0x34] sm:$0xf] }
  0x30   :  { %v237_v60 = vmax.bf16 %v221_v47, %v205_v51  ;;  %v143_v62 = vmax.bf16 %v127_v49, %v111_v53  ;;  %v191_v3 = vld [vmem:[%s890_s5 + $0x3c] sm:$0xf]  ;;  %v222_v6 = vld [vmem:[%s891_s6 + $0x38] sm:$0xf] }
  0x31   :  { %v268_v0 = vmax.bf16 %v252_v52, %v236_v55  ;;  %v174_v2 = vmax.bf16 %v158_v54, %v142_v57  ;;  %374 = vst [vmem:[%s894_s9 + $0x28] sm:$0xff] %v373_v59   ;;  %v223_v9 = vld [vmem:[%s891_s6 + $0x3c] sm:$0xf]  ;;  %v254_v12 = vld [vmem:[%s892_s7 + $0x38] sm:$0xf] }
  0x32   :  { %v269_v4 = vmax.bf16 %v253_v56, %v237_v60  ;;  %v175_v5 = vmax.bf16 %v159_v58, %v143_v62  ;;  %v255_v14 = vld [vmem:[%s892_s7 + $0x3c] sm:$0xf]  ;;  %v286_v17 = vld [vmem:[%s893_s8 + $0x38] sm:$0xf] }
  0x33   :  { %v300_v7 = vmax.bf16 %v284_v61, %v268_v0  ;;  %v206_v8 = vmax.bf16 %v190_v63, %v174_v2  ;;  %v287_v19 = vld [vmem:[%s893_s8 + $0x3c] sm:$0xf] }
  0x34   :  { %v301_v10 = vmax.bf16 %v285_v1, %v269_v4  ;;  %v207_v11 = vmax.bf16 %v191_v3, %v175_v5 }
  0x35   :  { %v238_v13 = vmax.bf16 %v222_v6, %v206_v8 }
  0x36   :  { %v375_v15 = vcombine.low %v300_v7, %v301_v10  ;;  %v239_v16 = vmax.bf16 %v223_v9, %v207_v11 }
  0x37   :  { %v270_v18 = vmax.bf16 %v254_v12, %v238_v13 }
  0x38   :  { %376 = vst [vmem:[%s894_s9 + $0x30] sm:$0xff] %v375_v15   ;;  %v271_v20 = vmax.bf16 %v255_v14, %v239_v16 }
  0x39   :  { %v302_v21 = vmax.bf16 %v286_v17, %v270_v18 }
  0x3a   :  { %v303_v22 = vmax.bf16 %v287_v19, %v271_v20 }
  0x3c   :  { %v377_v23 = vcombine.low %v302_v21, %v303_v22 }
  0x3e   :  { %378 = vst [vmem:[%s894_s9 + $0x38] sm:$0xff] %v377_v23  }

// kernel: resnet_simple_forward.17
= control target key start
LH: loop header
LB: loop body
LE: loop exit
PB: predicated region body
PF: predicated region fallthrough
CT: control target
= control target key end

     0   :  { %s3251_s1 = inlined_call_operand.vmem [shape: bf16[1152,128], index: 1, kind: input, shape index: {}]   ;;  %s3252_s0 = inlined_call_operand.vmem [shape: bf16[128,1152], index: 0, kind: input, shape index: {}]   ;;  %s3253_s4 = inlined_call_operand.vmem [shape: bf16[128,128], index: 4, kind: input, shape index: {}]   ;;  %s3254_s2 = inlined_call_operand.vmem [shape: f32[1,128], index: 2, kind: input, shape index: {}]   ;;  %s3255_s3 = inlined_call_operand.vmem [shape: f32[1,128], index: 3, kind: input, shape index: {}]   ;;  %s3256_s5 = inlined_call_operand.vmem [shape: bf16[128,128], index: 5, kind: output, shape index: {}]  }
   0x1   :  { %v2308_v0 = vld [vmem:[%s3251_s1 + $0x78] sm:$0xff]   ;;  %v2312_v4 = vld [vmem:[%s3251_s1 + $0x70] sm:$0xff]   ;;  %v2316_v8 = vld [vmem:[%s3251_s1 + $0x68] sm:$0xff]  }
   0x2   :  { %v2309_v1 = vld [vmem:[%s3251_s1 + $0xf8] sm:$0xff]   ;;  %1988 = vmatprep.subr.bf16.mxu0 %v2308_v0  ;;  %v2313_v5 = vld [vmem:[%s3251_s1 + $0xf0] sm:$0xff]   ;;  %v2317_v9 = vld [vmem:[%s3251_s1 + $0xe8] sm:$0xff]  }
   0x3   :  { %v2310_v2 = vld [vmem:[%s3251_s1 + $0x38] sm:$0xff]   ;;  %2052 = vmatprep.subr.bf16.mxu1 %v2309_v1  ;;  %v2314_v6 = vld [vmem:[%s3251_s1 + $0x30] sm:$0xff]   ;;  %v2318_v10 = vld [vmem:[%s3251_s1 + $0x28] sm:$0xff]  }
   0x4   :  { %v2311_v3 = vld [vmem:[%s3251_s1 + $0xb8] sm:$0xff]   ;;  %1989 = vmatpush3.bf16.msra.mxu0 %v2310_v2  ;;  %v2315_v7 = vld [vmem:[%s3251_s1 + $0xb0] sm:$0xff]   ;;  %v2319_v11 = vld [vmem:[%s3251_s1 + $0xa8] sm:$0xff]  }
   0x5   :  { %2053 = vmatpush3.bf16.msra.mxu1 %v2311_v3  ;;  %1990 = vmatprep.subr.bf16.mxu0 %v2312_v4  ;;  %v2320_v12 = vld [vmem:[%s3251_s1 + $0x60] sm:$0xff]   ;;  %v2324_v16 = vld [vmem:[%s3251_s1 + $0x58] sm:$0xff]   ;;  %v2328_v20 = vld [vmem:[%s3251_s1 + $0x50] sm:$0xff]  }
   0x6   :  { %2054 = vmatprep.subr.bf16.mxu1 %v2313_v5  ;;  %v2321_v13 = vld [vmem:[%s3251_s1 + $0xe0] sm:$0xff]   ;;  %v2325_v17 = vld [vmem:[%s3251_s1 + $0xd8] sm:$0xff]   ;;  %v2329_v21 = vld [vmem:[%s3251_s1 + $0xd0] sm:$0xff]  }
   0x7   :  { %v2322_v14 = vld [vmem:[%s3251_s1 + $0x20] sm:$0xff]   ;;  %v2326_v18 = vld [vmem:[%s3251_s1 + $0x18] sm:$0xff]   ;;  %v2330_v22 = vld [vmem:[%s3251_s1 + $0x10] sm:$0xff]  }
   0x8   :  { %1991 = vmatpush3.bf16.msra.mxu0 %v2314_v6  ;;  %v2323_v15 = vld [vmem:[%s3251_s1 + $0xa0] sm:$0xff]   ;;  %v2327_v19 = vld [vmem:[%s3251_s1 + $0x98] sm:$0xff]   ;;  %v2331_v23 = vld [vmem:[%s3251_s1 + $0x90] sm:$0xff]  }
   0x9   :  { %2055 = vmatpush3.bf16.msra.mxu1 %v2315_v7  ;;  %1992 = vmatprep.subr.bf16.mxu0 %v2316_v8  ;;  %v2332_v24 = vld [vmem:[%s3251_s1 + $0x48] sm:$0xff]   ;;  %v2336_v28 = vld [vmem:[%s3251_s1 + $0x40] sm:$0xff]   ;;  %v2346_v36 = vld [vmem:[%s3251_s1 + $0x178] sm:$0xff]  }
   0xa   :  { %2056 = vmatprep.subr.bf16.mxu1 %v2317_v9  ;;  %v2333_v25 = vld [vmem:[%s3251_s1 + $0xc8] sm:$0xff]   ;;  %v2337_v29 = vld [vmem:[%s3251_s1 + $0xc0] sm:$0xff]   ;;  %v2347_v37 = vld [vmem:[%s3251_s1 + $0x1f8] sm:$0xff]  }
   0xb   :  { %v2334_v26 = vld [vmem:[%s3251_s1 + $0x8] sm:$0xff]   ;;  %v2338_v30 = vld [vmem:[%s3251_s1] sm:$0xff]   ;;  %v2348_v38 = vld [vmem:[%s3251_s1 + $0x138] sm:$0xff]  }
   0xc   :  { %1993 = vmatpush3.bf16.msra.mxu0 %v2318_v10  ;;  %v2335_v27 = vld [vmem:[%s3251_s1 + $0x88] sm:$0xff]   ;;  %v2339_v31 = vld [vmem:[%s3251_s1 + $0x80] sm:$0xff]   ;;  %v2349_v39 = vld [vmem:[%s3251_s1 + $0x1b8] sm:$0xff]  }
   0xd   :  { %2057 = vmatpush3.bf16.msra.mxu1 %v2319_v11  ;;  %1994 = vmatprep.subr.bf16.mxu0 %v2320_v12  ;;  %v2340_v32 = vld [vmem:[%s3252_s0] ss:$36 sps:$4 sm:$0xff]   ;;  %v2343_v34 = vld [vmem:[%s3252_s0 + $0x8] ss:$36 sps:$4 sm:$0xff]   ;;  %v2352_v41 = vld [vmem:[%s3252_s0 + $0x54] ss:$36 sps:$4 sm:$0xff]  }
   0xe   :  { %2058 = vmatprep.subr.bf16.mxu1 %v2321_v13  ;;  %v2342_v33 = vld [vmem:[%s3252_s0 + $0x4] ss:$36 sps:$4 sm:$0xff]   ;;  %v2345_v35 = vld [vmem:[%s3252_s0 + $0xc] ss:$36 sps:$4 sm:$0xff]   ;;  %v2360_v48 = vld [vmem:[%s3252_s0 + $0x94] ss:$36 sps:$4 sm:$0xff]  }
   0xf   :  { %1077 = vmatprep.mubr.bf16.mxu0 %v2342_v33  ;;  %1174 = vmatprep.mubr.bf16.mxu1 %v2345_v35  ;;  %v2350_v40 = vld [vmem:[%s3252_s0 + $0x4c] ss:$36 sps:$4 sm:$0xff]   ;;  %v2362_v49 = vld [vmem:[%s3252_s0 + $0x9c] ss:$36 sps:$4 sm:$0xff]   ;;  %v2372_v57 = vld [vmem:[%s3252_s0 + $0xe4] ss:$36 sps:$4 sm:$0xff]  }
  0x10   :  { %1995 = vmatpush3.bf16.msra.mxu0 %v2322_v14  ;;  %v2354_v42 = vld [vmem:[%s3252_s0 + $0x48] ss:$36 sps:$4 sm:$0xff]   ;;  %v2355_v43 = vld [vmem:[%s3252_s0 + $0x50] ss:$36 sps:$4 sm:$0xff]   ;;  %v2365_v51 = vld [vmem:[%s3252_s0 + $0x98] ss:$36 sps:$4 sm:$0xff]  }
  0x11   :  { %2059 = vmatpush3.bf16.msra.mxu1 %v2323_v15  ;;  %1996 = vmatprep.subr.bf16.mxu0 %v2324_v16  ;;  %v2356_v44 = vld [vmem:[%s3251_s1 + $0x170] sm:$0xff]   ;;  %v2366_v52 = vld [vmem:[%s3251_s1 + $0x168] sm:$0xff]   ;;  %v2370_v56 = vld [vmem:[%s3252_s0 + $0xdc] ss:$36 sps:$4 sm:$0xff]  }
  0x12   :  { %2060 = vmatprep.subr.bf16.mxu1 %v2325_v17  ;;  %v2357_v45 = vld [vmem:[%s3251_s1 + $0x1f0] sm:$0xff]   ;;  %v2367_v53 = vld [vmem:[%s3251_s1 + $0x1e8] sm:$0xff]   ;;  %v2374_v58 = vld [vmem:[%s3252_s0 + $0xd8] ss:$36 sps:$4 sm:$0xff]  }
  0x13   :  { %v2358_v46 = vld [vmem:[%s3251_s1 + $0x130] sm:$0xff]   ;;  %v2368_v54 = vld [vmem:[%s3251_s1 + $0x128] sm:$0xff]   ;;  %v2375_v59 = vld [vmem:[%s3252_s0 + $0xe0] ss:$36 sps:$4 sm:$0xff]  }
  0x14   :  { %1997 = vmatpush3.bf16.msra.mxu0 %v2326_v18  ;;  %v2359_v47 = vld [vmem:[%s3251_s1 + $0x1b0] sm:$0xff]   ;;  %v2369_v55 = vld [vmem:[%s3251_s1 + $0x1a8] sm:$0xff]   ;;  %v2376_v60 = vld [vmem:[%s3251_s1 + $0x160] sm:$0xff]  }
  0x15   :  { %2061 = vmatpush3.bf16.msra.mxu1 %v2327_v19  ;;  %1998 = vmatprep.subr.bf16.mxu0 %v2328_v20  ;;  %v2364_v50 = vld [vmem:[%s3252_s0 + $0x90] ss:$36 sps:$4 sm:$0xff]   ;;  %v2377_v61 = vld [vmem:[%s3251_s1 + $0x1e0] sm:$0xff]   ;;  %v2386_v3 = vld [vmem:[%s3251_s1 + $0x158] sm:$0xff]  }
  0x16   :  { %2062 = vmatprep.subr.bf16.mxu1 %v2329_v21  ;;  %v2378_v62 = vld [vmem:[%s3251_s1 + $0x120] sm:$0xff]   ;;  %v2382_v1 = vld [vmem:[%s3252_s0 + $0x12c] ss:$36 sps:$4 sm:$0xff]   ;;  %v2387_v5 = vld [vmem:[%s3251_s1 + $0x1d8] sm:$0xff]  }
  0x17   :  { %v2379_v63 = vld [vmem:[%s3251_s1 + $0x1a0] sm:$0xff]   ;;  %v2385_v4 = vld [vmem:[%s3252_s0 + $0x128] ss:$36 sps:$4 sm:$0xff]   ;;  %v2388_v6 = vld [vmem:[%s3251_s1 + $0x118] sm:$0xff]  }
  0x18   :  { %1999 = vmatpush3.bf16.msra.mxu0 %v2330_v22  ;;  %v2380_v0 = vld [vmem:[%s3252_s0 + $0x124] ss:$36 sps:$4 sm:$0xff]   ;;  %v2389_v7 = vld [vmem:[%s3251_s1 + $0x198] sm:$0xff]   ;;  %v2390_v8 = vld [vmem:[%s3252_s0 + $0x16c] ss:$36 sps:$4 sm:$0xff]  }
  0x19   :  { %2063 = vmatpush3.bf16.msra.mxu1 %v2331_v23  ;;  %2000 = vmatprep.subr.bf16.mxu0 %v2332_v24  ;;  %v2384_v2 = vld [vmem:[%s3252_s0 + $0x120] ss:$36 sps:$4 sm:$0xff]   ;;  %v2392_v9 = vld [vmem:[%s3252_s0 + $0x174] ss:$36 sps:$4 sm:$0xff]   ;;  %v2394_v12 = vld [vmem:[%s3252_s0 + $0x168] ss:$36 sps:$4 sm:$0xff]  }
  0x1a   :  { %2064 = vmatprep.subr.bf16.mxu1 %v2333_v25  ;;  %v2396_v10 = vld [vmem:[%s3251_s1 + $0x150] sm:$0xff]   ;;  %v2402_v17 = vld [vmem:[%s3252_s0 + $0x1bc] ss:$36 sps:$4 sm:$0xff]   ;;  %v2406_v18 = vld [vmem:[%s3251_s1 + $0x148] sm:$0xff]  }
  0x1b   :  { %v2397_v11 = vld [vmem:[%s3251_s1 + $0x1d0] sm:$0xff]   ;;  %v2407_v19 = vld [vmem:[%s3251_s1 + $0x1c8] sm:$0xff]   ;;  %v2405_v23 = vld [vmem:[%s3252_s0 + $0x1b8] ss:$36 sps:$4 sm:$0xff]  }
  0x1c   :  { %2001 = vmatpush3.bf16.msra.mxu0 %v2334_v26  ;;  %v2398_v13 = vld [vmem:[%s3251_s1 + $0x110] sm:$0xff]   ;;  %v2408_v20 = vld [vmem:[%s3251_s1 + $0x108] sm:$0xff]   ;;  %v2410_v24 = vld [vmem:[%s3252_s0 + $0x1fc] ss:$36 sps:$4 sm:$0xff]  }
  0x1d   :  { %2065 = vmatpush3.bf16.msra.mxu1 %v2335_v27  ;;  %2002 = vmatprep.subr.bf16.mxu0 %v2336_v28  ;;  %v2399_v14 = vld [vmem:[%s3251_s1 + $0x190] sm:$0xff]   ;;  %v2409_v21 = vld [vmem:[%s3251_s1 + $0x188] sm:$0xff]   ;;  %v2416_v26 = vld [vmem:[%s3251_s1 + $0x140] sm:$0xff]  }
  0x1e   :  { %2066 = vmatprep.subr.bf16.mxu1 %v2337_v29  ;;  %v2395_v15 = vld [vmem:[%s3252_s0 + $0x170] ss:$36 sps:$4 sm:$0xff]   ;;  %v2412_v25 = vld [vmem:[%s3252_s0 + $0x204] ss:$36 sps:$4 sm:$0xff]  }
  0x1f   :  { %v2400_v16 = vld [vmem:[%s3252_s0 + $0x1b4] ss:$36 sps:$4 sm:$0xff]   ;;  %v2417_v27 = vld [vmem:[%s3251_s1 + $0x1c0] sm:$0xff]  }
  0x20   :  { %2003 = vmatpush3.bf16.msra.mxu0 %v2338_v30  ;;  %v2404_v22 = vld [vmem:[%s3252_s0 + $0x1b0] ss:$36 sps:$4 sm:$0xff]   ;;  %v2418_v28 = vld [vmem:[%s3251_s1 + $0x100] sm:$0xff]   ;;  %v2414_v30 = vld [vmem:[%s3252_s0 + $0x1f8] ss:$36 sps:$4 sm:$0xff]  }
  0x21   :  { %2067 = vmatpush3.bf16.msra.mxu1 %v2339_v31  ;;  %2116 = vmatprep.subr.bf16.mxu0 %v2346_v36  ;;  %v2419_v29 = vld [vmem:[%s3251_s1 + $0x180] sm:$0xff]   ;;  %v2422_v33 = vld [vmem:[%s3252_s0 + $0x14] ss:$36 sps:$4 sm:$0xff]  }
  0x22   :  { %2180 = vmatprep.subr.bf16.mxu1 %v2347_v37  ;;  %v2415_v31 = vld [vmem:[%s3252_s0 + $0x200] ss:$36 sps:$4 sm:$0xff]   ;;  %v2420_v35 = vld [vmem:[%s3252_s0 + $0x10] ss:$36 sps:$4 sm:$0xff]   ;;  %v2423_v36 = vld [vmem:[%s3252_s0 + $0x18] ss:$36 sps:$4 sm:$0xff]  }
  0x23   :  { %1078 = vmatmul.mubr.bf16.vlgmr.msra.gmra.mxu0 %v2340_v32  ;;  %v2426_v32 = vld [vmem:[%s3251_s1 + $0x238] sm:$0xff]  }
  0x24   :  { %1175 = vmatmul.mubr.bf16.vlgmr.msra.gmra.mxu1 %v2343_v34  ;;  %2117 = vmatpush3.bf16.msra.mxu0 %v2348_v38  ;;  %v2425_v34 = vld [vmem:[%s3252_s0 + $0x1c] ss:$36 sps:$4 sm:$0xff]   ;;  %v2429_v38 = vld [vmem:[%s3252_s0 + $0x64] ss:$36 sps:$4 sm:$0xff]  }
  0x25   :  { %2181 = vmatpush3.bf16.msra.mxu1 %v2349_v39  ;;  %1085 = vmatprep.mubr.bf16.mxu0 %v2350_v40  ;;  %v2427_v37 = vld [vmem:[%s3252_s0 + $0x5c] ss:$36 sps:$4 sm:$0xff]   ;;  %v2433_v39 = vld [vmem:[%s3251_s1 + $0x230] sm:$0xff]   ;;  %v2440_v40 = vld [vmem:[%s3251_s1 + $0x228] sm:$0xff]  }
  0x26   :  { %1182 = vmatprep.mubr.bf16.mxu1 %v2352_v41  ;;  %2118 = vmatprep.subr.bf16.mxu0 %v2356_v44  ;;  %v2431_v41 = vld [vmem:[%s3252_s0 + $0x58] ss:$36 sps:$4 sm:$0xff]   ;;  %v2436_v44 = vld [vmem:[%s3252_s0 + $0xac] ss:$36 sps:$4 sm:$0xff]  }
  0x27   :  { %2182 = vmatprep.subr.bf16.mxu1 %v2357_v45  ;;  %v2447_v45 = vld [vmem:[%s3251_s1 + $0x220] sm:$0xff]  }
  0x28   :  { %2119 = vmatpush3.bf16.msra.mxu0 %v2358_v46  ;;  %v2454_v46 = vld [vmem:[%s3251_s1 + $0x218] sm:$0xff]  }
  0x29   :  { %2183 = vmatpush3.bf16.msra.mxu1 %v2359_v47  ;;  %2120 = vmatprep.subr.bf16.mxu0 %v2366_v52  ;;  %v2438_v47 = vld [vmem:[%s3252_s0 + $0xa0] ss:$36 sps:$4 sm:$0xff]   ;;  %v2445_v52 = vld [vmem:[%s3252_s0 + $0xe8] ss:$36 sps:$4 sm:$0xff]  }
  0x2a   :  { %2184 = vmatprep.subr.bf16.mxu1 %v2367_v53  ;;  %v2468_v53 = vld [vmem:[%s3251_s1 + $0x208] sm:$0xff]  }
  0x2b   :  { %1086 = vmatmul.mubr.bf16.gmra.mxu0 %v2354_v42  ;;  %v2432_v42 = vld [vmem:[%s3252_s0 + $0x60] ss:$36 sps:$4 sm:$0xff]  }
  0x2c   :  { %1183 = vmatmul.mubr.bf16.gmra.mxu1 %v2355_v43  ;;  %1093 = vmatprep.mubr.bf16.mxu0 %v2360_v48  ;;  %v2434_v43 = vld [vmem:[%s3252_s0 + $0xa4] ss:$36 sps:$4 sm:$0xff]  }
  0x2d   :  { %1190 = vmatprep.mubr.bf16.mxu1 %v2362_v49  ;;  %2121 = vmatpush3.bf16.msra.mxu0 %v2368_v54  ;;  %v2439_v48 = vld [vmem:[%s3252_s0 + $0xa8] ss:$36 sps:$4 sm:$0xff]   ;;  %v2446_v54 = vld [vmem:[%s3252_s0 + $0xf0] ss:$36 sps:$4 sm:$0xff]  }
  0x2e   :  { %2185 = vmatpush3.bf16.msra.mxu1 %v2369_v55  ;;  %2122 = vmatprep.subr.bf16.mxu0 %v2376_v60  ;;  %v2441_v49 = vld [vmem:[%s3252_s0 + $0xec] ss:$36 sps:$4 sm:$0xff]   ;;  %v2448_v55 = vld [vmem:[%s3252_s0 + $0x134] ss:$36 sps:$4 sm:$0xff]   ;;  %v2455_v60 = vld [vmem:[%s3252_s0 + $0x17c] ss:$36 sps:$4 sm:$0xff]  }
  0x2f   :  { %2186 = vmatprep.subr.bf16.mxu1 %v2377_v61  ;;  %v2457_v61 = vld [vmem:[%s3252_s0 + $0x184] ss:$36 sps:$4 sm:$0xff]  }
  0x31   :  { %2123 = vmatpush3.bf16.msra.mxu0 %v2378_v62  ;;  %v2459_v62 = vld [vmem:[%s3252_s0 + $0x178] ss:$36 sps:$4 sm:$0xff]  }
  0x32   :  { %2187 = vmatpush3.bf16.msra.mxu1 %v2379_v63  ;;  %2124 = vmatprep.subr.bf16.mxu0 %v2386_v3  ;;  %v2460_v63 = vld [vmem:[%s3252_s0 + $0x180] ss:$36 sps:$4 sm:$0xff]   ;;  %v2467_v3 = vld [vmem:[%s3252_s0 + $0x1c8] ss:$36 sps:$4 sm:$0xff]  }
  0x33   :  { %1094 = vmatmul.mubr.bf16.gmra.mxu0 %v2364_v50  ;;  %2188 = vmatprep.subr.bf16.mxu1 %v2387_v5  ;;  %v2443_v50 = vld [vmem:[%s3252_s0 + $0xf4] ss:$36 sps:$4 sm:$0xff]  }
  0x34   :  { %1191 = vmatmul.mubr.bf16.gmra.mxu1 %v2365_v51  ;;  %1101 = vmatprep.mubr.bf16.mxu0 %v2370_v56  ;;  %v2461_v51 = vld [vmem:[%s3251_s1 + $0x210] sm:$0xff]   ;;  %v2450_v56 = vld [vmem:[%s3252_s0 + $0x13c] ss:$36 sps:$4 sm:$0xff]  }
  0x35   :  { %1198 = vmatprep.mubr.bf16.mxu1 %v2372_v57  ;;  %2125 = vmatpush3.bf16.msra.mxu0 %v2388_v6  ;;  %v2475_v57 = vld [vmem:[%s3251_s1 + $0x200] sm:$0xff]   ;;  %v2471_v5 = vld [vmem:[%s3252_s0 + $0x214] ss:$36 sps:$4 sm:$0xff]   ;;  %v2473_v6 = vld [vmem:[%s3252_s0 + $0x208] ss:$36 sps:$4 sm:$0xff]  }
  0x36   :  { %2189 = vmatpush3.bf16.msra.mxu1 %v2389_v7  ;;  %2126 = vmatprep.subr.bf16.mxu0 %v2396_v10  ;;  %v2474_v7 = vld [vmem:[%s3252_s0 + $0x210] ss:$36 sps:$4 sm:$0xff]   ;;  %v2478_v10 = vld [vmem:[%s3252_s0 + $0x68] ss:$36 sps:$4 sm:$0xff]  }
  0x37   :  { %2190 = vmatprep.subr.bf16.mxu1 %v2397_v11  ;;  %v2479_v11 = vld [vmem:[%s3252_s0 + $0x188] ss:$36 sps:$4 sm:$0xff]  }
  0x39   :  { %2127 = vmatpush3.bf16.msra.mxu0 %v2398_v13  ;;  %v2481_v13 = vld [vmem:[%s3252_s0 + $0x1d0] ss:$36 sps:$4 sm:$0xff]  }
  0x3a   :  { %2191 = vmatpush3.bf16.msra.mxu1 %v2399_v14  ;;  %2128 = vmatprep.subr.bf16.mxu0 %v2406_v18  ;;  %v2482_v14 = vld [vmem:[%s3252_s0 + $0xf8] ss:$36 sps:$4 sm:$0xff]  }
  0x3b   :  { %1102 = vmatmul.mubr.bf16.gmra.mxu0 %v2374_v58  ;;  %2192 = vmatprep.subr.bf16.mxu1 %v2407_v19  ;;  %v2452_v58 = vld [vmem:[%s3252_s0 + $0x130] ss:$36 sps:$4 sm:$0xff]  }
  0x3c   :  { %1199 = vmatmul.mubr.bf16.gmra.mxu1 %v2375_v59  ;;  %1109 = vmatprep.mubr.bf16.mxu0 %v2380_v0  ;;  %v2453_v59 = vld [vmem:[%s3252_s0 + $0x138] ss:$36 sps:$4 sm:$0xff]   ;;  %v2462_v0 = vld [vmem:[%s3252_s0 + $0x1c4] ss:$36 sps:$4 sm:$0xff]  }
  0x3d   :  { %1206 = vmatprep.mubr.bf16.mxu1 %v2382_v1  ;;  %2129 = vmatpush3.bf16.msra.mxu0 %v2408_v20  ;;  %v2464_v1 = vld [vmem:[%s3252_s0 + $0x1cc] ss:$36 sps:$4 sm:$0xff]  }
  0x3e   :  { %2193 = vmatpush3.bf16.msra.mxu1 %v2409_v21  ;;  %2130 = vmatprep.subr.bf16.mxu0 %v2416_v26 }
  0x3f   :  { %2194 = vmatprep.subr.bf16.mxu1 %v2417_v27 }
  0x41   :  { %2131 = vmatpush3.bf16.msra.mxu0 %v2418_v28 }
  0x42   :  { %2195 = vmatpush3.bf16.msra.mxu1 %v2419_v29  ;;  %2260 = vmatprep.subr.bf16.mxu0 %v2426_v32 }
  0x43   :  { %1110 = vmatmul.mubr.bf16.gmra.mxu0 %v2384_v2  ;;  %2292 = vmatprep.subr.bf16.mxu1 %v2426_v32  ;;  %v2466_v2 = vld [vmem:[%s3252_s0 + $0x1c0] ss:$36 sps:$4 sm:$0xff]  }
  0x44   :  { %1207 = vmatmul.mubr.bf16.gmra.mxu1 %v2385_v4  ;;  %1117 = vmatprep.mubr.bf16.mxu0 %v2390_v8  ;;  %v2469_v4 = vld [vmem:[%s3252_s0 + $0x20c] ss:$36 sps:$4 sm:$0xff]   ;;  %v2476_v8 = vld [vmem:[%s3252_s0 + $0x20] ss:$36 sps:$4 sm:$0xff]  }
  0x45   :  { %1214 = vmatprep.mubr.bf16.mxu1 %v2392_v9  ;;  %v2477_v9 = vld [vmem:[%s3252_s0 + $0x140] ss:$36 sps:$4 sm:$0xff]  }
  0x4b   :  { %1118 = vmatmul.mubr.bf16.gmra.mxu0 %v2394_v12  ;;  %v2480_v12 = vld [vmem:[%s3252_s0 + $0xb0] ss:$36 sps:$4 sm:$0xff]  }
  0x4c   :  { %1215 = vmatmul.mubr.bf16.gmra.mxu1 %v2395_v15  ;;  %1125 = vmatprep.mubr.bf16.mxu0 %v2400_v16  ;;  %v2483_v15 = vld [vmem:[%s3252_s0 + $0x218] ss:$36 sps:$4 sm:$0xff]  }
  0x4d   :  { %1222 = vmatprep.mubr.bf16.mxu1 %v2402_v17 }
  0x53   :  { %1126 = vmatmul.mubr.bf16.gmra.mxu0 %v2404_v22 }
  0x54   :  { %1223 = vmatmul.mubr.bf16.gmra.mxu1 %v2405_v23  ;;  %1133 = vmatprep.mubr.bf16.mxu0 %v2410_v24 }
  0x55   :  { %1230 = vmatprep.mubr.bf16.mxu1 %v2412_v25 }
  0x5b   :  { %1134 = vmatmul.mubr.bf16.gmra.mxu0 %v2414_v30 }
  0x5c   :  { %1231 = vmatmul.mubr.bf16.gmra.mxu1 %v2415_v31  ;;  %1271 = vmatprep.mubr.bf16.mxu0 %v2422_v33 }
  0x5d   :  { %1368 = vmatprep.mubr.bf16.mxu1 %v2425_v34 }
  0x63   :  { %1272 = vmatmul.mubr.bf16.vlgmr.msra.gmra.mxu0 %v2420_v35 }
  0x64   :  { %1369 = vmatmul.mubr.bf16.vlgmr.msra.gmra.mxu1 %v2423_v36  ;;  %2261 = vmatpush3.bf16.msra.mxu0 %v2426_v32 }
  0x65   :  { %2300 = vmatpush3.bf16.msra.mxu1 %v2426_v32  ;;  %1279 = vmatprep.mubr.bf16.mxu0 %v2427_v37 }
  0x66   :  { %1376 = vmatprep.mubr.bf16.mxu1 %v2429_v38  ;;  %2262 = vmatprep.subr.bf16.mxu0 %v2433_v39 }
  0x67   :  { %2293 = vmatprep.subr.bf16.mxu1 %v2433_v39 }
  0x68   :  { %2263 = vmatpush3.bf16.msra.mxu0 %v2433_v39 }
  0x69   :  { %2301 = vmatpush3.bf16.msra.mxu1 %v2433_v39  ;;  %2264 = vmatprep.subr.bf16.mxu0 %v2440_v40 }
  0x6a   :  { %2294 = vmatprep.subr.bf16.mxu1 %v2440_v40 }
  0x6b   :  { %1280 = vmatmul.mubr.bf16.gmra.mxu0 %v2431_v41 }
  0x6c   :  { %1377 = vmatmul.mubr.bf16.gmra.mxu1 %v2432_v42  ;;  %1287 = vmatprep.mubr.bf16.mxu0 %v2434_v43 }
  0x6d   :  { %1384 = vmatprep.mubr.bf16.mxu1 %v2436_v44  ;;  %2265 = vmatpush3.bf16.msra.mxu0 %v2440_v40 }
  0x6e   :  { %2302 = vmatpush3.bf16.msra.mxu1 %v2440_v40  ;;  %2266 = vmatprep.subr.bf16.mxu0 %v2447_v45 }
  0x6f   :  { %2295 = vmatprep.subr.bf16.mxu1 %v2447_v45 }
  0x71   :  { %2267 = vmatpush3.bf16.msra.mxu0 %v2447_v45 }
  0x72   :  { %2303 = vmatpush3.bf16.msra.mxu1 %v2447_v45  ;;  %2268 = vmatprep.subr.bf16.mxu0 %v2454_v46 }
  0x73   :  { %1288 = vmatmul.mubr.bf16.gmra.mxu0 %v2438_v47  ;;  %2296 = vmatprep.subr.bf16.mxu1 %v2454_v46 }
  0x74   :  { %1385 = vmatmul.mubr.bf16.gmra.mxu1 %v2439_v48  ;;  %1295 = vmatprep.mubr.bf16.mxu0 %v2441_v49 }
  0x75   :  { %1392 = vmatprep.mubr.bf16.mxu1 %v2443_v50  ;;  %2269 = vmatpush3.bf16.msra.mxu0 %v2454_v46 }
  0x76   :  { %2304 = vmatpush3.bf16.msra.mxu1 %v2454_v46  ;;  %2270 = vmatprep.subr.bf16.mxu0 %v2461_v51 }
  0x77   :  { %2297 = vmatprep.subr.bf16.mxu1 %v2461_v51 }
  0x79   :  { %2271 = vmatpush3.bf16.msra.mxu0 %v2461_v51 }
  0x7a   :  { %2305 = vmatpush3.bf16.msra.mxu1 %v2461_v51  ;;  %2272 = vmatprep.subr.bf16.mxu0 %v2468_v53 }
  0x7b   :  { %1296 = vmatmul.mubr.bf16.gmra.mxu0 %v2445_v52  ;;  %2298 = vmatprep.subr.bf16.mxu1 %v2468_v53 }
  0x7c   :  { %1393 = vmatmul.mubr.bf16.gmra.mxu1 %v2446_v54  ;;  %1303 = vmatprep.mubr.bf16.mxu0 %v2448_v55 }
  0x7d   :  { %1400 = vmatprep.mubr.bf16.mxu1 %v2450_v56  ;;  %2273 = vmatpush3.bf16.msra.mxu0 %v2468_v53 }
  0x7e   :  { %2306 = vmatpush3.bf16.msra.mxu1 %v2468_v53  ;;  %2274 = vmatprep.subr.bf16.mxu0 %v2475_v57 }
  0x7f   :  { %2299 = vmatprep.subr.bf16.mxu1 %v2475_v57 }
  0x81   :  { %2275 = vmatpush3.bf16.msra.mxu0 %v2475_v57 }
  0x82   :  { %2307 = vmatpush3.bf16.msra.mxu1 %v2475_v57 }
  0x83   :  { %1304 = vmatmul.mubr.bf16.gmra.mxu0 %v2452_v58 }
  0x84   :  { %1401 = vmatmul.mubr.bf16.gmra.mxu1 %v2453_v59  ;;  %1311 = vmatprep.mubr.bf16.mxu0 %v2455_v60 }
  0x85   :  { %1408 = vmatprep.mubr.bf16.mxu1 %v2457_v61 }
  0x8b   :  { %1312 = vmatmul.mubr.bf16.gmra.mxu0 %v2459_v62 }
  0x8c   :  { %1409 = vmatmul.mubr.bf16.gmra.mxu1 %v2460_v63  ;;  %1319 = vmatprep.mubr.bf16.mxu0 %v2462_v0 }
  0x8d   :  { %1416 = vmatprep.mubr.bf16.mxu1 %v2464_v1 }
  0x93   :  { %1320 = vmatmul.mubr.bf16.gmra.mxu0 %v2466_v2 }
  0x94   :  { %1417 = vmatmul.mubr.bf16.gmra.mxu1 %v2467_v3  ;;  %1327 = vmatprep.mubr.bf16.mxu0 %v2469_v4 }
  0x95   :  { %1424 = vmatprep.mubr.bf16.mxu1 %v2471_v5 }
  0x9b   :  { %1328 = vmatmul.mubr.bf16.gmra.mxu0 %v2473_v6 }
  0x9c   :  { %1425 = vmatmul.mubr.bf16.gmra.mxu1 %v2474_v7  ;;  %2276 = vmatprep.mubr.bf16.mxu0 %v2476_v8 }
  0x9d   :  { %2284 = vmatprep.mubr.bf16.mxu1 %v2477_v9 }
  0xa3   :  { %2277 = vmatmul.mubr.bf16.vlgmr.msra.gmra.mxu0 %v2478_v10 }
  0xa4   :  { %2285 = vmatmul.mubr.bf16.vlgmr.msra.gmra.mxu1 %v2479_v11  ;;  %2280 = vmatprep.mubr.bf16.mxu0 %v2480_v12 }
  0xa5   :  { %2288 = vmatprep.mubr.bf16.mxu1 %v2481_v13 }
  0xab   :  { %2281 = vmatmul.mubr.bf16.gmra.mxu0 %v2482_v14 }
  0xac   :  { %2289 = vmatmul.mubr.bf16.gmra.mxu1 %v2483_v15 }
  0xe3   :  { %v2004_v16 = vpop.f32.mrf.mxu0 }
  0xe4   :  { %v2068_v17 = vpop.f32.mrf.mxu1 }
  0xe5   :  { %v2005_v18 = vpop.f32.mrf.mxu0 }
  0xe6   :  { %v2006_v19 = vadd.f32 %v2005_v18, %v2004_v16  ;;  %v2069_v20 = vpop.f32.mrf.mxu1 }
  0xe7   :  { %v2070_v21 = vadd.f32 %v2069_v20, %v2068_v17  ;;  %v2007_v22 = vpop.f32.mrf.mxu0 }
  0xe8   :  { %v2071_v23 = vpop.f32.mrf.mxu1 }
  0xe9   :  { %v2946_v24 = vadd.f32 %v2070_v21, %v2006_v19  ;;  %v2008_v25 = vpop.f32.mrf.mxu0 }
  0xea   :  { %v2009_v26 = vadd.f32 %v2008_v25, %v2007_v22  ;;  %v2072_v27 = vpop.f32.mrf.mxu1 }
  0xeb   :  { %v2073_v28 = vadd.f32 %v2072_v27, %v2071_v23  ;;  %v2010_v29 = vpop.f32.mrf.mxu0 }
  0xec   :  { %v2074_v30 = vpop.f32.mrf.mxu1 }
  0xed   :  { %v2948_v31 = vadd.f32 %v2073_v28, %v2009_v26  ;;  %v2011_v32 = vpop.f32.mrf.mxu0 }
  0xee   :  { %v2012_v33 = vadd.f32 %v2011_v32, %v2010_v29  ;;  %v2075_v34 = vpop.f32.mrf.mxu1 }
  0xef   :  { %v2076_v35 = vadd.f32 %v2075_v34, %v2074_v30  ;;  %v2013_v36 = vpop.f32.mrf.mxu0 }
  0xf0   :  { %v2077_v37 = vpop.f32.mrf.mxu1 }
  0xf1   :  { %v2950_v38 = vadd.f32 %v2076_v35, %v2012_v33  ;;  %v2014_v39 = vpop.f32.mrf.mxu0 }
  0xf2   :  { %v2015_v40 = vadd.f32 %v2014_v39, %v2013_v36  ;;  %v2078_v41 = vpop.f32.mrf.mxu1 }
  0xf3   :  { %v2079_v42 = vadd.f32 %v2078_v41, %v2077_v37  ;;  %v2016_v43 = vpop.f32.mrf.mxu0 }
  0xf4   :  { %v2080_v44 = vpop.f32.mrf.mxu1 }
  0xf5   :  { %v2952_v45 = vadd.f32 %v2079_v42, %v2015_v40  ;;  %v2017_v46 = vpop.f32.mrf.mxu0 }
  0xf6   :  { %v2018_v47 = vadd.f32 %v2017_v46, %v2016_v43  ;;  %v2081_v48 = vpop.f32.mrf.mxu1 }
  0xf7   :  { %v2082_v49 = vadd.f32 %v2081_v48, %v2080_v44  ;;  %v2019_v50 = vpop.f32.mrf.mxu0 }
  0xf8   :  { %v2083_v51 = vpop.f32.mrf.mxu1 }
  0xf9   :  { %v2954_v52 = vadd.f32 %v2082_v49, %v2018_v47  ;;  %v2020_v53 = vpop.f32.mrf.mxu0 }
  0xfa   :  { %v2021_v54 = vadd.f32 %v2020_v53, %v2019_v50  ;;  %v2084_v55 = vpop.f32.mrf.mxu1 }
  0xfb   :  { %v2085_v56 = vadd.f32 %v2084_v55, %v2083_v51  ;;  %v2022_v57 = vpop.f32.mrf.mxu0 }
  0xfc   :  { %v2086_v58 = vpop.f32.mrf.mxu1 }
  0xfd   :  { %v2956_v59 = vadd.f32 %v2085_v56, %v2021_v54  ;;  %v2023_v60 = vpop.f32.mrf.mxu0 }
  0xfe   :  { %v2024_v61 = vadd.f32 %v2023_v60, %v2022_v57  ;;  %v2087_v62 = vpop.f32.mrf.mxu1 }
  0xff   :  { %v2088_v63 = vadd.f32 %v2087_v62, %v2086_v58  ;;  %v2025_v0 = vpop.f32.mrf.mxu0 }
 0x100   :  { %v2089_v1 = vpop.f32.mrf.mxu1 }
 0x101   :  { %v2958_v2 = vadd.f32 %v2088_v63, %v2024_v61  ;;  %v2026_v3 = vpop.f32.mrf.mxu0 }
 0x102   :  { %v2027_v4 = vadd.f32 %v2026_v3, %v2025_v0  ;;  %v2090_v5 = vpop.f32.mrf.mxu1 }
 0x103   :  { %v2091_v6 = vadd.f32 %v2090_v5, %v2089_v1  ;;  %v2028_v7 = vpop.f32.mrf.mxu0 }
 0x104   :  { %v2092_v8 = vpop.f32.mrf.mxu1 }
 0x105   :  { %v2960_v9 = vadd.f32 %v2091_v6, %v2027_v4  ;;  %v2029_v10 = vpop.f32.mrf.mxu0 }
 0x106   :  { %v2030_v11 = vadd.f32 %v2029_v10, %v2028_v7  ;;  %v2093_v12 = vpop.f32.mrf.mxu1 }
 0x107   :  { %v2094_v13 = vadd.f32 %v2093_v12, %v2092_v8  ;;  %v2031_v14 = vpop.f32.mrf.mxu0 }
 0x108   :  { %v2095_v15 = vpop.f32.mrf.mxu1 }
 0x109   :  { %v2962_v16 = vadd.f32 %v2094_v13, %v2030_v11  ;;  %v2032_v17 = vpop.f32.mrf.mxu0 }
 0x10a   :  { %v2033_v18 = vadd.f32 %v2032_v17, %v2031_v14  ;;  %v2096_v19 = vpop.f32.mrf.mxu1 }
 0x10b   :  { %v2097_v20 = vadd.f32 %v2096_v19, %v2095_v15  ;;  %v2034_v21 = vpop.f32.mrf.mxu0 }
 0x10c   :  { %v2098_v22 = vpop.f32.mrf.mxu1 }
 0x10d   :  { %v2964_v23 = vadd.f32 %v2097_v20, %v2033_v18  ;;  %v2035_v25 = vpop.f32.mrf.mxu0 }
 0x10e   :  { %v2036_v26 = vadd.f32 %v2035_v25, %v2034_v21  ;;  %v2099_v27 = vpop.f32.mrf.mxu1 }
 0x10f   :  { %v2100_v28 = vadd.f32 %v2099_v27, %v2098_v22  ;;  %v2037_v29 = vpop.f32.mrf.mxu0 }
 0x110   :  { %v2101_v30 = vpop.f32.mrf.mxu1 }
 0x111   :  { %v2966_v32 = vadd.f32 %v2100_v28, %v2036_v26  ;;  %v2038_v33 = vpop.f32.mrf.mxu0 }
 0x112   :  { %v2039_v34 = vadd.f32 %v2038_v33, %v2037_v29  ;;  %v2102_v35 = vpop.f32.mrf.mxu1 }
 0x113   :  { %v2103_v36 = vadd.f32 %v2102_v35, %v2101_v30  ;;  %v2040_v37 = vpop.f32.mrf.mxu0 }
 0x114   :  { %v2104_v39 = vpop.f32.mrf.mxu1 }
 0x115   :  { %v2968_v40 = vadd.f32 %v2103_v36, %v2039_v34  ;;  %v2041_v41 = vpop.f32.mrf.mxu0 }
 0x116   :  { %v2042_v42 = vadd.f32 %v2041_v41, %v2040_v37  ;;  %v2105_v43 = vpop.f32.mrf.mxu1 }
 0x117   :  { %3257 = vst [vmem:[#allocation2_spill] sm:$0xff] %v2968_v40  ;;  %v2106_v44 = vadd.f32 %v2105_v43, %v2104_v39  ;;  %v2043_v46 = vpop.f32.mrf.mxu0 }
 0x118   :  { %v2107_v47 = vpop.f32.mrf.mxu1 }
 0x119   :  { %v2970_v48 = vadd.f32 %v2106_v44, %v2042_v42  ;;  %v2044_v49 = vpop.f32.mrf.mxu0 }
 0x11a   :  { %v2045_v50 = vadd.f32 %v2044_v49, %v2043_v46  ;;  %v2108_v51 = vpop.f32.mrf.mxu1 }
 0x11b   :  { %3258 = vst [vmem:[#allocation3_spill] sm:$0xff] %v2970_v48  ;;  %v2109_v53 = vadd.f32 %v2108_v51, %v2107_v47  ;;  %v2046_v54 = vpop.f32.mrf.mxu0 }
 0x11c   :  { %v2110_v55 = vpop.f32.mrf.mxu1 }
 0x11d   :  { %v2972_v56 = vadd.f32 %v2109_v53, %v2045_v50  ;;  %v2047_v57 = vpop.f32.mrf.mxu0 }
 0x11e   :  { %v2048_v58 = vadd.f32 %v2047_v57, %v2046_v54  ;;  %v2111_v60 = vpop.f32.mrf.mxu1 }
 0x11f   :  { %3259 = vst [vmem:[#allocation4_spill] sm:$0xff] %v2972_v56  ;;  %v2112_v61 = vadd.f32 %v2111_v60, %v2110_v55  ;;  %v2049_v62 = vpop.f32.mrf.mxu0 }
 0x120   :  { %v2113_v63 = vpop.f32.mrf.mxu1 }
 0x121   :  { %v2974_v0 = vadd.f32 %v2112_v61, %v2048_v58  ;;  %v2050_v1 = vpop.f32.mrf.mxu0 }
 0x122   :  { %v2051_v3 = vadd.f32 %v2050_v1, %v2049_v62  ;;  %v2114_v4 = vpop.f32.mrf.mxu1 }
 0x123   :  { %3260 = vst [vmem:[#allocation5_spill] sm:$0xff] %v2974_v0  ;;  %v2115_v5 = vadd.f32 %v2114_v4, %v2113_v63  ;;  %v2132_v6 = vpop.f32.mrf.mxu0  ;;  %v3051_v0 = vld [vmem:[%s3253_s4 + $0x20] sm:$0xff]  }
 0x124   :  { %v2196_v7 = vpop.f32.mrf.mxu1 }
 0x125   :  { %v2976_v8 = vadd.f32 %v2115_v5, %v2051_v3  ;;  %v2133_v10 = vpop.f32.mrf.mxu0 }
 0x126   :  { %v2134_v11 = vadd.f32 %v2133_v10, %v2132_v6  ;;  %v2197_v12 = vpop.f32.mrf.mxu1 }
 0x127   :  { %3261 = vst [vmem:[#allocation6_spill] sm:$0xff] %v2976_v8  ;;  %v2135_v13 = vpop.f32.mrf.mxu0  ;;  %v2198_v15 = vadd.f32 %v2197_v12, %v2196_v7  ;;  %v3034_v12 = vld [vmem:[%s3253_s4 + $0x8] sm:$0xff]   ;;  %v3046_v8 = vld [vmem:[%s3253_s4] sm:$0xff]  }
 0x128   :  { %v1274_v14 = vadd.f32 %v2134_v11, %v2946_v24  ;;  %v2979_v17 = vpop.f32.mrf.mxu1 }
 0x129   :  { %v2136_v18 = vpop.f32.mrf.mxu0 }
 0x12a   :  { %v2981_v19 = vpop.f32.mrf.mxu1  ;;  %v2983_v20 = vadd.f32 %v2198_v15, %v1274_v14  ;;  %v3039_v14 = vld [vmem:[%s3253_s4 + $0x28] sm:$0xff]   ;;  %v2137_v56 = vadd.f32 %v2136_v18, %v2135_v13  ;;  %v3070_v13 = vld [vmem:[%s3253_s4 + $0x10] sm:$0xff]  }
 0x12b   :  { %v2138_v21 = vpop.f32.mrf.mxu0 }
 0x12c   :  { %3262 = vst [vmem:[#allocation7_spill] sm:$0xff] %v2983_v20  ;;  %v2985_v22 = vpop.f32.mrf.mxu1 }
 0x12d   :  { %v2139_v25 = vpop.f32.mrf.mxu0 }
 0x12e   :  { %v2987_v26 = vpop.f32.mrf.mxu1 }
 0x12f   :  { %v2141_v27 = vpop.f32.mrf.mxu0 }
 0x130   :  { %v2989_v28 = vpop.f32.mrf.mxu1 }
 0x131   :  { %v2142_v29 = vpop.f32.mrf.mxu0 }
 0x132   :  { %v2991_v30 = vpop.f32.mrf.mxu1  ;;  %v2143_v18 = vadd.f32 %v2142_v29, %v2141_v27 }
 0x133   :  { %v2144_v24 = vpop.f32.mrf.mxu0  ;;  %v2207_v27 = vadd.f32 %v2991_v30, %v2989_v28 }
 0x134   :  { %v2993_v33 = vpop.f32.mrf.mxu1 }
 0x135   :  { %v2145_v34 = vpop.f32.mrf.mxu0 }
 0x136   :  { %v2995_v35 = vpop.f32.mrf.mxu1 }
 0x137   :  { %v2997_v36 = vpop.f32.mrf.mxu0 }
 0x138   :  { %v2999_v37 = vpop.f32.mrf.mxu1 }
 0x139   :  { %v3001_v39 = vpop.f32.mrf.mxu0 }
 0x13a   :  { %v3003_v41 = vpop.f32.mrf.mxu1 }
 0x13b   :  { %v2150_v42 = vpop.f32.mrf.mxu0 }
 0x13c   :  { %v3005_v43 = vpop.f32.mrf.mxu1 }
 0x13d   :  { %v2151_v44 = vpop.f32.mrf.mxu0 }
 0x13e   :  { %v3007_v46 = vpop.f32.mrf.mxu1 }
 0x13f   :  { %v3009_v47 = vpop.f32.mrf.mxu0 }
 0x140   :  { %v3011_v49 = vpop.f32.mrf.mxu1 }
 0x141   :  { %3263 = vst [vmem:[#allocation8_spill] sm:$0xff] %v3011_v49  ;;  %v2154_v50 = vpop.f32.mrf.mxu0  ;;  %v2204_v49 = vadd.f32 %v2987_v26, %v2985_v22  ;;  %v2210_v22 = vadd.f32 %v2995_v35, %v2993_v33 }
 0x142   :  { %v3013_v51 = vpop.f32.mrf.mxu1 }
 0x143   :  { %3264 = vst [vmem:[#allocation9_spill] sm:$0xff] %v3013_v51  ;;  %v2156_v53 = vpop.f32.mrf.mxu0  ;;  %v1909_v51 = vunpack.c.h.bf16 %v3034_v12 }
 0x144   :  { %v3015_v54 = vpop.f32.mrf.mxu1 }
 0x145   :  { %3265 = vst [vmem:[#allocation10_spill] sm:$0xff] %v3015_v54  ;;  %v2157_v55 = vpop.f32.mrf.mxu0 }
 0x146   :  { %v3017_v57 = vpop.f32.mrf.mxu1 }
 0x147   :  { %3266 = vst [vmem:[#allocation11_spill] sm:$0xff] %v3017_v57  ;;  %v2159_v58 = vpop.f32.mrf.mxu0  ;;  %v3065_v57 = vld [vmem:[%s3253_s4 + $0x38] sm:$0xff]  }
 0x148   :  { %v3019_v60 = vpop.f32.mrf.mxu1 }
 0x149   :  { %3267 = vst [vmem:[#allocation12_spill] sm:$0xff] %v3019_v60  ;;  %v2160_v61 = vpop.f32.mrf.mxu0  ;;  %v1904_v60 = vunpack.c.l.bf16 %v3046_v8 }
 0x14a   :  { %v3021_v62 = vpop.f32.mrf.mxu1 }
 0x14b   :  { %3268 = vst [vmem:[#allocation13_spill] sm:$0xff] %v3021_v62  ;;  %v2162_v63 = vpop.f32.mrf.mxu0  ;;  %v1285_v62 = vadd.f32 %v2143_v18, %v2952_v45  ;;  %v2158_v45 = vadd.f32 %v2157_v55, %v2156_v53 }
 0x14c   :  { %v3023_v1 = vpop.f32.mrf.mxu1 }
 0x14d   :  { %v2163_v3 = vpop.f32.mrf.mxu0  ;;  %v1382_v35 = vadd.f32 %v2207_v27, %v1285_v62 }
 0x14e   :  { %v3025_v4 = vpop.f32.mrf.mxu1 }
 0x14f   :  { %3269 = vst [vmem:[#allocation14_spill] sm:$0xff] %v3025_v4  ;;  %v2165_v5 = vpop.f32.mrf.mxu0  ;;  %v2164_v4 = vadd.f32 %v2163_v3, %v2162_v63  ;;  %v2216_v63 = vadd.f32 %v3007_v46, %v3005_v43  ;;  %v1306_v46 = vadd.f32 %v2158_v45, %v2962_v16  ;;  %v3141_v45 = vld [vmem:[%s3254_s2] ss:$0 sm:$0xff] }
 0x150   :  { %v3027_v6 = vpop.f32.mrf.mxu1  ;;  %v3281_v16 = vld [vmem:[#allocation12_spill] sm:$0xff] }
 0x151   :  { %3270 = vst [vmem:[#allocation15_spill] sm:$0xff] %v3027_v6  ;;  %v2166_v7 = vpop.f32.mrf.mxu0 }
 0x152   :  { %v3029_v10 = vpop.f32.mrf.mxu1  ;;  %v2167_v26 = vadd.f32 %v2166_v7, %v2165_v5 }
 0x153   :  { %3271 = vst [vmem:[#allocation16_spill] sm:$0xff] %v3029_v10  ;;  %v2168_v11 = vpop.f32.mrf.mxu0  ;;  %v2140_v10 = vadd.f32 %v2139_v25, %v2138_v21  ;;  %v2146_v21 = vadd.f32 %v2145_v34, %v2144_v24  ;;  %v1277_v34 = vadd.f32 %v2137_v56, %v2948_v31  ;;  %v3096_v31 = vld [vmem:[%s3253_s4 + $0x30] sm:$0xff]  }
 0x154   :  { %v3041_v15 = vpop.f32.mrf.mxu1 }
 0x155   :  { %3272 = vst [vmem:[#allocation17_spill] sm:$0xff] %v3041_v15  ;;  %v2169_v20 = vpop.f32.mrf.mxu0  ;;  %v3060_v15 = vld [vmem:[%s3253_s4 + $0x18] sm:$0xff]   ;;  %v1290_v29 = vadd.f32 %v2146_v21, %v2954_v52  ;;  %v2161_v52 = vadd.f32 %v2160_v61, %v2159_v58  ;;  %v3276_v58 = vld [vmem:[#allocation3_spill] sm:$0xff] }
 0x156   :  { %v3053_v6 = vpop.f32.mrf.mxu1  ;;  %v2170_v28 = vadd.f32 %v2169_v20, %v2168_v11  ;;  %v3282_v11 = vld [vmem:[#allocation13_spill] sm:$0xff] }
 0x157   :  { %3273 = vst [vmem:[#allocation18_spill] sm:$0xff] %v3053_v6  ;;  %v2171_v25 = vpop.f32.mrf.mxu0  ;;  %v2152_v6 = vadd.f32 %v2151_v44, %v2150_v42  ;;  %v2201_v42 = vadd.f32 %v2981_v19, %v2979_v17  ;;  %v1282_v44 = vadd.f32 %v2140_v10, %v2950_v38  ;;  %v2149_v38 = vadd.f32 %v3001_v39, %v2997_v36 }
 0x158   :  { %v3074_v54 = vpop.f32.mrf.mxu1  ;;  %v2155_v17 = vadd.f32 %v2154_v50, %v3009_v47  ;;  %v3111_v36 = vadd.f32 %v3003_v41, %v2999_v37  ;;  %v1314_v39 = vadd.f32 %v2164_v4, %v2966_v32  ;;  %v3114_v47 = vadd.f32 %v2210_v22, %v1290_v29  ;;  %v3274_v37 = vld [vmem:[#allocation14_spill] sm:$0xff]  ;;  %v3277_v4 = vld [vmem:[#allocation8_spill] sm:$0xff] }
 0x159   :  { %v2172_v40 = vpop.f32.mrf.mxu0  ;;  %v1298_v56 = vadd.f32 %v2152_v6, %v2958_v2  ;;  %v1379_v10 = vadd.f32 %v2204_v49, %v1282_v44  ;;  %v3106_v18 = vadd.f32 %v2201_v42, %v1277_v34  ;;  %v1928_v2 = vunpack.c.l.bf16 %v3096_v31  ;;  %v3275_v32 = vld [vmem:[#allocation2_spill] sm:$0xff] }
 0x15a   :  { %v2236_v48 = vpop.f32.mrf.mxu1  ;;  %v3117_v20 = vadd.f32 %v2149_v38, %v2956_v59  ;;  %v1301_v43 = vadd.f32 %v2155_v17, %v2960_v9  ;;  %v1309_v53 = vadd.f32 %v2161_v52, %v2964_v23  ;;  %v2228_v41 = vadd.f32 %v3274_v37, %v3023_v1  ;;  %v3278_v59 = vld [vmem:[#allocation9_spill] sm:$0xff]  ;;  %v3279_v6 = vld [vmem:[#allocation10_spill] sm:$0xff]  ;;  %v3280_v9 = vld [vmem:[#allocation11_spill] sm:$0xff] }
 0x15b   :  { %v2174_v24 = vpop.f32.mrf.mxu0  ;;  %v3121_v50 = vadd.f32 %v2216_v63, %v1298_v56  ;;  %v1317_v55 = vadd.f32 %v2167_v26, %v3275_v32  ;;  %v1322_v61 = vadd.f32 %v2170_v28, %v3276_v58  ;;  %v2219_v5 = vadd.f32 %v3278_v59, %v3277_v4  ;;  %v3283_v23 = vld [vmem:[#allocation15_spill] sm:$0xff]  ;;  %v3284_v34 = vld [vmem:[#allocation16_spill] sm:$0xff] }
 0x15c   :  { %v2238_v19 = vpop.f32.mrf.mxu1  ;;  %v2222_v7 = vadd.f32 %v3280_v9, %v3279_v6  ;;  %v2225_v21 = vadd.f32 %v3282_v11, %v3281_v16  ;;  %v2173_v27 = vadd.f32 %v2172_v40, %v2171_v25  ;;  %v2231_v42 = vadd.f32 %v3284_v34, %v3283_v23  ;;  %v3285_v1 = vld [vmem:[#allocation17_spill] sm:$0xff]  ;;  %v3148_v25 = vld [vmem:[%s3255_s3] ss:$0 sm:$0xff]  ;;  %v3287_v4 = vld [vmem:[#allocation4_spill] sm:$0xff] }
 0x15d   :  { %v2175_v30 = vpop.f32.mrf.mxu0  ;;  %v1411_v22 = vadd.f32 %v2228_v41, %v1314_v39  ;;  %v3143_v40 = vadd.f32 %v2219_v5, %v1301_v43  ;;  %v3154_v39 = vadd.f32 %v2236_v48, %v3074_v54  ;;  %v3289_v41 = vld [vmem:[#allocation5_spill] sm:$0xff] }
 0x15e   :  { %v2239_v3 = vpop.f32.mrf.mxu1  ;;  %v3286_v44 = vld [vmem:[#allocation18_spill] sm:$0xff]  ;;  %v2176_v56 = vadd.f32 %v2175_v30, %v2174_v24  ;;  %v1403_v63 = vadd.f32 %v2222_v7, %v1306_v46  ;;  %v1414_v30 = vadd.f32 %v2231_v42, %v1317_v55  ;;  %v1406_v32 = vadd.f32 %v2225_v21, %v1309_v53 }
 0x15f   :  { %v2177_v33 = vpop.f32.mrf.mxu0  ;;  %v2234_v38 = vadd.f32 %v3286_v44, %v3285_v1  ;;  %v3151_v59 = vadd.f32 %v2173_v27, %v3287_v4  ;;  %v2240_v5 = vadd.f32 %v2239_v3, %v2238_v19  ;;  %v3290_v53 = vld [vmem:[#allocation6_spill] sm:$0xff]  ;;  %v3291_v19 = vunpack.c.l.bf16 %v3034_v12 }
 0x160   :  { %v2241_v49 = vpop.f32.mrf.mxu1 }
 0x161   :  { %v2178_v62 = vpop.f32.mrf.mxu0  ;;  %v1419_v58 = vadd.f32 %v2234_v38, %v1322_v61 }
 0x162   :  { %v2242_v29 = vpop.f32.mrf.mxu1  ;;  %v2179_v52 = vadd.f32 %v2178_v62, %v2177_v33  ;;  %v3288_v33 = vld [vmem:[#allocation7_spill] sm:$0xff]  ;;  %v1330_v62 = vadd.f32 %v2176_v56, %v3289_v41 }
 0x163   :  { %v2278_v17 = vpop.f32.mrf.mxu0  ;;  %v2243_v11 = vadd.f32 %v2242_v29, %v2241_v49 }
 0x164   :  { %v1476_v26 = vadd.f32 %v2278_v17, %v1379_v10  ;;  %v2286_v28 = vpop.f32.mrf.mxu1  ;;  %v1333_v61 = vadd.f32 %v2179_v52, %v3290_v53 }
 0x165   :  { %v1508_v37 = vadd.f32 %v2286_v28, %v1411_v22  ;;  %v1467_v24 = vpop.f32.mrf.mxu0  ;;  %v1427_v28 = vadd.f32 %v2240_v5, %v1330_v62  ;;  %v3293_v62 = vunpack.c.l.bf16 %v3051_v0 }
 0x166   :  { %v1539_v10 = vmul.f32 %v3141_v45, %v1476_v26  ;;  %v1468_v43 = vadd.f32 %v1467_v24, %v3288_v33  ;;  %v1499_v46 = vpop.f32.mrf.mxu1 }
 0x167   :  { %v1547_v6 = vmul.f32 %v3141_v45, %v1508_v37  ;;  %v1500_v9 = vadd.f32 %v1499_v46, %v1403_v63  ;;  %v2279_v55 = vpop.f32.mrf.mxu0  ;;  %v1430_v37 = vadd.f32 %v2243_v11, %v1333_v61 }
 0x168   :  { %v1562_v7 = vadd.f32 %v3148_v25, %v1539_v10  ;;  %v1537_v16 = vmul.f32 %v3141_v45, %v1468_v43  ;;  %v1479_v48 = vadd.f32 %v2279_v55, %v1382_v35  ;;  %v2287_v54 = vpop.f32.mrf.mxu1  ;;  %v3292_v35 = vunpack.c.l.bf16 %v3039_v14 }
 0x169   :  { %v1570_v21 = vadd.f32 %v3148_v25, %v1547_v6  ;;  %v1545_v27 = vmul.f32 %v3141_v45, %v1500_v9  ;;  %v1511_v23 = vadd.f32 %v2287_v54, %v1414_v30  ;;  %v1470_v34 = vpop.f32.mrf.mxu0  ;;  %v3294_v6 = vunpack.c.h.bf16 %v3039_v14 }
 0x16a   :  { %v1610_v3 = vadd.f32 %v3291_v19, %v1562_v7  ;;  %v1560_v42 = vadd.f32 %v3148_v25, %v1537_v16  ;;  %v1540_v1 = vmul.f32 %v3141_v45, %v1479_v48  ;;  %v1471_v44 = vadd.f32 %v1470_v34, %v3106_v18  ;;  %v1502_v38 = vpop.f32.mrf.mxu1 }
 0x16b   :  { %v1618_v56 = vadd.f32 %v3292_v35, %v1570_v21  ;;  %v1568_v49 = vadd.f32 %v3148_v25, %v1545_v27  ;;  %v1548_v29 = vmul.f32 %v3141_v45, %v1511_v23  ;;  %v1503_v17 = vadd.f32 %v1502_v38, %v1406_v32  ;;  %v2282_v22 = vpop.f32.mrf.mxu0 }
 0x16c   :  { %v1563_v52 = vadd.f32 %v3148_v25, %v1540_v1  ;;  %v1538_v26 = vmul.f32 %v3141_v45, %v1471_v44  ;;  %v2290_v63 = vpop.f32.mrf.mxu1  ;;  %v1626_v24 = vmax.f32 %v1610_v3, 0.0  ;;  %v1608_v18 = vadd.f32 %v1904_v60, %v1560_v42 }
 0x16d   :  { %v1571_v30 = vadd.f32 %v3148_v25, %v1548_v29  ;;  %v1546_v4 = vmul.f32 %v3141_v45, %v1503_v17  ;;  %v1483_v10 = vpop.f32.mrf.mxu0  ;;  %v1634_v33 = vmax.f32 %v1618_v56, 0.0  ;;  %v1492_v46 = vadd.f32 %v2282_v22, %v3121_v50 }
 0x16e   :  { %v1611_v32 = vadd.f32 %v1909_v51, %v1563_v52  ;;  %v1561_v43 = vadd.f32 %v3148_v25, %v1538_v26  ;;  %v1515_v41 = vpop.f32.mrf.mxu1  ;;  %v1616_v5 = vadd.f32 %v3293_v62, %v1568_v49  ;;  %v1524_v55 = vadd.f32 %v2290_v63, %v1427_v28 }
 0x16f   :  { %v1619_v60 = vadd.f32 %v3294_v6, %v1571_v30  ;;  %v1569_v9 = vadd.f32 %v3148_v25, %v1546_v4  ;;  %v2283_v53 = vpop.f32.mrf.mxu0  ;;  %v3295_v7 = vunpack.c.h.bf16 %v3046_v8  ;;  %v1543_v51 = vmul.f32 %v3141_v45, %v1492_v46 }
 0x170   :  { %v1627_v61 = vmax.f32 %v1611_v32, 0.0  ;;  %v1484_v16 = vadd.f32 %v1483_v10, %v3114_v47  ;;  %v2291_v50 = vpop.f32.mrf.mxu1  ;;  %v3296_v54 = vunpack.c.h.bf16 %v3051_v0  ;;  %v1551_v14 = vmul.f32 %v3141_v45, %v1524_v55 }
 0x171   :  { %v1609_v12 = vadd.f32 %v3295_v7, %v1561_v43  ;;  %v1635_v48 = vmax.f32 %v1619_v60, 0.0  ;;  %v1516_v21 = vadd.f32 %v1515_v41, %v1419_v58  ;;  %v1624_v27 = vmax.f32 %v1608_v18, 0.0  ;;  %v1486_v44 = vpop.f32.mrf.mxu0 }
 0x172   :  { %v1617_v11 = vadd.f32 %v3296_v54, %v1569_v9  ;;  %v1942_v23 = vpack.c.bf16 %v1627_v61, %v1626_v24  ;;  %v1541_v19 = vmul.f32 %v3141_v45, %v1484_v16  ;;  %v1632_v3 = vmax.f32 %v1616_v5, 0.0  ;;  %v1518_v35 = vpop.f32.mrf.mxu1 }
 0x173   :  { %v1625_v34 = vmax.f32 %v1609_v12, 0.0  ;;  %v1962_v8 = vpack.c.bf16 %v1635_v48, %v1634_v33  ;;  %v1549_v1 = vmul.f32 %v3141_v45, %v1516_v21  ;;  %v1566_v47 = vadd.f32 %v3148_v25, %v1543_v51 }
 0x174   :  { %v1633_v42 = vmax.f32 %v1617_v11, 0.0  ;;  %1981 = vst [vmem:[%s3256_s5 + $0x8] sm:$0xff] %v1942_v23   ;;  %v1495_v58 = vadd.f32 %v2283_v53, %v3143_v40  ;;  %v1390_v38 = vadd.f32 %v3111_v36, %v3117_v20  ;;  %v1574_v49 = vadd.f32 %v3148_v25, %v1551_v14 }
 0x175   :  { %v1937_v0 = vpack.c.bf16 %v1625_v34, %v1624_v27  ;;  %1985 = vst [vmem:[%s3256_s5 + $0x28] sm:$0xff] %v1962_v8   ;;  %v1527_v29 = vadd.f32 %v2291_v50, %v1430_v37  ;;  %v1422_v17 = vadd.f32 %v3154_v39, %v3151_v59  ;;  %v1564_v40 = vadd.f32 %v3148_v25, %v1541_v19 }
 0x176   :  { %v1957_v56 = vpack.c.bf16 %v1633_v42, %v1632_v3  ;;  %v1544_v36 = vmul.f32 %v3141_v45, %v1495_v58  ;;  %v1917_v20 = vunpack.c.h.bf16 %v3060_v15  ;;  %v1487_v22 = vadd.f32 %v1486_v44, %v1390_v38 }
 0x177   :  { %1938 = vst [vmem:[%s3256_s5] sm:$0xff] %v1937_v0   ;;  %v1572_v52 = vadd.f32 %v3148_v25, %v1549_v1  ;;  %v1552_v26 = vmul.f32 %v3141_v45, %v1527_v29  ;;  %v1933_v59 = vunpack.c.h.bf16 %v3065_v57  ;;  %v1519_v39 = vadd.f32 %v1518_v35, %v1422_v17 }
 0x178   :  { %1984 = vst [vmem:[%s3256_s5 + $0x20] sm:$0xff] %v1957_v56   ;;  %v3297_v28 = vunpack.c.l.bf16 %v3060_v15  ;;  %v1567_v37 = vadd.f32 %v3148_v25, %v1544_v36  ;;  %v1542_v24 = vmul.f32 %v3141_v45, %v1487_v22  ;;  %v1913_v18 = vunpack.c.h.bf16 %v3070_v13 }
 0x179   :  { %v3298_v30 = vunpack.c.l.bf16 %v3065_v57  ;;  %v1575_v10 = vadd.f32 %v3148_v25, %v1552_v26  ;;  %v1550_v33 = vmul.f32 %v3141_v45, %v1519_v39  ;;  %v1929_v32 = vunpack.c.h.bf16 %v3096_v31 }
 0x17a   :  { %v1614_v63 = vadd.f32 %v3297_v28, %v1566_v47  ;;  %v3299_v43 = vunpack.c.l.bf16 %v3070_v13  ;;  %v1615_v15 = vadd.f32 %v1917_v20, %v1567_v37  ;;  %v1565_v41 = vadd.f32 %v3148_v25, %v1542_v24 }
 0x17b   :  { %v1622_v4 = vadd.f32 %v3298_v30, %v1574_v49  ;;  %v1620_v62 = vadd.f32 %v1928_v2, %v1572_v52  ;;  %v1623_v5 = vadd.f32 %v1933_v59, %v1575_v10  ;;  %v1573_v6 = vadd.f32 %v3148_v25, %v1550_v33 }
 0x17c   :  { %v1612_v46 = vadd.f32 %v3299_v43, %v1564_v40  ;;  %v1630_v57 = vmax.f32 %v1614_v63, 0.0  ;;  %v1631_v60 = vmax.f32 %v1615_v15, 0.0  ;;  %v1613_v9 = vadd.f32 %v1913_v18, %v1565_v41 }
 0x17d   :  { %v1638_v55 = vmax.f32 %v1622_v4, 0.0  ;;  %v1639_v53 = vmax.f32 %v1623_v5, 0.0  ;;  %v1621_v45 = vadd.f32 %v1929_v32, %v1573_v6  ;;  %v1636_v13 = vmax.f32 %v1620_v62, 0.0 }
 0x17e   :  { %v1628_v61 = vmax.f32 %v1612_v46, 0.0  ;;  %v1952_v7 = vpack.c.bf16 %v1631_v60, %v1630_v57  ;;  %v1629_v12 = vmax.f32 %v1613_v9, 0.0 }
 0x17f   :  { %v1972_v51 = vpack.c.bf16 %v1639_v53, %v1638_v55  ;;  %v1637_v16 = vmax.f32 %v1621_v45, 0.0 }
 0x180   :  { %1983 = vst [vmem:[%s3256_s5 + $0x18] sm:$0xff] %v1952_v7   ;;  %v1947_v31 = vpack.c.bf16 %v1629_v12, %v1628_v61 }
 0x181   :  { %1987 = vst [vmem:[%s3256_s5 + $0x38] sm:$0xff] %v1972_v51   ;;  %v1967_v2 = vpack.c.bf16 %v1637_v16, %v1636_v13 }
 0x182   :  { %1982 = vst [vmem:[%s3256_s5 + $0x10] sm:$0xff] %v1947_v31  }
 0x183   :  { %1986 = vst [vmem:[%s3256_s5 + $0x30] sm:$0xff] %v1967_v2  }

// kernel: resnet_simple_forward.16
= control target key start
LH: loop header
LB: loop body
LE: loop exit
PB: predicated region body
PF: predicated region fallthrough
CT: control target
= control target key end

     0   :  { %s3007_s1 = inlined_call_operand.vmem [shape: bf16[1152,128], index: 1, kind: input, shape index: {}]   ;;  %s3008_s0 = inlined_call_operand.vmem [shape: bf16[128,1152], index: 0, kind: input, shape index: {}]   ;;  %s3009_s2 = inlined_call_operand.vmem [shape: f32[1,128], index: 2, kind: input, shape index: {}]   ;;  %s3010_s3 = inlined_call_operand.vmem [shape: f32[1,128], index: 3, kind: input, shape index: {}]   ;;  %s3011_s4 = inlined_call_operand.vmem [shape: bf16[128,128], index: 4, kind: output, shape index: {}]  }
   0x1   :  { %v2218_v0 = vld [vmem:[%s3007_s1 + $0x78] sm:$0xff]   ;;  %v2222_v4 = vld [vmem:[%s3007_s1 + $0x70] sm:$0xff]   ;;  %v2226_v8 = vld [vmem:[%s3007_s1 + $0x68] sm:$0xff]  }
   0x2   :  { %v2219_v1 = vld [vmem:[%s3007_s1 + $0xf8] sm:$0xff]   ;;  %1898 = vmatprep.subr.bf16.mxu0 %v2218_v0  ;;  %v2223_v5 = vld [vmem:[%s3007_s1 + $0xf0] sm:$0xff]   ;;  %v2227_v9 = vld [vmem:[%s3007_s1 + $0xe8] sm:$0xff]  }
   0x3   :  { %v2220_v2 = vld [vmem:[%s3007_s1 + $0x38] sm:$0xff]   ;;  %1962 = vmatprep.subr.bf16.mxu1 %v2219_v1  ;;  %v2224_v6 = vld [vmem:[%s3007_s1 + $0x30] sm:$0xff]   ;;  %v2228_v10 = vld [vmem:[%s3007_s1 + $0x28] sm:$0xff]  }
   0x4   :  { %v2221_v3 = vld [vmem:[%s3007_s1 + $0xb8] sm:$0xff]   ;;  %1899 = vmatpush3.bf16.msra.mxu0 %v2220_v2  ;;  %v2225_v7 = vld [vmem:[%s3007_s1 + $0xb0] sm:$0xff]   ;;  %v2229_v11 = vld [vmem:[%s3007_s1 + $0xa8] sm:$0xff]  }
   0x5   :  { %1963 = vmatpush3.bf16.msra.mxu1 %v2221_v3  ;;  %1900 = vmatprep.subr.bf16.mxu0 %v2222_v4  ;;  %v2230_v12 = vld [vmem:[%s3007_s1 + $0x60] sm:$0xff]   ;;  %v2234_v16 = vld [vmem:[%s3007_s1 + $0x58] sm:$0xff]   ;;  %v2238_v20 = vld [vmem:[%s3007_s1 + $0x50] sm:$0xff]  }
   0x6   :  { %1964 = vmatprep.subr.bf16.mxu1 %v2223_v5  ;;  %v2231_v13 = vld [vmem:[%s3007_s1 + $0xe0] sm:$0xff]   ;;  %v2235_v17 = vld [vmem:[%s3007_s1 + $0xd8] sm:$0xff]   ;;  %v2239_v21 = vld [vmem:[%s3007_s1 + $0xd0] sm:$0xff]  }
   0x7   :  { %v2232_v14 = vld [vmem:[%s3007_s1 + $0x20] sm:$0xff]   ;;  %v2236_v18 = vld [vmem:[%s3007_s1 + $0x18] sm:$0xff]   ;;  %v2240_v22 = vld [vmem:[%s3007_s1 + $0x10] sm:$0xff]  }
   0x8   :  { %1901 = vmatpush3.bf16.msra.mxu0 %v2224_v6  ;;  %v2233_v15 = vld [vmem:[%s3007_s1 + $0xa0] sm:$0xff]   ;;  %v2237_v19 = vld [vmem:[%s3007_s1 + $0x98] sm:$0xff]   ;;  %v2241_v23 = vld [vmem:[%s3007_s1 + $0x90] sm:$0xff]  }
   0x9   :  { %1965 = vmatpush3.bf16.msra.mxu1 %v2225_v7  ;;  %1902 = vmatprep.subr.bf16.mxu0 %v2226_v8  ;;  %v2242_v24 = vld [vmem:[%s3007_s1 + $0x48] sm:$0xff]   ;;  %v2246_v28 = vld [vmem:[%s3007_s1 + $0x40] sm:$0xff]   ;;  %v2256_v36 = vld [vmem:[%s3007_s1 + $0x178] sm:$0xff]  }
   0xa   :  { %1966 = vmatprep.subr.bf16.mxu1 %v2227_v9  ;;  %v2243_v25 = vld [vmem:[%s3007_s1 + $0xc8] sm:$0xff]   ;;  %v2247_v29 = vld [vmem:[%s3007_s1 + $0xc0] sm:$0xff]   ;;  %v2257_v37 = vld [vmem:[%s3007_s1 + $0x1f8] sm:$0xff]  }
   0xb   :  { %v2244_v26 = vld [vmem:[%s3007_s1 + $0x8] sm:$0xff]   ;;  %v2248_v30 = vld [vmem:[%s3007_s1] sm:$0xff]   ;;  %v2258_v38 = vld [vmem:[%s3007_s1 + $0x138] sm:$0xff]  }
   0xc   :  { %1903 = vmatpush3.bf16.msra.mxu0 %v2228_v10  ;;  %v2245_v27 = vld [vmem:[%s3007_s1 + $0x88] sm:$0xff]   ;;  %v2249_v31 = vld [vmem:[%s3007_s1 + $0x80] sm:$0xff]   ;;  %v2259_v39 = vld [vmem:[%s3007_s1 + $0x1b8] sm:$0xff]  }
   0xd   :  { %1967 = vmatpush3.bf16.msra.mxu1 %v2229_v11  ;;  %1904 = vmatprep.subr.bf16.mxu0 %v2230_v12  ;;  %v2250_v32 = vld [vmem:[%s3008_s0] ss:$36 sps:$4 sm:$0xff]   ;;  %v2253_v34 = vld [vmem:[%s3008_s0 + $0x8] ss:$36 sps:$4 sm:$0xff]   ;;  %v2262_v41 = vld [vmem:[%s3008_s0 + $0x54] ss:$36 sps:$4 sm:$0xff]  }
   0xe   :  { %1968 = vmatprep.subr.bf16.mxu1 %v2231_v13  ;;  %v2252_v33 = vld [vmem:[%s3008_s0 + $0x4] ss:$36 sps:$4 sm:$0xff]   ;;  %v2255_v35 = vld [vmem:[%s3008_s0 + $0xc] ss:$36 sps:$4 sm:$0xff]   ;;  %v2270_v48 = vld [vmem:[%s3008_s0 + $0x94] ss:$36 sps:$4 sm:$0xff]  }
   0xf   :  { %1074 = vmatprep.mubr.bf16.mxu0 %v2252_v33  ;;  %1171 = vmatprep.mubr.bf16.mxu1 %v2255_v35  ;;  %v2260_v40 = vld [vmem:[%s3008_s0 + $0x4c] ss:$36 sps:$4 sm:$0xff]   ;;  %v2272_v49 = vld [vmem:[%s3008_s0 + $0x9c] ss:$36 sps:$4 sm:$0xff]   ;;  %v2282_v57 = vld [vmem:[%s3008_s0 + $0xe4] ss:$36 sps:$4 sm:$0xff]  }
  0x10   :  { %1905 = vmatpush3.bf16.msra.mxu0 %v2232_v14  ;;  %v2264_v42 = vld [vmem:[%s3008_s0 + $0x48] ss:$36 sps:$4 sm:$0xff]   ;;  %v2265_v43 = vld [vmem:[%s3008_s0 + $0x50] ss:$36 sps:$4 sm:$0xff]   ;;  %v2275_v51 = vld [vmem:[%s3008_s0 + $0x98] ss:$36 sps:$4 sm:$0xff]  }
  0x11   :  { %1969 = vmatpush3.bf16.msra.mxu1 %v2233_v15  ;;  %1906 = vmatprep.subr.bf16.mxu0 %v2234_v16  ;;  %v2266_v44 = vld [vmem:[%s3007_s1 + $0x170] sm:$0xff]   ;;  %v2276_v52 = vld [vmem:[%s3007_s1 + $0x168] sm:$0xff]   ;;  %v2280_v56 = vld [vmem:[%s3008_s0 + $0xdc] ss:$36 sps:$4 sm:$0xff]  }
  0x12   :  { %1970 = vmatprep.subr.bf16.mxu1 %v2235_v17  ;;  %v2267_v45 = vld [vmem:[%s3007_s1 + $0x1f0] sm:$0xff]   ;;  %v2277_v53 = vld [vmem:[%s3007_s1 + $0x1e8] sm:$0xff]   ;;  %v2284_v58 = vld [vmem:[%s3008_s0 + $0xd8] ss:$36 sps:$4 sm:$0xff]  }
  0x13   :  { %v2268_v46 = vld [vmem:[%s3007_s1 + $0x130] sm:$0xff]   ;;  %v2278_v54 = vld [vmem:[%s3007_s1 + $0x128] sm:$0xff]   ;;  %v2285_v59 = vld [vmem:[%s3008_s0 + $0xe0] ss:$36 sps:$4 sm:$0xff]  }
  0x14   :  { %1907 = vmatpush3.bf16.msra.mxu0 %v2236_v18  ;;  %v2269_v47 = vld [vmem:[%s3007_s1 + $0x1b0] sm:$0xff]   ;;  %v2279_v55 = vld [vmem:[%s3007_s1 + $0x1a8] sm:$0xff]   ;;  %v2286_v60 = vld [vmem:[%s3007_s1 + $0x160] sm:$0xff]  }
  0x15   :  { %1971 = vmatpush3.bf16.msra.mxu1 %v2237_v19  ;;  %1908 = vmatprep.subr.bf16.mxu0 %v2238_v20  ;;  %v2274_v50 = vld [vmem:[%s3008_s0 + $0x90] ss:$36 sps:$4 sm:$0xff]   ;;  %v2287_v61 = vld [vmem:[%s3007_s1 + $0x1e0] sm:$0xff]   ;;  %v2296_v3 = vld [vmem:[%s3007_s1 + $0x158] sm:$0xff]  }
  0x16   :  { %1972 = vmatprep.subr.bf16.mxu1 %v2239_v21  ;;  %v2288_v62 = vld [vmem:[%s3007_s1 + $0x120] sm:$0xff]   ;;  %v2292_v1 = vld [vmem:[%s3008_s0 + $0x12c] ss:$36 sps:$4 sm:$0xff]   ;;  %v2297_v5 = vld [vmem:[%s3007_s1 + $0x1d8] sm:$0xff]  }
  0x17   :  { %v2289_v63 = vld [vmem:[%s3007_s1 + $0x1a0] sm:$0xff]   ;;  %v2295_v4 = vld [vmem:[%s3008_s0 + $0x128] ss:$36 sps:$4 sm:$0xff]   ;;  %v2298_v6 = vld [vmem:[%s3007_s1 + $0x118] sm:$0xff]  }
  0x18   :  { %1909 = vmatpush3.bf16.msra.mxu0 %v2240_v22  ;;  %v2290_v0 = vld [vmem:[%s3008_s0 + $0x124] ss:$36 sps:$4 sm:$0xff]   ;;  %v2299_v7 = vld [vmem:[%s3007_s1 + $0x198] sm:$0xff]   ;;  %v2300_v8 = vld [vmem:[%s3008_s0 + $0x16c] ss:$36 sps:$4 sm:$0xff]  }
  0x19   :  { %1973 = vmatpush3.bf16.msra.mxu1 %v2241_v23  ;;  %1910 = vmatprep.subr.bf16.mxu0 %v2242_v24  ;;  %v2294_v2 = vld [vmem:[%s3008_s0 + $0x120] ss:$36 sps:$4 sm:$0xff]   ;;  %v2302_v9 = vld [vmem:[%s3008_s0 + $0x174] ss:$36 sps:$4 sm:$0xff]   ;;  %v2304_v12 = vld [vmem:[%s3008_s0 + $0x168] ss:$36 sps:$4 sm:$0xff]  }
  0x1a   :  { %1974 = vmatprep.subr.bf16.mxu1 %v2243_v25  ;;  %v2306_v10 = vld [vmem:[%s3007_s1 + $0x150] sm:$0xff]   ;;  %v2312_v17 = vld [vmem:[%s3008_s0 + $0x1bc] ss:$36 sps:$4 sm:$0xff]   ;;  %v2316_v18 = vld [vmem:[%s3007_s1 + $0x148] sm:$0xff]  }
  0x1b   :  { %v2307_v11 = vld [vmem:[%s3007_s1 + $0x1d0] sm:$0xff]   ;;  %v2317_v19 = vld [vmem:[%s3007_s1 + $0x1c8] sm:$0xff]   ;;  %v2315_v23 = vld [vmem:[%s3008_s0 + $0x1b8] ss:$36 sps:$4 sm:$0xff]  }
  0x1c   :  { %1911 = vmatpush3.bf16.msra.mxu0 %v2244_v26  ;;  %v2308_v13 = vld [vmem:[%s3007_s1 + $0x110] sm:$0xff]   ;;  %v2318_v20 = vld [vmem:[%s3007_s1 + $0x108] sm:$0xff]   ;;  %v2320_v24 = vld [vmem:[%s3008_s0 + $0x1fc] ss:$36 sps:$4 sm:$0xff]  }
  0x1d   :  { %1975 = vmatpush3.bf16.msra.mxu1 %v2245_v27  ;;  %1912 = vmatprep.subr.bf16.mxu0 %v2246_v28  ;;  %v2309_v14 = vld [vmem:[%s3007_s1 + $0x190] sm:$0xff]   ;;  %v2319_v21 = vld [vmem:[%s3007_s1 + $0x188] sm:$0xff]   ;;  %v2326_v26 = vld [vmem:[%s3007_s1 + $0x140] sm:$0xff]  }
  0x1e   :  { %1976 = vmatprep.subr.bf16.mxu1 %v2247_v29  ;;  %v2305_v15 = vld [vmem:[%s3008_s0 + $0x170] ss:$36 sps:$4 sm:$0xff]   ;;  %v2322_v25 = vld [vmem:[%s3008_s0 + $0x204] ss:$36 sps:$4 sm:$0xff]  }
  0x1f   :  { %v2310_v16 = vld [vmem:[%s3008_s0 + $0x1b4] ss:$36 sps:$4 sm:$0xff]   ;;  %v2327_v27 = vld [vmem:[%s3007_s1 + $0x1c0] sm:$0xff]  }
  0x20   :  { %1913 = vmatpush3.bf16.msra.mxu0 %v2248_v30  ;;  %v2314_v22 = vld [vmem:[%s3008_s0 + $0x1b0] ss:$36 sps:$4 sm:$0xff]   ;;  %v2328_v28 = vld [vmem:[%s3007_s1 + $0x100] sm:$0xff]   ;;  %v2324_v30 = vld [vmem:[%s3008_s0 + $0x1f8] ss:$36 sps:$4 sm:$0xff]  }
  0x21   :  { %1977 = vmatpush3.bf16.msra.mxu1 %v2249_v31  ;;  %2026 = vmatprep.subr.bf16.mxu0 %v2256_v36  ;;  %v2329_v29 = vld [vmem:[%s3007_s1 + $0x180] sm:$0xff]   ;;  %v2332_v33 = vld [vmem:[%s3008_s0 + $0x14] ss:$36 sps:$4 sm:$0xff]  }
  0x22   :  { %2090 = vmatprep.subr.bf16.mxu1 %v2257_v37  ;;  %v2325_v31 = vld [vmem:[%s3008_s0 + $0x200] ss:$36 sps:$4 sm:$0xff]   ;;  %v2330_v35 = vld [vmem:[%s3008_s0 + $0x10] ss:$36 sps:$4 sm:$0xff]   ;;  %v2333_v36 = vld [vmem:[%s3008_s0 + $0x18] ss:$36 sps:$4 sm:$0xff]  }
  0x23   :  { %1075 = vmatmul.mubr.bf16.vlgmr.msra.gmra.mxu0 %v2250_v32  ;;  %v2336_v32 = vld [vmem:[%s3007_s1 + $0x238] sm:$0xff]  }
  0x24   :  { %1172 = vmatmul.mubr.bf16.vlgmr.msra.gmra.mxu1 %v2253_v34  ;;  %2027 = vmatpush3.bf16.msra.mxu0 %v2258_v38  ;;  %v2335_v34 = vld [vmem:[%s3008_s0 + $0x1c] ss:$36 sps:$4 sm:$0xff]   ;;  %v2339_v38 = vld [vmem:[%s3008_s0 + $0x64] ss:$36 sps:$4 sm:$0xff]  }
  0x25   :  { %2091 = vmatpush3.bf16.msra.mxu1 %v2259_v39  ;;  %1082 = vmatprep.mubr.bf16.mxu0 %v2260_v40  ;;  %v2337_v37 = vld [vmem:[%s3008_s0 + $0x5c] ss:$36 sps:$4 sm:$0xff]   ;;  %v2343_v39 = vld [vmem:[%s3007_s1 + $0x230] sm:$0xff]   ;;  %v2350_v40 = vld [vmem:[%s3007_s1 + $0x228] sm:$0xff]  }
  0x26   :  { %1179 = vmatprep.mubr.bf16.mxu1 %v2262_v41  ;;  %2028 = vmatprep.subr.bf16.mxu0 %v2266_v44  ;;  %v2341_v41 = vld [vmem:[%s3008_s0 + $0x58] ss:$36 sps:$4 sm:$0xff]   ;;  %v2346_v44 = vld [vmem:[%s3008_s0 + $0xac] ss:$36 sps:$4 sm:$0xff]  }
  0x27   :  { %2092 = vmatprep.subr.bf16.mxu1 %v2267_v45  ;;  %v2357_v45 = vld [vmem:[%s3007_s1 + $0x220] sm:$0xff]  }
  0x28   :  { %2029 = vmatpush3.bf16.msra.mxu0 %v2268_v46  ;;  %v2364_v46 = vld [vmem:[%s3007_s1 + $0x218] sm:$0xff]  }
  0x29   :  { %2093 = vmatpush3.bf16.msra.mxu1 %v2269_v47  ;;  %2030 = vmatprep.subr.bf16.mxu0 %v2276_v52  ;;  %v2348_v47 = vld [vmem:[%s3008_s0 + $0xa0] ss:$36 sps:$4 sm:$0xff]   ;;  %v2355_v52 = vld [vmem:[%s3008_s0 + $0xe8] ss:$36 sps:$4 sm:$0xff]  }
  0x2a   :  { %2094 = vmatprep.subr.bf16.mxu1 %v2277_v53  ;;  %v2378_v53 = vld [vmem:[%s3007_s1 + $0x208] sm:$0xff]  }
  0x2b   :  { %1083 = vmatmul.mubr.bf16.gmra.mxu0 %v2264_v42  ;;  %v2342_v42 = vld [vmem:[%s3008_s0 + $0x60] ss:$36 sps:$4 sm:$0xff]  }
  0x2c   :  { %1180 = vmatmul.mubr.bf16.gmra.mxu1 %v2265_v43  ;;  %1090 = vmatprep.mubr.bf16.mxu0 %v2270_v48  ;;  %v2344_v43 = vld [vmem:[%s3008_s0 + $0xa4] ss:$36 sps:$4 sm:$0xff]  }
  0x2d   :  { %1187 = vmatprep.mubr.bf16.mxu1 %v2272_v49  ;;  %2031 = vmatpush3.bf16.msra.mxu0 %v2278_v54  ;;  %v2349_v48 = vld [vmem:[%s3008_s0 + $0xa8] ss:$36 sps:$4 sm:$0xff]   ;;  %v2356_v54 = vld [vmem:[%s3008_s0 + $0xf0] ss:$36 sps:$4 sm:$0xff]  }
  0x2e   :  { %2095 = vmatpush3.bf16.msra.mxu1 %v2279_v55  ;;  %2032 = vmatprep.subr.bf16.mxu0 %v2286_v60  ;;  %v2351_v49 = vld [vmem:[%s3008_s0 + $0xec] ss:$36 sps:$4 sm:$0xff]   ;;  %v2358_v55 = vld [vmem:[%s3008_s0 + $0x134] ss:$36 sps:$4 sm:$0xff]   ;;  %v2365_v60 = vld [vmem:[%s3008_s0 + $0x17c] ss:$36 sps:$4 sm:$0xff]  }
  0x2f   :  { %2096 = vmatprep.subr.bf16.mxu1 %v2287_v61  ;;  %v2367_v61 = vld [vmem:[%s3008_s0 + $0x184] ss:$36 sps:$4 sm:$0xff]  }
  0x31   :  { %2033 = vmatpush3.bf16.msra.mxu0 %v2288_v62  ;;  %v2369_v62 = vld [vmem:[%s3008_s0 + $0x178] ss:$36 sps:$4 sm:$0xff]  }
  0x32   :  { %2097 = vmatpush3.bf16.msra.mxu1 %v2289_v63  ;;  %2034 = vmatprep.subr.bf16.mxu0 %v2296_v3  ;;  %v2370_v63 = vld [vmem:[%s3008_s0 + $0x180] ss:$36 sps:$4 sm:$0xff]   ;;  %v2377_v3 = vld [vmem:[%s3008_s0 + $0x1c8] ss:$36 sps:$4 sm:$0xff]  }
  0x33   :  { %1091 = vmatmul.mubr.bf16.gmra.mxu0 %v2274_v50  ;;  %2098 = vmatprep.subr.bf16.mxu1 %v2297_v5  ;;  %v2353_v50 = vld [vmem:[%s3008_s0 + $0xf4] ss:$36 sps:$4 sm:$0xff]  }
  0x34   :  { %1188 = vmatmul.mubr.bf16.gmra.mxu1 %v2275_v51  ;;  %1098 = vmatprep.mubr.bf16.mxu0 %v2280_v56  ;;  %v2371_v51 = vld [vmem:[%s3007_s1 + $0x210] sm:$0xff]   ;;  %v2360_v56 = vld [vmem:[%s3008_s0 + $0x13c] ss:$36 sps:$4 sm:$0xff]  }
  0x35   :  { %1195 = vmatprep.mubr.bf16.mxu1 %v2282_v57  ;;  %2035 = vmatpush3.bf16.msra.mxu0 %v2298_v6  ;;  %v2385_v57 = vld [vmem:[%s3007_s1 + $0x200] sm:$0xff]   ;;  %v2381_v5 = vld [vmem:[%s3008_s0 + $0x214] ss:$36 sps:$4 sm:$0xff]   ;;  %v2383_v6 = vld [vmem:[%s3008_s0 + $0x208] ss:$36 sps:$4 sm:$0xff]  }
  0x36   :  { %2099 = vmatpush3.bf16.msra.mxu1 %v2299_v7  ;;  %2036 = vmatprep.subr.bf16.mxu0 %v2306_v10  ;;  %v2384_v7 = vld [vmem:[%s3008_s0 + $0x210] ss:$36 sps:$4 sm:$0xff]   ;;  %v2388_v10 = vld [vmem:[%s3008_s0 + $0x68] ss:$36 sps:$4 sm:$0xff]  }
  0x37   :  { %2100 = vmatprep.subr.bf16.mxu1 %v2307_v11  ;;  %v2389_v11 = vld [vmem:[%s3008_s0 + $0x188] ss:$36 sps:$4 sm:$0xff]  }
  0x39   :  { %2037 = vmatpush3.bf16.msra.mxu0 %v2308_v13  ;;  %v2391_v13 = vld [vmem:[%s3008_s0 + $0x1d0] ss:$36 sps:$4 sm:$0xff]  }
  0x3a   :  { %2101 = vmatpush3.bf16.msra.mxu1 %v2309_v14  ;;  %2038 = vmatprep.subr.bf16.mxu0 %v2316_v18  ;;  %v2392_v14 = vld [vmem:[%s3008_s0 + $0xf8] ss:$36 sps:$4 sm:$0xff]  }
  0x3b   :  { %1099 = vmatmul.mubr.bf16.gmra.mxu0 %v2284_v58  ;;  %2102 = vmatprep.subr.bf16.mxu1 %v2317_v19  ;;  %v2362_v58 = vld [vmem:[%s3008_s0 + $0x130] ss:$36 sps:$4 sm:$0xff]  }
  0x3c   :  { %1196 = vmatmul.mubr.bf16.gmra.mxu1 %v2285_v59  ;;  %1106 = vmatprep.mubr.bf16.mxu0 %v2290_v0  ;;  %v2363_v59 = vld [vmem:[%s3008_s0 + $0x138] ss:$36 sps:$4 sm:$0xff]   ;;  %v2372_v0 = vld [vmem:[%s3008_s0 + $0x1c4] ss:$36 sps:$4 sm:$0xff]  }
  0x3d   :  { %1203 = vmatprep.mubr.bf16.mxu1 %v2292_v1  ;;  %2039 = vmatpush3.bf16.msra.mxu0 %v2318_v20  ;;  %v2374_v1 = vld [vmem:[%s3008_s0 + $0x1cc] ss:$36 sps:$4 sm:$0xff]  }
  0x3e   :  { %2103 = vmatpush3.bf16.msra.mxu1 %v2319_v21  ;;  %2040 = vmatprep.subr.bf16.mxu0 %v2326_v26 }
  0x3f   :  { %2104 = vmatprep.subr.bf16.mxu1 %v2327_v27 }
  0x41   :  { %2041 = vmatpush3.bf16.msra.mxu0 %v2328_v28 }
  0x42   :  { %2105 = vmatpush3.bf16.msra.mxu1 %v2329_v29  ;;  %2170 = vmatprep.subr.bf16.mxu0 %v2336_v32 }
  0x43   :  { %1107 = vmatmul.mubr.bf16.gmra.mxu0 %v2294_v2  ;;  %2202 = vmatprep.subr.bf16.mxu1 %v2336_v32  ;;  %v2376_v2 = vld [vmem:[%s3008_s0 + $0x1c0] ss:$36 sps:$4 sm:$0xff]  }
  0x44   :  { %1204 = vmatmul.mubr.bf16.gmra.mxu1 %v2295_v4  ;;  %1114 = vmatprep.mubr.bf16.mxu0 %v2300_v8  ;;  %v2379_v4 = vld [vmem:[%s3008_s0 + $0x20c] ss:$36 sps:$4 sm:$0xff]   ;;  %v2386_v8 = vld [vmem:[%s3008_s0 + $0x20] ss:$36 sps:$4 sm:$0xff]  }
  0x45   :  { %1211 = vmatprep.mubr.bf16.mxu1 %v2302_v9  ;;  %v2387_v9 = vld [vmem:[%s3008_s0 + $0x140] ss:$36 sps:$4 sm:$0xff]  }
  0x4b   :  { %1115 = vmatmul.mubr.bf16.gmra.mxu0 %v2304_v12  ;;  %v2390_v12 = vld [vmem:[%s3008_s0 + $0xb0] ss:$36 sps:$4 sm:$0xff]  }
  0x4c   :  { %1212 = vmatmul.mubr.bf16.gmra.mxu1 %v2305_v15  ;;  %1122 = vmatprep.mubr.bf16.mxu0 %v2310_v16  ;;  %v2393_v15 = vld [vmem:[%s3008_s0 + $0x218] ss:$36 sps:$4 sm:$0xff]  }
  0x4d   :  { %1219 = vmatprep.mubr.bf16.mxu1 %v2312_v17 }
  0x53   :  { %1123 = vmatmul.mubr.bf16.gmra.mxu0 %v2314_v22 }
  0x54   :  { %1220 = vmatmul.mubr.bf16.gmra.mxu1 %v2315_v23  ;;  %1130 = vmatprep.mubr.bf16.mxu0 %v2320_v24 }
  0x55   :  { %1227 = vmatprep.mubr.bf16.mxu1 %v2322_v25 }
  0x5b   :  { %1131 = vmatmul.mubr.bf16.gmra.mxu0 %v2324_v30 }
  0x5c   :  { %1228 = vmatmul.mubr.bf16.gmra.mxu1 %v2325_v31  ;;  %1268 = vmatprep.mubr.bf16.mxu0 %v2332_v33 }
  0x5d   :  { %1365 = vmatprep.mubr.bf16.mxu1 %v2335_v34 }
  0x63   :  { %1269 = vmatmul.mubr.bf16.vlgmr.msra.gmra.mxu0 %v2330_v35 }
  0x64   :  { %1366 = vmatmul.mubr.bf16.vlgmr.msra.gmra.mxu1 %v2333_v36  ;;  %2171 = vmatpush3.bf16.msra.mxu0 %v2336_v32 }
  0x65   :  { %2210 = vmatpush3.bf16.msra.mxu1 %v2336_v32  ;;  %1276 = vmatprep.mubr.bf16.mxu0 %v2337_v37 }
  0x66   :  { %1373 = vmatprep.mubr.bf16.mxu1 %v2339_v38  ;;  %2172 = vmatprep.subr.bf16.mxu0 %v2343_v39 }
  0x67   :  { %2203 = vmatprep.subr.bf16.mxu1 %v2343_v39 }
  0x68   :  { %2173 = vmatpush3.bf16.msra.mxu0 %v2343_v39 }
  0x69   :  { %2211 = vmatpush3.bf16.msra.mxu1 %v2343_v39  ;;  %2174 = vmatprep.subr.bf16.mxu0 %v2350_v40 }
  0x6a   :  { %2204 = vmatprep.subr.bf16.mxu1 %v2350_v40 }
  0x6b   :  { %1277 = vmatmul.mubr.bf16.gmra.mxu0 %v2341_v41 }
  0x6c   :  { %1374 = vmatmul.mubr.bf16.gmra.mxu1 %v2342_v42  ;;  %1284 = vmatprep.mubr.bf16.mxu0 %v2344_v43 }
  0x6d   :  { %1381 = vmatprep.mubr.bf16.mxu1 %v2346_v44  ;;  %2175 = vmatpush3.bf16.msra.mxu0 %v2350_v40 }
  0x6e   :  { %2212 = vmatpush3.bf16.msra.mxu1 %v2350_v40  ;;  %2176 = vmatprep.subr.bf16.mxu0 %v2357_v45 }
  0x6f   :  { %2205 = vmatprep.subr.bf16.mxu1 %v2357_v45 }
  0x71   :  { %2177 = vmatpush3.bf16.msra.mxu0 %v2357_v45 }
  0x72   :  { %2213 = vmatpush3.bf16.msra.mxu1 %v2357_v45  ;;  %2178 = vmatprep.subr.bf16.mxu0 %v2364_v46 }
  0x73   :  { %1285 = vmatmul.mubr.bf16.gmra.mxu0 %v2348_v47  ;;  %2206 = vmatprep.subr.bf16.mxu1 %v2364_v46 }
  0x74   :  { %1382 = vmatmul.mubr.bf16.gmra.mxu1 %v2349_v48  ;;  %1292 = vmatprep.mubr.bf16.mxu0 %v2351_v49 }
  0x75   :  { %1389 = vmatprep.mubr.bf16.mxu1 %v2353_v50  ;;  %2179 = vmatpush3.bf16.msra.mxu0 %v2364_v46 }
  0x76   :  { %2214 = vmatpush3.bf16.msra.mxu1 %v2364_v46  ;;  %2180 = vmatprep.subr.bf16.mxu0 %v2371_v51 }
  0x77   :  { %2207 = vmatprep.subr.bf16.mxu1 %v2371_v51 }
  0x79   :  { %2181 = vmatpush3.bf16.msra.mxu0 %v2371_v51 }
  0x7a   :  { %2215 = vmatpush3.bf16.msra.mxu1 %v2371_v51  ;;  %2182 = vmatprep.subr.bf16.mxu0 %v2378_v53 }
  0x7b   :  { %1293 = vmatmul.mubr.bf16.gmra.mxu0 %v2355_v52  ;;  %2208 = vmatprep.subr.bf16.mxu1 %v2378_v53 }
  0x7c   :  { %1390 = vmatmul.mubr.bf16.gmra.mxu1 %v2356_v54  ;;  %1300 = vmatprep.mubr.bf16.mxu0 %v2358_v55 }
  0x7d   :  { %1397 = vmatprep.mubr.bf16.mxu1 %v2360_v56  ;;  %2183 = vmatpush3.bf16.msra.mxu0 %v2378_v53 }
  0x7e   :  { %2216 = vmatpush3.bf16.msra.mxu1 %v2378_v53  ;;  %2184 = vmatprep.subr.bf16.mxu0 %v2385_v57 }
  0x7f   :  { %2209 = vmatprep.subr.bf16.mxu1 %v2385_v57 }
  0x81   :  { %2185 = vmatpush3.bf16.msra.mxu0 %v2385_v57 }
  0x82   :  { %2217 = vmatpush3.bf16.msra.mxu1 %v2385_v57 }
  0x83   :  { %1301 = vmatmul.mubr.bf16.gmra.mxu0 %v2362_v58 }
  0x84   :  { %1398 = vmatmul.mubr.bf16.gmra.mxu1 %v2363_v59  ;;  %1308 = vmatprep.mubr.bf16.mxu0 %v2365_v60 }
  0x85   :  { %1405 = vmatprep.mubr.bf16.mxu1 %v2367_v61 }
  0x8b   :  { %1309 = vmatmul.mubr.bf16.gmra.mxu0 %v2369_v62 }
  0x8c   :  { %1406 = vmatmul.mubr.bf16.gmra.mxu1 %v2370_v63  ;;  %1316 = vmatprep.mubr.bf16.mxu0 %v2372_v0 }
  0x8d   :  { %1413 = vmatprep.mubr.bf16.mxu1 %v2374_v1 }
  0x93   :  { %1317 = vmatmul.mubr.bf16.gmra.mxu0 %v2376_v2 }
  0x94   :  { %1414 = vmatmul.mubr.bf16.gmra.mxu1 %v2377_v3  ;;  %1324 = vmatprep.mubr.bf16.mxu0 %v2379_v4 }
  0x95   :  { %1421 = vmatprep.mubr.bf16.mxu1 %v2381_v5 }
  0x9b   :  { %1325 = vmatmul.mubr.bf16.gmra.mxu0 %v2383_v6 }
  0x9c   :  { %1422 = vmatmul.mubr.bf16.gmra.mxu1 %v2384_v7  ;;  %2186 = vmatprep.mubr.bf16.mxu0 %v2386_v8 }
  0x9d   :  { %2194 = vmatprep.mubr.bf16.mxu1 %v2387_v9 }
  0xa3   :  { %2187 = vmatmul.mubr.bf16.vlgmr.msra.gmra.mxu0 %v2388_v10 }
  0xa4   :  { %2195 = vmatmul.mubr.bf16.vlgmr.msra.gmra.mxu1 %v2389_v11  ;;  %2190 = vmatprep.mubr.bf16.mxu0 %v2390_v12 }
  0xa5   :  { %2198 = vmatprep.mubr.bf16.mxu1 %v2391_v13 }
  0xab   :  { %2191 = vmatmul.mubr.bf16.gmra.mxu0 %v2392_v14 }
  0xac   :  { %2199 = vmatmul.mubr.bf16.gmra.mxu1 %v2393_v15 }
  0xe3   :  { %v1914_v16 = vpop.f32.mrf.mxu0 }
  0xe4   :  { %v1978_v17 = vpop.f32.mrf.mxu1 }
  0xe5   :  { %v1915_v18 = vpop.f32.mrf.mxu0 }
  0xe6   :  { %v1916_v19 = vadd.f32 %v1915_v18, %v1914_v16  ;;  %v1979_v20 = vpop.f32.mrf.mxu1 }
  0xe7   :  { %v1980_v21 = vadd.f32 %v1979_v20, %v1978_v17  ;;  %v1917_v22 = vpop.f32.mrf.mxu0 }
  0xe8   :  { %v1981_v23 = vpop.f32.mrf.mxu1 }
  0xe9   :  { %v2851_v24 = vadd.f32 %v1980_v21, %v1916_v19  ;;  %v1918_v25 = vpop.f32.mrf.mxu0 }
  0xea   :  { %v1919_v26 = vadd.f32 %v1918_v25, %v1917_v22  ;;  %v1982_v27 = vpop.f32.mrf.mxu1 }
  0xeb   :  { %v1983_v28 = vadd.f32 %v1982_v27, %v1981_v23  ;;  %v1920_v29 = vpop.f32.mrf.mxu0 }
  0xec   :  { %v1984_v30 = vpop.f32.mrf.mxu1 }
  0xed   :  { %v2853_v31 = vadd.f32 %v1983_v28, %v1919_v26  ;;  %v1921_v32 = vpop.f32.mrf.mxu0 }
  0xee   :  { %v1922_v33 = vadd.f32 %v1921_v32, %v1920_v29  ;;  %v1985_v34 = vpop.f32.mrf.mxu1 }
  0xef   :  { %v1986_v35 = vadd.f32 %v1985_v34, %v1984_v30  ;;  %v1923_v36 = vpop.f32.mrf.mxu0 }
  0xf0   :  { %v1987_v37 = vpop.f32.mrf.mxu1 }
  0xf1   :  { %v2855_v38 = vadd.f32 %v1986_v35, %v1922_v33  ;;  %v1924_v39 = vpop.f32.mrf.mxu0 }
  0xf2   :  { %v1925_v40 = vadd.f32 %v1924_v39, %v1923_v36  ;;  %v1988_v41 = vpop.f32.mrf.mxu1 }
  0xf3   :  { %v1989_v42 = vadd.f32 %v1988_v41, %v1987_v37  ;;  %v1926_v43 = vpop.f32.mrf.mxu0 }
  0xf4   :  { %v1990_v44 = vpop.f32.mrf.mxu1 }
  0xf5   :  { %v2857_v45 = vadd.f32 %v1989_v42, %v1925_v40  ;;  %v1927_v46 = vpop.f32.mrf.mxu0 }
  0xf6   :  { %v1928_v47 = vadd.f32 %v1927_v46, %v1926_v43  ;;  %v1991_v48 = vpop.f32.mrf.mxu1 }
  0xf7   :  { %v1992_v49 = vadd.f32 %v1991_v48, %v1990_v44  ;;  %v1929_v50 = vpop.f32.mrf.mxu0 }
  0xf8   :  { %v1993_v51 = vpop.f32.mrf.mxu1 }
  0xf9   :  { %v2859_v52 = vadd.f32 %v1992_v49, %v1928_v47  ;;  %v1930_v53 = vpop.f32.mrf.mxu0 }
  0xfa   :  { %v1931_v54 = vadd.f32 %v1930_v53, %v1929_v50  ;;  %v1994_v55 = vpop.f32.mrf.mxu1 }
  0xfb   :  { %v1995_v56 = vadd.f32 %v1994_v55, %v1993_v51  ;;  %v1932_v57 = vpop.f32.mrf.mxu0 }
  0xfc   :  { %v1996_v58 = vpop.f32.mrf.mxu1 }
  0xfd   :  { %v2861_v59 = vadd.f32 %v1995_v56, %v1931_v54  ;;  %v1933_v60 = vpop.f32.mrf.mxu0 }
  0xfe   :  { %v1934_v61 = vadd.f32 %v1933_v60, %v1932_v57  ;;  %v1997_v62 = vpop.f32.mrf.mxu1 }
  0xff   :  { %v1998_v63 = vadd.f32 %v1997_v62, %v1996_v58  ;;  %v1935_v0 = vpop.f32.mrf.mxu0 }
 0x100   :  { %v1999_v1 = vpop.f32.mrf.mxu1 }
 0x101   :  { %v2863_v2 = vadd.f32 %v1998_v63, %v1934_v61  ;;  %v1936_v3 = vpop.f32.mrf.mxu0 }
 0x102   :  { %v1937_v4 = vadd.f32 %v1936_v3, %v1935_v0  ;;  %v2000_v5 = vpop.f32.mrf.mxu1 }
 0x103   :  { %v2001_v6 = vadd.f32 %v2000_v5, %v1999_v1  ;;  %v1938_v7 = vpop.f32.mrf.mxu0 }
 0x104   :  { %v2002_v8 = vpop.f32.mrf.mxu1 }
 0x105   :  { %v2865_v9 = vadd.f32 %v2001_v6, %v1937_v4  ;;  %v1939_v10 = vpop.f32.mrf.mxu0 }
 0x106   :  { %v1940_v11 = vadd.f32 %v1939_v10, %v1938_v7  ;;  %v2003_v12 = vpop.f32.mrf.mxu1 }
 0x107   :  { %v2004_v13 = vadd.f32 %v2003_v12, %v2002_v8  ;;  %v1941_v14 = vpop.f32.mrf.mxu0 }
 0x108   :  { %v2005_v15 = vpop.f32.mrf.mxu1 }
 0x109   :  { %v2867_v16 = vadd.f32 %v2004_v13, %v1940_v11  ;;  %v1942_v17 = vpop.f32.mrf.mxu0 }
 0x10a   :  { %v1943_v18 = vadd.f32 %v1942_v17, %v1941_v14  ;;  %v2006_v19 = vpop.f32.mrf.mxu1 }
 0x10b   :  { %v2007_v20 = vadd.f32 %v2006_v19, %v2005_v15  ;;  %v1944_v21 = vpop.f32.mrf.mxu0 }
 0x10c   :  { %v2008_v22 = vpop.f32.mrf.mxu1 }
 0x10d   :  { %v2869_v23 = vadd.f32 %v2007_v20, %v1943_v18  ;;  %v1945_v25 = vpop.f32.mrf.mxu0 }
 0x10e   :  { %v1946_v26 = vadd.f32 %v1945_v25, %v1944_v21  ;;  %v2009_v27 = vpop.f32.mrf.mxu1 }
 0x10f   :  { %3012 = vst [vmem:[#allocation2_spill] sm:$0xff] %v2869_v23  ;;  %v2010_v28 = vadd.f32 %v2009_v27, %v2008_v22  ;;  %v1947_v29 = vpop.f32.mrf.mxu0 }
 0x110   :  { %v2011_v30 = vpop.f32.mrf.mxu1 }
 0x111   :  { %v2871_v32 = vadd.f32 %v2010_v28, %v1946_v26  ;;  %v1948_v33 = vpop.f32.mrf.mxu0 }
 0x112   :  { %v1949_v34 = vadd.f32 %v1948_v33, %v1947_v29  ;;  %v2012_v35 = vpop.f32.mrf.mxu1 }
 0x113   :  { %v2013_v36 = vadd.f32 %v2012_v35, %v2011_v30  ;;  %v1950_v37 = vpop.f32.mrf.mxu0 }
 0x114   :  { %v2014_v39 = vpop.f32.mrf.mxu1 }
 0x115   :  { %v2873_v40 = vadd.f32 %v2013_v36, %v1949_v34  ;;  %v1951_v41 = vpop.f32.mrf.mxu0 }
 0x116   :  { %v1952_v42 = vadd.f32 %v1951_v41, %v1950_v37  ;;  %v2015_v43 = vpop.f32.mrf.mxu1 }
 0x117   :  { %3013 = vst [vmem:[#allocation3_spill] sm:$0xff] %v2873_v40  ;;  %v2016_v44 = vadd.f32 %v2015_v43, %v2014_v39  ;;  %v1953_v46 = vpop.f32.mrf.mxu0 }
 0x118   :  { %v2017_v47 = vpop.f32.mrf.mxu1 }
 0x119   :  { %v2875_v48 = vadd.f32 %v2016_v44, %v1952_v42  ;;  %v1954_v49 = vpop.f32.mrf.mxu0 }
 0x11a   :  { %v1955_v50 = vadd.f32 %v1954_v49, %v1953_v46  ;;  %v2018_v51 = vpop.f32.mrf.mxu1 }
 0x11b   :  { %3014 = vst [vmem:[#allocation4_spill] sm:$0xff] %v2875_v48  ;;  %v2019_v53 = vadd.f32 %v2018_v51, %v2017_v47  ;;  %v1956_v54 = vpop.f32.mrf.mxu0 }
 0x11c   :  { %v2020_v55 = vpop.f32.mrf.mxu1 }
 0x11d   :  { %v2877_v56 = vadd.f32 %v2019_v53, %v1955_v50  ;;  %v1957_v57 = vpop.f32.mrf.mxu0 }
 0x11e   :  { %v1958_v58 = vadd.f32 %v1957_v57, %v1956_v54  ;;  %v2021_v60 = vpop.f32.mrf.mxu1 }
 0x11f   :  { %3015 = vst [vmem:[#allocation5_spill] sm:$0xff] %v2877_v56  ;;  %v2022_v61 = vadd.f32 %v2021_v60, %v2020_v55  ;;  %v1959_v62 = vpop.f32.mrf.mxu0 }
 0x120   :  { %v2023_v63 = vpop.f32.mrf.mxu1 }
 0x121   :  { %v2879_v0 = vadd.f32 %v2022_v61, %v1958_v58  ;;  %v1960_v1 = vpop.f32.mrf.mxu0 }
 0x122   :  { %v1961_v3 = vadd.f32 %v1960_v1, %v1959_v62  ;;  %v2024_v4 = vpop.f32.mrf.mxu1 }
 0x123   :  { %3016 = vst [vmem:[#allocation6_spill] sm:$0xff] %v2879_v0  ;;  %v2025_v5 = vadd.f32 %v2024_v4, %v2023_v63  ;;  %v2042_v6 = vpop.f32.mrf.mxu0 }
 0x124   :  { %v2106_v7 = vpop.f32.mrf.mxu1 }
 0x125   :  { %v2881_v8 = vadd.f32 %v2025_v5, %v1961_v3  ;;  %v2043_v10 = vpop.f32.mrf.mxu0 }
 0x126   :  { %v2044_v11 = vadd.f32 %v2043_v10, %v2042_v6  ;;  %v2107_v12 = vpop.f32.mrf.mxu1 }
 0x127   :  { %3017 = vst [vmem:[#allocation7_spill] sm:$0xff] %v2881_v8  ;;  %v2045_v13 = vpop.f32.mrf.mxu0  ;;  %v2108_v15 = vadd.f32 %v2107_v12, %v2106_v7 }
 0x128   :  { %v1271_v14 = vadd.f32 %v2044_v11, %v2851_v24  ;;  %v2109_v17 = vpop.f32.mrf.mxu1 }
 0x129   :  { %v2046_v18 = vpop.f32.mrf.mxu0 }
 0x12a   :  { %v2110_v19 = vpop.f32.mrf.mxu1  ;;  %v2884_v20 = vadd.f32 %v2108_v15, %v1271_v14  ;;  %v2047_v15 = vadd.f32 %v2046_v18, %v2045_v13 }
 0x12b   :  { %v2048_v21 = vpop.f32.mrf.mxu0 }
 0x12c   :  { %3018 = vst [vmem:[#allocation8_spill] sm:$0xff] %v2884_v20  ;;  %v2112_v22 = vpop.f32.mrf.mxu1 }
 0x12d   :  { %v2049_v25 = vpop.f32.mrf.mxu0 }
 0x12e   :  { %v2113_v26 = vpop.f32.mrf.mxu1  ;;  %v2050_v8 = vadd.f32 %v2049_v25, %v2048_v21 }
 0x12f   :  { %v2051_v27 = vpop.f32.mrf.mxu0 }
 0x130   :  { %v2115_v28 = vpop.f32.mrf.mxu1  ;;  %v1279_v23 = vadd.f32 %v2050_v8, %v2855_v38 }
 0x131   :  { %v2052_v29 = vpop.f32.mrf.mxu0 }
 0x132   :  { %v2116_v30 = vpop.f32.mrf.mxu1  ;;  %v2053_v20 = vadd.f32 %v2052_v29, %v2051_v27 }
 0x133   :  { %v2054_v33 = vpop.f32.mrf.mxu0 }
 0x134   :  { %v2118_v34 = vpop.f32.mrf.mxu1  ;;  %v1282_v13 = vadd.f32 %v2053_v20, %v2857_v45 }
 0x135   :  { %v2055_v35 = vpop.f32.mrf.mxu0 }
 0x136   :  { %v2119_v36 = vpop.f32.mrf.mxu1 }
 0x137   :  { %v2057_v37 = vpop.f32.mrf.mxu0 }
 0x138   :  { %v2121_v24 = vpop.f32.mrf.mxu1 }
 0x139   :  { %v2058_v39 = vpop.f32.mrf.mxu0 }
 0x13a   :  { %v2122_v41 = vpop.f32.mrf.mxu1  ;;  %v2059_v48 = vadd.f32 %v2058_v39, %v2057_v37  ;;  %v2117_v37 = vadd.f32 %v2116_v30, %v2115_v28 }
 0x13b   :  { %v2060_v42 = vpop.f32.mrf.mxu0  ;;  %v2123_v38 = vadd.f32 %v2122_v41, %v2121_v24 }
 0x13c   :  { %v2124_v43 = vpop.f32.mrf.mxu1  ;;  %v1290_v27 = vadd.f32 %v2059_v48, %v2861_v59 }
 0x13d   :  { %v2061_v44 = vpop.f32.mrf.mxu0 }
 0x13e   :  { %v2125_v46 = vpop.f32.mrf.mxu1  ;;  %v2916_v30 = vadd.f32 %v2123_v38, %v1290_v27 }
 0x13f   :  { %v2063_v47 = vpop.f32.mrf.mxu0  ;;  %v2126_v8 = vadd.f32 %v2125_v46, %v2124_v43  ;;  %v3027_v43 = vld [vmem:[#allocation3_spill] sm:$0xff] }
 0x140   :  { %v2886_v49 = vpop.f32.mrf.mxu1 }
 0x141   :  { %3019 = vst [vmem:[#allocation9_spill] sm:$0xff] %v2886_v49  ;;  %v2064_v50 = vpop.f32.mrf.mxu0  ;;  %v2111_v49 = vadd.f32 %v2110_v19, %v2109_v17 }
 0x142   :  { %v2888_v51 = vpop.f32.mrf.mxu1 }
 0x143   :  { %3020 = vst [vmem:[#allocation10_spill] sm:$0xff] %v2888_v51  ;;  %v2066_v53 = vpop.f32.mrf.mxu0  ;;  %v1274_v51 = vadd.f32 %v2047_v15, %v2853_v31 }
 0x144   :  { %v2890_v54 = vpop.f32.mrf.mxu1 }
 0x145   :  { %3021 = vst [vmem:[#allocation11_spill] sm:$0xff] %v2890_v54  ;;  %v2067_v55 = vpop.f32.mrf.mxu0  ;;  %v1371_v59 = vadd.f32 %v2111_v49, %v1274_v51 }
 0x146   :  { %v2892_v57 = vpop.f32.mrf.mxu1  ;;  %v2068_v31 = vadd.f32 %v2067_v55, %v2066_v53  ;;  %v3032_v55 = vld [vmem:[#allocation4_spill] sm:$0xff] }
 0x147   :  { %3022 = vst [vmem:[#allocation12_spill] sm:$0xff] %v2892_v57  ;;  %v2069_v58 = vpop.f32.mrf.mxu0 }
 0x148   :  { %v2894_v60 = vpop.f32.mrf.mxu1 }
 0x149   :  { %3023 = vst [vmem:[#allocation13_spill] sm:$0xff] %v2894_v60  ;;  %v2070_v61 = vpop.f32.mrf.mxu0  ;;  %v2056_v60 = vadd.f32 %v2055_v35, %v2054_v33  ;;  %v2065_v33 = vadd.f32 %v2064_v50, %v2063_v47 }
 0x14a   :  { %v2896_v62 = vpop.f32.mrf.mxu1  ;;  %v2071_v17 = vadd.f32 %v2070_v61, %v2069_v58  ;;  %v3029_v50 = vld [vmem:[#allocation10_spill] sm:$0xff] }
 0x14b   :  { %3024 = vst [vmem:[#allocation14_spill] sm:$0xff] %v2896_v62  ;;  %v2072_v63 = vpop.f32.mrf.mxu0  ;;  %v2062_v62 = vadd.f32 %v2061_v44, %v2060_v42  ;;  %v1287_v25 = vadd.f32 %v2056_v60, %v2859_v52  ;;  %v2120_v42 = vadd.f32 %v2119_v36, %v2118_v34  ;;  %v1379_v44 = vadd.f32 %v2117_v37, %v1282_v13  ;;  %v3026_v36 = vld [vmem:[#allocation2_spill] sm:$0xff] }
 0x14c   :  { %v2136_v1 = vpop.f32.mrf.mxu1  ;;  %v1303_v34 = vadd.f32 %v2068_v31, %v2867_v16  ;;  %v1306_v24 = vadd.f32 %v2071_v17, %v3026_v36  ;;  %v3030_v51 = vld [vmem:[#allocation11_spill] sm:$0xff]  ;;  %v2941_v31 = vld [vmem:[%s3010_s3] ss:$0 sm:$0xff] }
 0x14d   :  { %v2073_v3 = vpop.f32.mrf.mxu0  ;;  %v1295_v29 = vadd.f32 %v2062_v62, %v2863_v2  ;;  %v1298_v2 = vadd.f32 %v2065_v33, %v2865_v9  ;;  %v2914_v28 = vadd.f32 %v2120_v42, %v1287_v25 }
 0x14e   :  { %v2137_v4 = vpop.f32.mrf.mxu1  ;;  %v2074_v18 = vadd.f32 %v2073_v3, %v2072_v63  ;;  %v3031_v9 = vld [vmem:[#allocation12_spill] sm:$0xff] }
 0x14f   :  { %v2075_v5 = vpop.f32.mrf.mxu0  ;;  %v2912_v47 = vadd.f32 %v2126_v8, %v1295_v29  ;;  %v2138_v41 = vadd.f32 %v2137_v4, %v2136_v1  ;;  %v2132_v53 = vadd.f32 %v3031_v9, %v3030_v51  ;;  %v2931_v1 = vld [vmem:[%s3009_s2] ss:$0 sm:$0xff] }
 0x150   :  { %v2139_v6 = vpop.f32.mrf.mxu1  ;;  %v1311_v20 = vadd.f32 %v2074_v18, %v2871_v32  ;;  %v3033_v62 = vld [vmem:[#allocation13_spill] sm:$0xff] }
 0x151   :  { %v2076_v7 = vpop.f32.mrf.mxu0  ;;  %v1400_v27 = vadd.f32 %v2132_v53, %v1303_v34 }
 0x152   :  { %v2140_v10 = vpop.f32.mrf.mxu1  ;;  %v2077_v19 = vadd.f32 %v2076_v7, %v2075_v5  ;;  %v3034_v63 = vld [vmem:[#allocation14_spill] sm:$0xff]  ;;  %v1408_v4 = vadd.f32 %v2138_v41, %v1311_v20  ;;  %v3039_v20 = vld [vmem:[#allocation5_spill] sm:$0xff] }
 0x153   :  { %v2078_v11 = vpop.f32.mrf.mxu0  ;;  %v2135_v3 = vadd.f32 %v3034_v63, %v3033_v62  ;;  %v2141_v16 = vadd.f32 %v2140_v10, %v2139_v6  ;;  %v3036_v10 = vld [vmem:[#allocation6_spill] sm:$0xff] }
 0x154   :  { %v2898_v12 = vpop.f32.mrf.mxu1  ;;  %v1314_v32 = vadd.f32 %v2077_v19, %v3027_v43 }
 0x155   :  { %3025 = vst [vmem:[#allocation15_spill] sm:$0xff] %v2898_v12  ;;  %v2079_v14 = vpop.f32.mrf.mxu0  ;;  %v2114_v12 = vadd.f32 %v2113_v26, %v2112_v22  ;;  %v1403_v6 = vadd.f32 %v2135_v3, %v1306_v24 }
 0x156   :  { %v2143_v56 = vpop.f32.mrf.mxu1  ;;  %v2080_v22 = vadd.f32 %v2079_v14, %v2078_v11  ;;  %v1411_v29 = vadd.f32 %v2141_v16, %v1314_v32 }
 0x157   :  { %v2081_v0 = vpop.f32.mrf.mxu0  ;;  %v1376_v52 = vadd.f32 %v2114_v12, %v1279_v23  ;;  %v3028_v23 = vld [vmem:[#allocation9_spill] sm:$0xff] }
 0x158   :  { %v2900_v57 = vpop.f32.mrf.mxu1  ;;  %v2129_v49 = vadd.f32 %v3029_v50, %v3028_v23  ;;  %v1319_v58 = vadd.f32 %v2080_v22, %v3032_v55 }
 0x159   :  { %v2082_v54 = vpop.f32.mrf.mxu0 }
 0x15a   :  { %v2903_v40 = vpop.f32.mrf.mxu1  ;;  %v2083_v14 = vadd.f32 %v2082_v54, %v2081_v0  ;;  %v2934_v18 = vadd.f32 %v2129_v49, %v1298_v2 }
 0x15b   :  { %v2084_v21 = vpop.f32.mrf.mxu0  ;;  %v2147_v19 = vadd.f32 %v2903_v40, %v2900_v57 }
 0x15c   :  { %v2148_v35 = vpop.f32.mrf.mxu1  ;;  %v3035_v11 = vld [vmem:[#allocation15_spill] sm:$0xff] }
 0x15d   :  { %v2085_v39 = vpop.f32.mrf.mxu0  ;;  %v2144_v12 = vadd.f32 %v2143_v56, %v3035_v11  ;;  %v3037_v56 = vld [vmem:[#allocation8_spill] sm:$0xff] }
 0x15e   :  { %v2149_v45 = vpop.f32.mrf.mxu1  ;;  %v2086_v60 = vadd.f32 %v2085_v39, %v2084_v21  ;;  %v3038_v39 = vld [vmem:[#allocation7_spill] sm:$0xff] }
 0x15f   :  { %v2087_v26 = vpop.f32.mrf.mxu0  ;;  %v1416_v17 = vadd.f32 %v2144_v12, %v1319_v58 }
 0x160   :  { %v2151_v48 = vpop.f32.mrf.mxu1  ;;  %v1327_v33 = vadd.f32 %v2086_v60, %v3036_v10 }
 0x161   :  { %v2088_v46 = vpop.f32.mrf.mxu0 }
 0x162   :  { %v2152_v61 = vpop.f32.mrf.mxu1  ;;  %v2089_v5 = vadd.f32 %v2088_v46, %v2087_v26  ;;  %v1322_v26 = vadd.f32 %v2083_v14, %v3039_v20 }
 0x163   :  { %v2188_v7 = vpop.f32.mrf.mxu0  ;;  %v2153_v24 = vadd.f32 %v2152_v61, %v2151_v48 }
 0x164   :  { %v1473_v15 = vadd.f32 %v2188_v7, %v1376_v52  ;;  %v2196_v13 = vpop.f32.mrf.mxu1  ;;  %v1330_v42 = vadd.f32 %v2089_v5, %v3038_v39  ;;  %v2150_v52 = vadd.f32 %v2149_v45, %v2148_v35  ;;  %v1419_v39 = vadd.f32 %v2147_v19, %v1322_v26 }
 0x165   :  { %v1505_v21 = vadd.f32 %v2196_v13, %v1408_v4  ;;  %v1464_v25 = vpop.f32.mrf.mxu0 }
 0x166   :  { %v1536_v37 = vmul.f32 %v2931_v1, %v1473_v15  ;;  %v1465_v0 = vadd.f32 %v1464_v25, %v3037_v56  ;;  %v1496_v54 = vpop.f32.mrf.mxu1  ;;  %v1424_v49 = vadd.f32 %v2150_v52, %v1327_v33  ;;  %v1427_v48 = vadd.f32 %v2153_v24, %v1330_v42 }
 0x167   :  { %v1544_v38 = vmul.f32 %v2931_v1, %v1505_v21  ;;  %v1497_v8 = vadd.f32 %v1496_v54, %v1400_v27  ;;  %v2189_v22 = vpop.f32.mrf.mxu0 }
 0x168   :  { %v1534_v2 = vmul.f32 %v2931_v1, %v1465_v0  ;;  %v1476_v34 = vadd.f32 %v2189_v22, %v1379_v44  ;;  %v2197_v36 = vpop.f32.mrf.mxu1  ;;  %v1559_v41 = vadd.f32 %v2941_v31, %v1536_v37 }
 0x169   :  { %v1542_v43 = vmul.f32 %v2931_v1, %v1497_v8  ;;  %v1508_v32 = vadd.f32 %v2197_v36, %v1411_v29  ;;  %v1467_v40 = vpop.f32.mrf.mxu0  ;;  %v1567_v57 = vadd.f32 %v2941_v31, %v1544_v38 }
 0x16a   :  { %v1537_v46 = vmul.f32 %v2931_v1, %v1476_v34  ;;  %v1468_v23 = vadd.f32 %v1467_v40, %v1371_v59  ;;  %v1499_v50 = vpop.f32.mrf.mxu1  ;;  %v1557_v35 = vadd.f32 %v2941_v31, %v1534_v2  ;;  %v1575_v61 = vmax.f32 %v1559_v41, 0.0 }
 0x16b   :  { %v1545_v45 = vmul.f32 %v2931_v1, %v1508_v32  ;;  %v1500_v44 = vadd.f32 %v1499_v50, %v1403_v6  ;;  %v2192_v51 = vpop.f32.mrf.mxu0  ;;  %v1565_v9 = vadd.f32 %v2941_v31, %v1542_v43  ;;  %v1583_v16 = vmax.f32 %v1567_v57, 0.0 }
 0x16c   :  { %v1560_v53 = vadd.f32 %v2941_v31, %v1537_v46  ;;  %v1535_v55 = vmul.f32 %v2931_v1, %v1468_v23  ;;  %v1489_v58 = vadd.f32 %v2192_v51, %v2912_v47  ;;  %v2200_v60 = vpop.f32.mrf.mxu1  ;;  %v1573_v12 = vmax.f32 %v1557_v35, 0.0 }
 0x16d   :  { %v1568_v59 = vadd.f32 %v2941_v31, %v1545_v45  ;;  %v1543_v62 = vmul.f32 %v2931_v1, %v1500_v44  ;;  %v1521_v63 = vadd.f32 %v2200_v60, %v1424_v49  ;;  %v1480_v3 = vpop.f32.mrf.mxu0  ;;  %v1581_v21 = vmax.f32 %v1565_v9, 0.0 }
 0x16e   :  { %v1576_v5 = vmax.f32 %v1560_v53, 0.0  ;;  %v1558_v7 = vadd.f32 %v2941_v31, %v1535_v55  ;;  %v1481_v4 = vadd.f32 %v1480_v3, %v2914_v28  ;;  %v1512_v11 = vpop.f32.mrf.mxu1  ;;  %v1540_v29 = vmul.f32 %v2931_v1, %v1489_v58 }
 0x16f   :  { %v1584_v14 = vmax.f32 %v1568_v59, 0.0  ;;  %v1566_v15 = vadd.f32 %v2941_v31, %v1543_v62  ;;  %v1513_v47 = vadd.f32 %v1512_v11, %v1416_v17  ;;  %v2193_v13 = vpop.f32.mrf.mxu0  ;;  %v1548_v37 = vmul.f32 %v2931_v1, %v1521_v63 }
 0x170   :  { %v1859_v25 = vpack.c.bf16 %v1576_v5, %v1575_v61  ;;  %v1574_v27 = vmax.f32 %v1558_v7, 0.0  ;;  %v2201_v6 = vpop.f32.mrf.mxu1  ;;  %v1538_v56 = vmul.f32 %v2931_v1, %v1481_v4  ;;  %v1492_v17 = vadd.f32 %v2193_v13, %v2934_v18 }
 0x171   :  { %v1879_v10 = vpack.c.bf16 %v1584_v14, %v1583_v16  ;;  %v1582_v33 = vmax.f32 %v1566_v15, 0.0  ;;  %v1483_v28 = vpop.f32.mrf.mxu0  ;;  %v1546_v54 = vmul.f32 %v2931_v1, %v1513_v47  ;;  %v1524_v8 = vadd.f32 %v2201_v6, %v1427_v48 }
 0x172   :  { %1891 = vst [vmem:[%s3011_s4 + $0x8] sm:$0xff] %v1859_v25   ;;  %v1854_v0 = vpack.c.bf16 %v1574_v27, %v1573_v12  ;;  %v1515_v42 = vpop.f32.mrf.mxu1  ;;  %v1563_v22 = vadd.f32 %v2941_v31, %v1540_v29  ;;  %v1541_v20 = vmul.f32 %v2931_v1, %v1492_v17  ;;  %v1484_v52 = vadd.f32 %v1483_v28, %v2916_v30 }
 0x173   :  { %1895 = vst [vmem:[%s3011_s4 + $0x28] sm:$0xff] %v1879_v10   ;;  %v1874_v38 = vpack.c.bf16 %v1582_v33, %v1581_v21  ;;  %v1516_v2 = vadd.f32 %v1515_v42, %v1419_v39  ;;  %v1571_v18 = vadd.f32 %v2941_v31, %v1548_v37  ;;  %v1561_v19 = vadd.f32 %v2941_v31, %v1538_v56 }
 0x174   :  { %1855 = vst [vmem:[%s3011_s4] sm:$0xff] %v1854_v0   ;;  %v1549_v26 = vmul.f32 %v2931_v1, %v1524_v8  ;;  %v1569_v34 = vadd.f32 %v2941_v31, %v1546_v54  ;;  %v1564_v36 = vadd.f32 %v2941_v31, %v1541_v20  ;;  %v1539_v24 = vmul.f32 %v2931_v1, %v1484_v52 }
 0x175   :  { %1894 = vst [vmem:[%s3011_s4 + $0x20] sm:$0xff] %v1874_v38   ;;  %v1547_v41 = vmul.f32 %v2931_v1, %v1516_v2  ;;  %v1579_v43 = vmax.f32 %v1563_v22, 0.0  ;;  %v1587_v46 = vmax.f32 %v1571_v18, 0.0  ;;  %v1577_v23 = vmax.f32 %v1561_v19, 0.0 }
 0x176   :  { %v1572_v30 = vadd.f32 %v2941_v31, %v1549_v26  ;;  %v1580_v32 = vmax.f32 %v1564_v36, 0.0  ;;  %v1562_v40 = vadd.f32 %v2941_v31, %v1539_v24  ;;  %v1585_v49 = vmax.f32 %v1569_v34, 0.0 }
 0x177   :  { %v1570_v57 = vadd.f32 %v2941_v31, %v1547_v41 }
 0x178   :  { %v1588_v50 = vmax.f32 %v1572_v30, 0.0  ;;  %v1869_v35 = vpack.c.bf16 %v1580_v32, %v1579_v43  ;;  %v1578_v45 = vmax.f32 %v1562_v40, 0.0 }
 0x179   :  { %v1586_v44 = vmax.f32 %v1570_v57, 0.0 }
 0x17a   :  { %v1889_v51 = vpack.c.bf16 %v1588_v50, %v1587_v46  ;;  %1893 = vst [vmem:[%s3011_s4 + $0x18] sm:$0xff] %v1869_v35   ;;  %v1864_v1 = vpack.c.bf16 %v1578_v45, %v1577_v23 }
 0x17b   :  { %v1884_v48 = vpack.c.bf16 %v1586_v44, %v1585_v49 }
 0x17c   :  { %1897 = vst [vmem:[%s3011_s4 + $0x38] sm:$0xff] %v1889_v51   ;;  %1892 = vst [vmem:[%s3011_s4 + $0x10] sm:$0xff] %v1864_v1  }
 0x17d   :  { %1896 = vst [vmem:[%s3011_s4 + $0x30] sm:$0xff] %v1884_v48  }

// kernel: resnet_simple_forward.18
= control target key start
LH: loop header
LB: loop body
LE: loop exit
PB: predicated region body
PF: predicated region fallthrough
CT: control target
= control target key end

     0   :  { %s1659_s1 = inlined_call_operand.vmem [shape: bf16[1152,128], index: 1, kind: input, shape index: {}]   ;;  %s1660_s0 = inlined_call_operand.vmem [shape: bf16[32,1152], index: 0, kind: input, shape index: {}]   ;;  %s1661_s2 = inlined_call_operand.vmem [shape: f32[1,128], index: 2, kind: input, shape index: {}]   ;;  %s1662_s3 = inlined_call_operand.vmem [shape: f32[1,128], index: 3, kind: input, shape index: {}]   ;;  %s1663_s4 = inlined_call_operand.vmem [shape: bf16[32,128], index: 4, kind: output, shape index: {}]  }
   0x1   :  { %v1254_v0 = vld [vmem:[%s1659_s1 + $0x78] sm:$0xff]   ;;  %v1258_v4 = vld [vmem:[%s1659_s1 + $0x70] sm:$0xff]   ;;  %v1262_v8 = vld [vmem:[%s1659_s1 + $0x68] sm:$0xff]  }
   0x2   :  { %v1255_v1 = vld [vmem:[%s1659_s1 + $0xf8] sm:$0xff]   ;;  %1112 = vmatprep.subr.bf16.mxu0 %v1254_v0  ;;  %v1259_v5 = vld [vmem:[%s1659_s1 + $0xf0] sm:$0xff]   ;;  %v1263_v9 = vld [vmem:[%s1659_s1 + $0xe8] sm:$0xff]  }
   0x3   :  { %v1256_v2 = vld [vmem:[%s1659_s1 + $0x38] sm:$0xff]   ;;  %1140 = vmatprep.subr.bf16.mxu1 %v1255_v1  ;;  %v1260_v6 = vld [vmem:[%s1659_s1 + $0x30] sm:$0xff]   ;;  %v1264_v10 = vld [vmem:[%s1659_s1 + $0x28] sm:$0xff]  }
   0x4   :  { %v1257_v3 = vld [vmem:[%s1659_s1 + $0xb8] sm:$0xff]   ;;  %1113 = vmatpush3.bf16.msra.mxu0 %v1256_v2  ;;  %v1261_v7 = vld [vmem:[%s1659_s1 + $0xb0] sm:$0xff]   ;;  %v1265_v11 = vld [vmem:[%s1659_s1 + $0xa8] sm:$0xff]  }
   0x5   :  { %1141 = vmatpush3.bf16.msra.mxu1 %v1257_v3  ;;  %1114 = vmatprep.subr.bf16.mxu0 %v1258_v4  ;;  %v1266_v12 = vld [vmem:[%s1659_s1 + $0x60] sm:$0xff]   ;;  %v1270_v16 = vld [vmem:[%s1659_s1 + $0x58] sm:$0xff]   ;;  %v1274_v20 = vld [vmem:[%s1659_s1 + $0x50] sm:$0xff]  }
   0x6   :  { %1142 = vmatprep.subr.bf16.mxu1 %v1259_v5  ;;  %v1267_v13 = vld [vmem:[%s1659_s1 + $0xe0] sm:$0xff]   ;;  %v1271_v17 = vld [vmem:[%s1659_s1 + $0xd8] sm:$0xff]   ;;  %v1275_v21 = vld [vmem:[%s1659_s1 + $0xd0] sm:$0xff]  }
   0x7   :  { %v1268_v14 = vld [vmem:[%s1659_s1 + $0x20] sm:$0xff]   ;;  %v1272_v18 = vld [vmem:[%s1659_s1 + $0x18] sm:$0xff]   ;;  %v1276_v22 = vld [vmem:[%s1659_s1 + $0x10] sm:$0xff]  }
   0x8   :  { %1115 = vmatpush3.bf16.msra.mxu0 %v1260_v6  ;;  %v1269_v15 = vld [vmem:[%s1659_s1 + $0xa0] sm:$0xff]   ;;  %v1273_v19 = vld [vmem:[%s1659_s1 + $0x98] sm:$0xff]   ;;  %v1277_v23 = vld [vmem:[%s1659_s1 + $0x90] sm:$0xff]  }
   0x9   :  { %1143 = vmatpush3.bf16.msra.mxu1 %v1261_v7  ;;  %1116 = vmatprep.subr.bf16.mxu0 %v1262_v8  ;;  %v1278_v24 = vld [vmem:[%s1659_s1 + $0x48] sm:$0xff]   ;;  %v1282_v28 = vld [vmem:[%s1659_s1 + $0x40] sm:$0xff]   ;;  %v1292_v36 = vld [vmem:[%s1659_s1 + $0x178] sm:$0xff]  }
   0xa   :  { %1144 = vmatprep.subr.bf16.mxu1 %v1263_v9  ;;  %v1279_v25 = vld [vmem:[%s1659_s1 + $0xc8] sm:$0xff]   ;;  %v1283_v29 = vld [vmem:[%s1659_s1 + $0xc0] sm:$0xff]   ;;  %v1293_v37 = vld [vmem:[%s1659_s1 + $0x138] sm:$0xff]  }
   0xb   :  { %v1280_v26 = vld [vmem:[%s1659_s1 + $0x8] sm:$0xff]   ;;  %v1284_v30 = vld [vmem:[%s1659_s1] sm:$0xff]   ;;  %v1294_v38 = vld [vmem:[%s1659_s1 + $0x1f8] sm:$0xff]  }
   0xc   :  { %1117 = vmatpush3.bf16.msra.mxu0 %v1264_v10  ;;  %v1281_v27 = vld [vmem:[%s1659_s1 + $0x88] sm:$0xff]   ;;  %v1285_v31 = vld [vmem:[%s1659_s1 + $0x80] sm:$0xff]   ;;  %v1295_v39 = vld [vmem:[%s1659_s1 + $0x1b8] sm:$0xff]  }
   0xd   :  { %1145 = vmatpush3.bf16.msra.mxu1 %v1265_v11  ;;  %1118 = vmatprep.subr.bf16.mxu0 %v1266_v12  ;;  %v1286_v32 = vld [vmem:[%s1660_s0] ss:$36 sps:$4 sm:$0xff]   ;;  %v1289_v34 = vld [vmem:[%s1660_s0 + $0x8] ss:$36 sps:$4 sm:$0xff]   ;;  %v1296_v40 = vld [vmem:[%s1659_s1 + $0x170] sm:$0xff]  }
   0xe   :  { %1146 = vmatprep.subr.bf16.mxu1 %v1267_v13  ;;  %v1288_v33 = vld [vmem:[%s1660_s0 + $0x4] ss:$36 sps:$4 sm:$0xff]   ;;  %v1291_v35 = vld [vmem:[%s1660_s0 + $0xc] ss:$36 sps:$4 sm:$0xff]   ;;  %v1308_v52 = vld [vmem:[%s1659_s1 + $0x158] sm:$0xff]  }
   0xf   :  { %738 = vmatprep.mubr.bf16.mxu0 %v1288_v33  ;;  %787 = vmatprep.mubr.bf16.mxu1 %v1291_v35  ;;  %v1297_v41 = vld [vmem:[%s1659_s1 + $0x130] sm:$0xff]   ;;  %v1300_v44 = vld [vmem:[%s1659_s1 + $0x168] sm:$0xff]   ;;  %v1304_v48 = vld [vmem:[%s1659_s1 + $0x160] sm:$0xff]  }
  0x10   :  { %1119 = vmatpush3.bf16.msra.mxu0 %v1268_v14  ;;  %v1298_v42 = vld [vmem:[%s1659_s1 + $0x1f0] sm:$0xff]   ;;  %v1301_v45 = vld [vmem:[%s1659_s1 + $0x128] sm:$0xff]   ;;  %v1305_v49 = vld [vmem:[%s1659_s1 + $0x120] sm:$0xff]  }
  0x11   :  { %1147 = vmatpush3.bf16.msra.mxu1 %v1269_v15  ;;  %1120 = vmatprep.subr.bf16.mxu0 %v1270_v16  ;;  %v1299_v43 = vld [vmem:[%s1659_s1 + $0x1b0] sm:$0xff]   ;;  %v1302_v46 = vld [vmem:[%s1659_s1 + $0x1e8] sm:$0xff]   ;;  %v1306_v50 = vld [vmem:[%s1659_s1 + $0x1e0] sm:$0xff]  }
  0x12   :  { %1148 = vmatprep.subr.bf16.mxu1 %v1271_v17  ;;  %v1303_v47 = vld [vmem:[%s1659_s1 + $0x1a8] sm:$0xff]   ;;  %v1307_v51 = vld [vmem:[%s1659_s1 + $0x1a0] sm:$0xff]   ;;  %v1309_v53 = vld [vmem:[%s1659_s1 + $0x118] sm:$0xff]  }
  0x13   :  { %v1310_v54 = vld [vmem:[%s1660_s0 + $0x4c] ss:$36 sps:$4 sm:$0xff]   ;;  %v1312_v55 = vld [vmem:[%s1660_s0 + $0x54] ss:$36 sps:$4 sm:$0xff]   ;;  %v1326_v4 = vld [vmem:[%s1659_s1 + $0x140] sm:$0xff]  }
  0x14   :  { %1121 = vmatpush3.bf16.msra.mxu0 %v1272_v18  ;;  %v1314_v56 = vld [vmem:[%s1659_s1 + $0x1d8] sm:$0xff]   ;;  %v1315_v57 = vld [vmem:[%s1660_s0 + $0x48] ss:$36 sps:$4 sm:$0xff]   ;;  %v1316_v58 = vld [vmem:[%s1660_s0 + $0x50] ss:$36 sps:$4 sm:$0xff]  }
  0x15   :  { %1149 = vmatpush3.bf16.msra.mxu1 %v1273_v19  ;;  %1122 = vmatprep.subr.bf16.mxu0 %v1274_v20  ;;  %v1317_v59 = vld [vmem:[%s1659_s1 + $0x198] sm:$0xff]   ;;  %v1318_v60 = vld [vmem:[%s1659_s1 + $0x150] sm:$0xff]   ;;  %v1322_v0 = vld [vmem:[%s1659_s1 + $0x148] sm:$0xff]  }
  0x16   :  { %1150 = vmatprep.subr.bf16.mxu1 %v1275_v21  ;;  %v1319_v61 = vld [vmem:[%s1659_s1 + $0x110] sm:$0xff]   ;;  %v1323_v1 = vld [vmem:[%s1659_s1 + $0x108] sm:$0xff]   ;;  %v1327_v5 = vld [vmem:[%s1659_s1 + $0x100] sm:$0xff]  }
  0x17   :  { %v1320_v62 = vld [vmem:[%s1659_s1 + $0x1d0] sm:$0xff]   ;;  %v1324_v2 = vld [vmem:[%s1659_s1 + $0x1c8] sm:$0xff]   ;;  %v1328_v6 = vld [vmem:[%s1659_s1 + $0x1c0] sm:$0xff]  }
  0x18   :  { %1123 = vmatpush3.bf16.msra.mxu0 %v1276_v22  ;;  %v1321_v63 = vld [vmem:[%s1659_s1 + $0x190] sm:$0xff]   ;;  %v1325_v3 = vld [vmem:[%s1659_s1 + $0x188] sm:$0xff]   ;;  %v1332_v9 = vld [vmem:[%s1659_s1 + $0x180] sm:$0xff]  }
  0x19   :  { %1151 = vmatpush3.bf16.msra.mxu1 %v1277_v23  ;;  %1124 = vmatprep.subr.bf16.mxu0 %v1278_v24  ;;  %v1329_v7 = vld [vmem:[%s1660_s0 + $0x10] ss:$36 sps:$4 sm:$0xff]   ;;  %v1333_v10 = vld [vmem:[%s1659_s1 + $0x238] sm:$0xff]   ;;  %v1341_v16 = vld [vmem:[%s1659_s1 + $0x228] sm:$0xff]  }
  0x1a   :  { %1152 = vmatprep.subr.bf16.mxu1 %v1279_v25  ;;  %v1331_v8 = vld [vmem:[%s1660_s0 + $0x14] ss:$36 sps:$4 sm:$0xff]   ;;  %v1336_v12 = vld [vmem:[%s1660_s0 + $0x1c] ss:$36 sps:$4 sm:$0xff]   ;;  %v1342_v17 = vld [vmem:[%s1660_s0 + $0x64] ss:$36 sps:$4 sm:$0xff]  }
  0x1b   :  { %v1334_v11 = vld [vmem:[%s1660_s0 + $0x18] ss:$36 sps:$4 sm:$0xff]   ;;  %v1337_v13 = vld [vmem:[%s1659_s1 + $0x230] sm:$0xff]   ;;  %v1344_v18 = vld [vmem:[%s1660_s0 + $0x60] ss:$36 sps:$4 sm:$0xff]  }
  0x1c   :  { %1125 = vmatpush3.bf16.msra.mxu0 %v1280_v26  ;;  %v1338_v14 = vld [vmem:[%s1660_s0 + $0x5c] ss:$36 sps:$4 sm:$0xff]   ;;  %v1347_v22 = vld [vmem:[%s1659_s1 + $0x210] sm:$0xff]   ;;  %v1348_v23 = vld [vmem:[%s1659_s1 + $0x208] sm:$0xff]  }
  0x1d   :  { %1153 = vmatpush3.bf16.msra.mxu1 %v1281_v27  ;;  %1126 = vmatprep.subr.bf16.mxu0 %v1282_v28  ;;  %v1340_v15 = vld [vmem:[%s1660_s0 + $0x58] ss:$36 sps:$4 sm:$0xff]   ;;  %v1345_v19 = vld [vmem:[%s1659_s1 + $0x220] sm:$0xff]   ;;  %v1351_v25 = vld [vmem:[%s1660_s0 + $0x68] ss:$36 sps:$4 sm:$0xff]  }
  0x1e   :  { %1154 = vmatprep.subr.bf16.mxu1 %v1283_v29  ;;  %v1346_v20 = vld [vmem:[%s1659_s1 + $0x218] sm:$0xff]   ;;  %v1350_v21 = vld [vmem:[%s1660_s0 + $0x20] ss:$36 sps:$4 sm:$0xff]  }
  0x1f   :  { %v1349_v24 = vld [vmem:[%s1659_s1 + $0x200] sm:$0xff]  }
  0x20   :  { %1127 = vmatpush3.bf16.msra.mxu0 %v1284_v30 }
  0x21   :  { %1155 = vmatpush3.bf16.msra.mxu1 %v1285_v31  ;;  %1168 = vmatprep.subr.bf16.mxu0 %v1292_v36 }
  0x22   :  { %1196 = vmatprep.subr.bf16.mxu1 %v1294_v38 }
  0x23   :  { %739 = vmatmul.mubr.bf16.vlgmr.msra.gmra.mxu0 %v1286_v32 }
  0x24   :  { %788 = vmatmul.mubr.bf16.vlgmr.msra.gmra.mxu1 %v1289_v34  ;;  %1169 = vmatpush3.bf16.msra.mxu0 %v1293_v37 }
  0x25   :  { %1197 = vmatpush3.bf16.msra.mxu1 %v1295_v39  ;;  %1170 = vmatprep.subr.bf16.mxu0 %v1296_v40 }
  0x26   :  { %1198 = vmatprep.subr.bf16.mxu1 %v1298_v42  ;;  %746 = vmatprep.mubr.bf16.mxu0 %v1310_v54 }
  0x27   :  { %795 = vmatprep.mubr.bf16.mxu1 %v1312_v55 }
  0x28   :  { %1171 = vmatpush3.bf16.msra.mxu0 %v1297_v41 }
  0x29   :  { %1199 = vmatpush3.bf16.msra.mxu1 %v1299_v43  ;;  %1172 = vmatprep.subr.bf16.mxu0 %v1300_v44 }
  0x2a   :  { %1200 = vmatprep.subr.bf16.mxu1 %v1302_v46 }
  0x2b   :  { %747 = vmatmul.mubr.bf16.gmra.mxu0 %v1315_v57 }
  0x2c   :  { %1173 = vmatpush3.bf16.msra.mxu0 %v1301_v45  ;;  %796 = vmatmul.mubr.bf16.gmra.mxu1 %v1316_v58 }
  0x2d   :  { %1201 = vmatpush3.bf16.msra.mxu1 %v1303_v47  ;;  %1174 = vmatprep.subr.bf16.mxu0 %v1304_v48 }
  0x2e   :  { %1202 = vmatprep.subr.bf16.mxu1 %v1306_v50  ;;  %836 = vmatprep.mubr.bf16.mxu0 %v1331_v8 }
  0x2f   :  { %885 = vmatprep.mubr.bf16.mxu1 %v1336_v12 }
  0x30   :  { %1175 = vmatpush3.bf16.msra.mxu0 %v1305_v49 }
  0x31   :  { %1203 = vmatpush3.bf16.msra.mxu1 %v1307_v51  ;;  %1176 = vmatprep.subr.bf16.mxu0 %v1308_v52 }
  0x32   :  { %1204 = vmatprep.subr.bf16.mxu1 %v1314_v56 }
  0x34   :  { %1177 = vmatpush3.bf16.msra.mxu0 %v1309_v53 }
  0x35   :  { %1205 = vmatpush3.bf16.msra.mxu1 %v1317_v59  ;;  %1178 = vmatprep.subr.bf16.mxu0 %v1318_v60 }
  0x36   :  { %1206 = vmatprep.subr.bf16.mxu1 %v1320_v62 }
  0x38   :  { %1179 = vmatpush3.bf16.msra.mxu0 %v1319_v61 }
  0x39   :  { %1207 = vmatpush3.bf16.msra.mxu1 %v1321_v63  ;;  %1180 = vmatprep.subr.bf16.mxu0 %v1322_v0 }
  0x3a   :  { %1208 = vmatprep.subr.bf16.mxu1 %v1324_v2 }
  0x3c   :  { %1181 = vmatpush3.bf16.msra.mxu0 %v1323_v1 }
  0x3d   :  { %1209 = vmatpush3.bf16.msra.mxu1 %v1325_v3  ;;  %1182 = vmatprep.subr.bf16.mxu0 %v1326_v4 }
  0x3e   :  { %1210 = vmatprep.subr.bf16.mxu1 %v1328_v6 }
  0x40   :  { %1183 = vmatpush3.bf16.msra.mxu0 %v1327_v5 }
  0x41   :  { %1211 = vmatpush3.bf16.msra.mxu1 %v1332_v9  ;;  %1234 = vmatprep.subr.bf16.mxu0 %v1333_v10 }
  0x43   :  { %837 = vmatmul.mubr.bf16.vlgmr.msra.gmra.mxu0 %v1329_v7 }
  0x44   :  { %1235 = vmatpush3.bf16.msra.mxu0 %v1333_v10  ;;  %886 = vmatmul.mubr.bf16.vlgmr.msra.gmra.mxu1 %v1334_v11 }
  0x45   :  { %1236 = vmatprep.subr.bf16.mxu0 %v1337_v13  ;;  %844 = vmatprep.mubr.bf16.mxu0 %v1338_v14 }
  0x46   :  { %893 = vmatprep.mubr.bf16.mxu1 %v1342_v17 }
  0x48   :  { %1237 = vmatpush3.bf16.msra.mxu0 %v1337_v13 }
  0x49   :  { %1238 = vmatprep.subr.bf16.mxu0 %v1341_v16 }
  0x4b   :  { %845 = vmatmul.mubr.bf16.gmra.mxu0 %v1340_v15 }
  0x4c   :  { %1239 = vmatpush3.bf16.msra.mxu0 %v1341_v16  ;;  %894 = vmatmul.mubr.bf16.gmra.mxu1 %v1344_v18  ;;  %v1091_v18 = vld [vmem:[%s1661_s2] ss:$0 sm:$0xff] }
  0x4d   :  { %1240 = vmatprep.subr.bf16.mxu0 %v1345_v19  ;;  %1250 = vmatprep.mubr.bf16.mxu0 %v1350_v21 }
  0x50   :  { %1241 = vmatpush3.bf16.msra.mxu0 %v1345_v19 }
  0x51   :  { %1242 = vmatprep.subr.bf16.mxu0 %v1346_v20 }
  0x54   :  { %1243 = vmatpush3.bf16.msra.mxu0 %v1346_v20 }
  0x55   :  { %1244 = vmatprep.subr.bf16.mxu0 %v1347_v22 }
  0x58   :  { %1245 = vmatpush3.bf16.msra.mxu0 %v1347_v22 }
  0x59   :  { %1246 = vmatprep.subr.bf16.mxu0 %v1348_v23 }
  0x5c   :  { %1247 = vmatpush3.bf16.msra.mxu0 %v1348_v23 }
  0x5d   :  { %1248 = vmatprep.subr.bf16.mxu0 %v1349_v24 }
  0x60   :  { %1249 = vmatpush3.bf16.msra.mxu0 %v1349_v24 }
  0x63   :  { %1251 = vmatmul.mubr.bf16.vlgmr.msra.gmra.mxu0 %v1351_v25 }
  0xe3   :  { %v1128_v26 = vpop.f32.mrf.mxu0 }
  0xe4   :  { %v1156_v27 = vpop.f32.mrf.mxu1 }
  0xe5   :  { %v1129_v28 = vpop.f32.mrf.mxu0 }
  0xe6   :  { %v1157_v29 = vpop.f32.mrf.mxu1  ;;  %v1130_v57 = vadd.f32 %v1129_v28, %v1128_v26 }
  0xe7   :  { %v1131_v30 = vpop.f32.mrf.mxu0  ;;  %v1158_v58 = vadd.f32 %v1157_v29, %v1156_v27  ;;  %v1092_v27 = vld [vmem:[%s1662_s3] ss:$0 sm:$0xff] }
  0xe8   :  { %v1159_v31 = vpop.f32.mrf.mxu1 }
  0xe9   :  { %v1132_v32 = vpop.f32.mrf.mxu0  ;;  %v790_v2 = vadd.f32 %v1158_v58, %v1130_v57 }
  0xea   :  { %v1160_v34 = vpop.f32.mrf.mxu1  ;;  %v1133_v3 = vadd.f32 %v1132_v32, %v1131_v30 }
  0xeb   :  { %v1134_v33 = vpop.f32.mrf.mxu0  ;;  %v1161_v4 = vadd.f32 %v1160_v34, %v1159_v31 }
  0xec   :  { %v1162_v35 = vpop.f32.mrf.mxu1 }
  0xed   :  { %v1135_v36 = vpop.f32.mrf.mxu0  ;;  %v793_v13 = vadd.f32 %v1161_v4, %v1133_v3 }
  0xee   :  { %v1163_v37 = vpop.f32.mrf.mxu1  ;;  %v1136_v55 = vadd.f32 %v1135_v36, %v1134_v33 }
  0xef   :  { %v1137_v38 = vpop.f32.mrf.mxu0  ;;  %v1164_v56 = vadd.f32 %v1163_v37, %v1162_v35 }
  0xf0   :  { %v1165_v39 = vpop.f32.mrf.mxu1 }
  0xf1   :  { %v1138_v40 = vpop.f32.mrf.mxu0  ;;  %v798_v62 = vadd.f32 %v1164_v56, %v1136_v55 }
  0xf2   :  { %v1166_v42 = vpop.f32.mrf.mxu1  ;;  %v1139_v63 = vadd.f32 %v1138_v40, %v1137_v38 }
  0xf3   :  { %v1167_v0 = vadd.f32 %v1166_v42, %v1165_v39 }
  0xf5   :  { %v801_v9 = vadd.f32 %v1167_v0, %v1139_v63 }
 0x103   :  { %v1184_v41 = vpop.f32.mrf.mxu0 }
 0x104   :  { %v1212_v44 = vpop.f32.mrf.mxu1 }
 0x105   :  { %v1185_v43 = vpop.f32.mrf.mxu0 }
 0x106   :  { %v1213_v46 = vpop.f32.mrf.mxu1  ;;  %v1186_v1 = vadd.f32 %v1185_v43, %v1184_v41 }
 0x107   :  { %v1187_v45 = vpop.f32.mrf.mxu0  ;;  %v1214_v11 = vadd.f32 %v1213_v46, %v1212_v44 }
 0x108   :  { %v1215_v48 = vpop.f32.mrf.mxu1  ;;  %v839_v10 = vadd.f32 %v1186_v1, %v790_v2 }
 0x109   :  { %v1188_v47 = vpop.f32.mrf.mxu0 }
 0x10a   :  { %v1216_v50 = vpop.f32.mrf.mxu1  ;;  %v1189_v12 = vadd.f32 %v1188_v47, %v1187_v45  ;;  %v888_v22 = vadd.f32 %v1214_v11, %v839_v10 }
 0x10b   :  { %v1190_v49 = vpop.f32.mrf.mxu0  ;;  %v1217_v20 = vadd.f32 %v1216_v50, %v1215_v48 }
 0x10c   :  { %v1218_v52 = vpop.f32.mrf.mxu1  ;;  %v842_v19 = vadd.f32 %v1189_v12, %v793_v13 }
 0x10d   :  { %v1191_v51 = vpop.f32.mrf.mxu0 }
 0x10e   :  { %v1219_v54 = vpop.f32.mrf.mxu1  ;;  %v1192_v59 = vadd.f32 %v1191_v51, %v1190_v49  ;;  %v891_v31 = vadd.f32 %v1217_v20, %v842_v19 }
 0x10f   :  { %v1193_v53 = vpop.f32.mrf.mxu0  ;;  %v1220_v6 = vadd.f32 %v1219_v54, %v1218_v52 }
 0x110   :  { %v1221_v61 = vpop.f32.mrf.mxu1  ;;  %v847_v5 = vadd.f32 %v1192_v59, %v798_v62 }
 0x111   :  { %v1194_v60 = vpop.f32.mrf.mxu0 }
 0x112   :  { %v1195_v7 = vadd.f32 %v1194_v60, %v1193_v53  ;;  %v1222_v8 = vpop.f32.mrf.mxu1  ;;  %v896_v16 = vadd.f32 %v1220_v6, %v847_v5 }
 0x113   :  { %v1223_v15 = vadd.f32 %v1222_v8, %v1221_v61 }
 0x114   :  { %v850_v14 = vadd.f32 %v1195_v7, %v801_v9 }
 0x116   :  { %v899_v26 = vadd.f32 %v1223_v15, %v850_v14 }
 0x123   :  { %v1252_v17 = vpop.f32.mrf.mxu0 }
 0x124   :  { %v945_v21 = vadd.f32 %v1252_v17, %v896_v16 }
 0x125   :  { %v936_v23 = vpop.f32.mrf.mxu0 }
 0x126   :  { %v960_v24 = vmul.f32 %v1091_v18, %v945_v21  ;;  %v937_v25 = vadd.f32 %v936_v23, %v888_v22 }
 0x127   :  { %v1253_v28 = vpop.f32.mrf.mxu0 }
 0x128   :  { %v958_v29 = vmul.f32 %v1091_v18, %v937_v25  ;;  %v948_v30 = vadd.f32 %v1253_v28, %v899_v26  ;;  %v971_v33 = vadd.f32 %v1092_v27, %v960_v24 }
 0x129   :  { %v939_v32 = vpop.f32.mrf.mxu0 }
 0x12a   :  { %v961_v34 = vmul.f32 %v1091_v18, %v948_v30  ;;  %v940_v35 = vadd.f32 %v939_v32, %v891_v31  ;;  %v969_v36 = vadd.f32 %v1092_v27, %v958_v29  ;;  %v975_v39 = vmax.f32 %v971_v33, 0.0 }
 0x12c   :  { %v972_v37 = vadd.f32 %v1092_v27, %v961_v34  ;;  %v959_v38 = vmul.f32 %v1091_v18, %v940_v35  ;;  %v973_v42 = vmax.f32 %v969_v36, 0.0 }
 0x12e   :  { %v976_v40 = vmax.f32 %v972_v37, 0.0  ;;  %v970_v41 = vadd.f32 %v1092_v27, %v959_v38 }
 0x130   :  { %v1109_v43 = vpack.c.bf16 %v976_v40, %v975_v39  ;;  %v974_v44 = vmax.f32 %v970_v41, 0.0 }
 0x132   :  { %1111 = vst [vmem:[%s1663_s4 + $0x8] sm:$0xff] %v1109_v43   ;;  %v1104_v45 = vpack.c.bf16 %v974_v44, %v973_v42 }
 0x134   :  { %1105 = vst [vmem:[%s1663_s4] sm:$0xff] %v1104_v45  }

// kernel: resnet_simple_forward.19
= control target key start
LH: loop header
LB: loop body
LE: loop exit
PB: predicated region body
PF: predicated region fallthrough
CT: control target
= control target key end

     0   :  { %s331_s1 = inlined_call_operand.vmem [shape: bf16[128,128], index: 1, kind: input, shape index: {}]   ;;  %s332_s0 = inlined_call_operand.vmem [shape: bf16[32,128], index: 0, kind: input, shape index: {}]   ;;  %s333_s2 = inlined_call_operand.vmem [shape: f32[1,128], index: 2, kind: input, shape index: {}]   ;;  %s334_s3 = inlined_call_operand.vmem [shape: f32[1,128], index: 3, kind: input, shape index: {}]   ;;  %s335_s4 = inlined_call_operand.vmem [shape: bf16[32,128], index: 4, kind: output, shape index: {}]  }
   0x1   :  { %v254_v0 = vld [vmem:[%s331_s1 + $0x38] sm:$0xff]   ;;  %v255_v1 = vld [vmem:[%s331_s1 + $0x30] sm:$0xff]   ;;  %v256_v2 = vld [vmem:[%s331_s1 + $0x28] sm:$0xff]  }
   0x2   :  { %234 = vmatprep.subr.bf16.mxu0 %v254_v0  ;;  %v257_v3 = vld [vmem:[%s331_s1 + $0x20] sm:$0xff]   ;;  %v258_v5 = vld [vmem:[%s331_s1 + $0x18] sm:$0xff]   ;;  %v259_v6 = vld [vmem:[%s331_s1 + $0x10] sm:$0xff]  }
   0x3   :  { %235 = vmatpush3.bf16.msra.mxu0 %v254_v0  ;;  %v262_v4 = vld [vmem:[%s332_s0] sm:$0xff]   ;;  %v260_v7 = vld [vmem:[%s331_s1 + $0x8] sm:$0xff]  }
   0x4   :  { %236 = vmatprep.subr.bf16.mxu0 %v255_v1  ;;  %250 = vmatprep.mubr.bf16.mxu0 %v262_v4  ;;  %v261_v8 = vld [vmem:[%s331_s1] sm:$0xff]   ;;  %v263_v9 = vld [vmem:[%s332_s0 + $0x8] sm:$0xff]  }
   0x5   :  { %v203_v11 = vld [vmem:[%s333_s2] ss:$0 sm:$0xff] }
   0x6   :  { %v204_v14 = vld [vmem:[%s334_s3] ss:$0 sm:$0xff] }
   0x7   :  { %237 = vmatpush3.bf16.msra.mxu0 %v255_v1 }
   0x8   :  { %238 = vmatprep.subr.bf16.mxu0 %v256_v2 }
   0xb   :  { %239 = vmatpush3.bf16.msra.mxu0 %v256_v2 }
   0xc   :  { %240 = vmatprep.subr.bf16.mxu0 %v257_v3 }
   0xf   :  { %241 = vmatpush3.bf16.msra.mxu0 %v257_v3 }
  0x10   :  { %242 = vmatprep.subr.bf16.mxu0 %v258_v5 }
  0x13   :  { %243 = vmatpush3.bf16.msra.mxu0 %v258_v5 }
  0x14   :  { %244 = vmatprep.subr.bf16.mxu0 %v259_v6 }
  0x17   :  { %245 = vmatpush3.bf16.msra.mxu0 %v259_v6 }
  0x18   :  { %246 = vmatprep.subr.bf16.mxu0 %v260_v7 }
  0x1b   :  { %247 = vmatpush3.bf16.msra.mxu0 %v260_v7 }
  0x1c   :  { %248 = vmatprep.subr.bf16.mxu0 %v261_v8 }
  0x1f   :  { %249 = vmatpush3.bf16.msra.mxu0 %v261_v8 }
  0x22   :  { %251 = vmatmul.mubr.bf16.vlgmr.msra.gmra.mxu0 %v263_v9 }
  0xe2   :  { %v252_v10 = vpop.f32.mrf.mxu0 }
  0xe3   :  { %v156_v13 = vmul.f32 %v252_v10, %v203_v11 }
  0xe4   :  { %v132_v12 = vpop.f32.mrf.mxu0 }
  0xe5   :  { %v154_v16 = vmul.f32 %v203_v11, %v132_v12  ;;  %v167_v19 = vadd.f32 %v204_v14, %v156_v13 }
  0xe6   :  { %v253_v15 = vpop.f32.mrf.mxu0 }
  0xe7   :  { %v157_v17 = vmul.f32 %v253_v15, %v203_v11  ;;  %v165_v22 = vadd.f32 %v204_v14, %v154_v16 }
  0xe8   :  { %v135_v18 = vpop.f32.mrf.mxu0 }
  0xe9   :  { %v168_v20 = vadd.f32 %v204_v14, %v157_v17  ;;  %v155_v21 = vmul.f32 %v203_v11, %v135_v18 }
  0xeb   :  { %v221_v23 = vpack.c.bf16 %v168_v20, %v167_v19  ;;  %v166_v24 = vadd.f32 %v204_v14, %v155_v21 }
  0xed   :  { %223 = vst [vmem:[%s335_s4 + $0x8] sm:$0xff] %v221_v23   ;;  %v216_v25 = vpack.c.bf16 %v166_v24, %v165_v22 }
  0xef   :  { %217 = vst [vmem:[%s335_s4] sm:$0xff] %v216_v25  }

// kernel: resnet_simple_forward.20
= control target key start
LH: loop header
LB: loop body
LE: loop exit
PB: predicated region body
PF: predicated region fallthrough
CT: control target
= control target key end

     0   :  { %s1694_s1 = inlined_call_operand.vmem [shape: bf16[1152,128], index: 1, kind: input, shape index: {}]   ;;  %s1695_s0 = inlined_call_operand.vmem [shape: bf16[32,1152], index: 0, kind: input, shape index: {}]   ;;  %s1696_s2 = inlined_call_operand.vmem [shape: f32[1,128], index: 2, kind: input, shape index: {}]   ;;  %s1697_s4 = inlined_call_operand.vmem [shape: bf16[32,128], index: 4, kind: input, shape index: {}]   ;;  %s1698_s3 = inlined_call_operand.vmem [shape: f32[1,128], index: 3, kind: input, shape index: {}]   ;;  %s1699_s5 = inlined_call_operand.vmem [shape: bf16[32,128], index: 5, kind: output, shape index: {}]  }
   0x1   :  { %v1278_v0 = vld [vmem:[%s1694_s1 + $0x78] sm:$0xff]   ;;  %v1282_v4 = vld [vmem:[%s1694_s1 + $0x70] sm:$0xff]   ;;  %v1286_v8 = vld [vmem:[%s1694_s1 + $0x68] sm:$0xff]  }
   0x2   :  { %v1279_v1 = vld [vmem:[%s1694_s1 + $0xf8] sm:$0xff]   ;;  %1136 = vmatprep.subr.bf16.mxu0 %v1278_v0  ;;  %v1283_v5 = vld [vmem:[%s1694_s1 + $0xf0] sm:$0xff]   ;;  %v1287_v9 = vld [vmem:[%s1694_s1 + $0xe8] sm:$0xff]  }
   0x3   :  { %v1280_v2 = vld [vmem:[%s1694_s1 + $0x38] sm:$0xff]   ;;  %1164 = vmatprep.subr.bf16.mxu1 %v1279_v1  ;;  %v1284_v6 = vld [vmem:[%s1694_s1 + $0x30] sm:$0xff]   ;;  %v1288_v10 = vld [vmem:[%s1694_s1 + $0x28] sm:$0xff]  }
   0x4   :  { %v1281_v3 = vld [vmem:[%s1694_s1 + $0xb8] sm:$0xff]   ;;  %1137 = vmatpush3.bf16.msra.mxu0 %v1280_v2  ;;  %v1285_v7 = vld [vmem:[%s1694_s1 + $0xb0] sm:$0xff]   ;;  %v1289_v11 = vld [vmem:[%s1694_s1 + $0xa8] sm:$0xff]  }
   0x5   :  { %1165 = vmatpush3.bf16.msra.mxu1 %v1281_v3  ;;  %1138 = vmatprep.subr.bf16.mxu0 %v1282_v4  ;;  %v1290_v12 = vld [vmem:[%s1694_s1 + $0x60] sm:$0xff]   ;;  %v1294_v16 = vld [vmem:[%s1694_s1 + $0x58] sm:$0xff]   ;;  %v1298_v20 = vld [vmem:[%s1694_s1 + $0x50] sm:$0xff]  }
   0x6   :  { %1166 = vmatprep.subr.bf16.mxu1 %v1283_v5  ;;  %v1291_v13 = vld [vmem:[%s1694_s1 + $0xe0] sm:$0xff]   ;;  %v1295_v17 = vld [vmem:[%s1694_s1 + $0xd8] sm:$0xff]   ;;  %v1299_v21 = vld [vmem:[%s1694_s1 + $0xd0] sm:$0xff]  }
   0x7   :  { %v1292_v14 = vld [vmem:[%s1694_s1 + $0x20] sm:$0xff]   ;;  %v1296_v18 = vld [vmem:[%s1694_s1 + $0x18] sm:$0xff]   ;;  %v1300_v22 = vld [vmem:[%s1694_s1 + $0x10] sm:$0xff]  }
   0x8   :  { %1139 = vmatpush3.bf16.msra.mxu0 %v1284_v6  ;;  %v1293_v15 = vld [vmem:[%s1694_s1 + $0xa0] sm:$0xff]   ;;  %v1297_v19 = vld [vmem:[%s1694_s1 + $0x98] sm:$0xff]   ;;  %v1301_v23 = vld [vmem:[%s1694_s1 + $0x90] sm:$0xff]  }
   0x9   :  { %1167 = vmatpush3.bf16.msra.mxu1 %v1285_v7  ;;  %1140 = vmatprep.subr.bf16.mxu0 %v1286_v8  ;;  %v1302_v24 = vld [vmem:[%s1694_s1 + $0x48] sm:$0xff]   ;;  %v1306_v28 = vld [vmem:[%s1694_s1 + $0x40] sm:$0xff]   ;;  %v1316_v36 = vld [vmem:[%s1694_s1 + $0x178] sm:$0xff]  }
   0xa   :  { %1168 = vmatprep.subr.bf16.mxu1 %v1287_v9  ;;  %v1303_v25 = vld [vmem:[%s1694_s1 + $0xc8] sm:$0xff]   ;;  %v1307_v29 = vld [vmem:[%s1694_s1 + $0xc0] sm:$0xff]   ;;  %v1317_v37 = vld [vmem:[%s1694_s1 + $0x138] sm:$0xff]  }
   0xb   :  { %v1304_v26 = vld [vmem:[%s1694_s1 + $0x8] sm:$0xff]   ;;  %v1308_v30 = vld [vmem:[%s1694_s1] sm:$0xff]   ;;  %v1318_v38 = vld [vmem:[%s1694_s1 + $0x1f8] sm:$0xff]  }
   0xc   :  { %1141 = vmatpush3.bf16.msra.mxu0 %v1288_v10  ;;  %v1305_v27 = vld [vmem:[%s1694_s1 + $0x88] sm:$0xff]   ;;  %v1309_v31 = vld [vmem:[%s1694_s1 + $0x80] sm:$0xff]   ;;  %v1319_v39 = vld [vmem:[%s1694_s1 + $0x1b8] sm:$0xff]  }
   0xd   :  { %1169 = vmatpush3.bf16.msra.mxu1 %v1289_v11  ;;  %1142 = vmatprep.subr.bf16.mxu0 %v1290_v12  ;;  %v1310_v32 = vld [vmem:[%s1695_s0] ss:$36 sps:$4 sm:$0xff]   ;;  %v1313_v34 = vld [vmem:[%s1695_s0 + $0x8] ss:$36 sps:$4 sm:$0xff]   ;;  %v1320_v40 = vld [vmem:[%s1694_s1 + $0x170] sm:$0xff]  }
   0xe   :  { %1170 = vmatprep.subr.bf16.mxu1 %v1291_v13  ;;  %v1312_v33 = vld [vmem:[%s1695_s0 + $0x4] ss:$36 sps:$4 sm:$0xff]   ;;  %v1315_v35 = vld [vmem:[%s1695_s0 + $0xc] ss:$36 sps:$4 sm:$0xff]   ;;  %v1332_v52 = vld [vmem:[%s1694_s1 + $0x158] sm:$0xff]  }
   0xf   :  { %741 = vmatprep.mubr.bf16.mxu0 %v1312_v33  ;;  %790 = vmatprep.mubr.bf16.mxu1 %v1315_v35  ;;  %v1321_v41 = vld [vmem:[%s1694_s1 + $0x130] sm:$0xff]   ;;  %v1324_v44 = vld [vmem:[%s1694_s1 + $0x168] sm:$0xff]   ;;  %v1328_v48 = vld [vmem:[%s1694_s1 + $0x160] sm:$0xff]  }
  0x10   :  { %1143 = vmatpush3.bf16.msra.mxu0 %v1292_v14  ;;  %v1322_v42 = vld [vmem:[%s1694_s1 + $0x1f0] sm:$0xff]   ;;  %v1325_v45 = vld [vmem:[%s1694_s1 + $0x128] sm:$0xff]   ;;  %v1329_v49 = vld [vmem:[%s1694_s1 + $0x120] sm:$0xff]  }
  0x11   :  { %1171 = vmatpush3.bf16.msra.mxu1 %v1293_v15  ;;  %1144 = vmatprep.subr.bf16.mxu0 %v1294_v16  ;;  %v1323_v43 = vld [vmem:[%s1694_s1 + $0x1b0] sm:$0xff]   ;;  %v1326_v46 = vld [vmem:[%s1694_s1 + $0x1e8] sm:$0xff]   ;;  %v1330_v50 = vld [vmem:[%s1694_s1 + $0x1e0] sm:$0xff]  }
  0x12   :  { %1172 = vmatprep.subr.bf16.mxu1 %v1295_v17  ;;  %v1327_v47 = vld [vmem:[%s1694_s1 + $0x1a8] sm:$0xff]   ;;  %v1331_v51 = vld [vmem:[%s1694_s1 + $0x1a0] sm:$0xff]   ;;  %v1333_v53 = vld [vmem:[%s1694_s1 + $0x118] sm:$0xff]  }
  0x13   :  { %v1334_v54 = vld [vmem:[%s1695_s0 + $0x4c] ss:$36 sps:$4 sm:$0xff]   ;;  %v1336_v55 = vld [vmem:[%s1695_s0 + $0x54] ss:$36 sps:$4 sm:$0xff]   ;;  %v1350_v4 = vld [vmem:[%s1694_s1 + $0x140] sm:$0xff]  }
  0x14   :  { %1145 = vmatpush3.bf16.msra.mxu0 %v1296_v18  ;;  %v1338_v56 = vld [vmem:[%s1694_s1 + $0x1d8] sm:$0xff]   ;;  %v1339_v57 = vld [vmem:[%s1695_s0 + $0x48] ss:$36 sps:$4 sm:$0xff]   ;;  %v1340_v58 = vld [vmem:[%s1695_s0 + $0x50] ss:$36 sps:$4 sm:$0xff]  }
  0x15   :  { %1173 = vmatpush3.bf16.msra.mxu1 %v1297_v19  ;;  %1146 = vmatprep.subr.bf16.mxu0 %v1298_v20  ;;  %v1341_v59 = vld [vmem:[%s1694_s1 + $0x198] sm:$0xff]   ;;  %v1342_v60 = vld [vmem:[%s1694_s1 + $0x150] sm:$0xff]   ;;  %v1346_v0 = vld [vmem:[%s1694_s1 + $0x148] sm:$0xff]  }
  0x16   :  { %1174 = vmatprep.subr.bf16.mxu1 %v1299_v21  ;;  %v1343_v61 = vld [vmem:[%s1694_s1 + $0x110] sm:$0xff]   ;;  %v1347_v1 = vld [vmem:[%s1694_s1 + $0x108] sm:$0xff]   ;;  %v1351_v5 = vld [vmem:[%s1694_s1 + $0x100] sm:$0xff]  }
  0x17   :  { %v1344_v62 = vld [vmem:[%s1694_s1 + $0x1d0] sm:$0xff]   ;;  %v1348_v2 = vld [vmem:[%s1694_s1 + $0x1c8] sm:$0xff]   ;;  %v1352_v6 = vld [vmem:[%s1694_s1 + $0x1c0] sm:$0xff]  }
  0x18   :  { %1147 = vmatpush3.bf16.msra.mxu0 %v1300_v22  ;;  %v1345_v63 = vld [vmem:[%s1694_s1 + $0x190] sm:$0xff]   ;;  %v1349_v3 = vld [vmem:[%s1694_s1 + $0x188] sm:$0xff]   ;;  %v1356_v9 = vld [vmem:[%s1694_s1 + $0x180] sm:$0xff]  }
  0x19   :  { %1175 = vmatpush3.bf16.msra.mxu1 %v1301_v23  ;;  %1148 = vmatprep.subr.bf16.mxu0 %v1302_v24  ;;  %v1353_v7 = vld [vmem:[%s1695_s0 + $0x10] ss:$36 sps:$4 sm:$0xff]   ;;  %v1357_v10 = vld [vmem:[%s1694_s1 + $0x238] sm:$0xff]   ;;  %v1365_v16 = vld [vmem:[%s1694_s1 + $0x228] sm:$0xff]  }
  0x1a   :  { %1176 = vmatprep.subr.bf16.mxu1 %v1303_v25  ;;  %v1355_v8 = vld [vmem:[%s1695_s0 + $0x14] ss:$36 sps:$4 sm:$0xff]   ;;  %v1360_v12 = vld [vmem:[%s1695_s0 + $0x1c] ss:$36 sps:$4 sm:$0xff]   ;;  %v1366_v17 = vld [vmem:[%s1695_s0 + $0x64] ss:$36 sps:$4 sm:$0xff]  }
  0x1b   :  { %v1358_v11 = vld [vmem:[%s1695_s0 + $0x18] ss:$36 sps:$4 sm:$0xff]   ;;  %v1361_v13 = vld [vmem:[%s1694_s1 + $0x230] sm:$0xff]   ;;  %v1368_v18 = vld [vmem:[%s1695_s0 + $0x60] ss:$36 sps:$4 sm:$0xff]  }
  0x1c   :  { %1149 = vmatpush3.bf16.msra.mxu0 %v1304_v26  ;;  %v1362_v14 = vld [vmem:[%s1695_s0 + $0x5c] ss:$36 sps:$4 sm:$0xff]   ;;  %v1371_v22 = vld [vmem:[%s1694_s1 + $0x210] sm:$0xff]   ;;  %v1372_v23 = vld [vmem:[%s1694_s1 + $0x208] sm:$0xff]  }
  0x1d   :  { %1177 = vmatpush3.bf16.msra.mxu1 %v1305_v27  ;;  %1150 = vmatprep.subr.bf16.mxu0 %v1306_v28  ;;  %v1364_v15 = vld [vmem:[%s1695_s0 + $0x58] ss:$36 sps:$4 sm:$0xff]   ;;  %v1369_v19 = vld [vmem:[%s1694_s1 + $0x220] sm:$0xff]   ;;  %v1375_v25 = vld [vmem:[%s1695_s0 + $0x68] ss:$36 sps:$4 sm:$0xff]  }
  0x1e   :  { %1178 = vmatprep.subr.bf16.mxu1 %v1307_v29  ;;  %v1370_v20 = vld [vmem:[%s1694_s1 + $0x218] sm:$0xff]   ;;  %v1374_v21 = vld [vmem:[%s1695_s0 + $0x20] ss:$36 sps:$4 sm:$0xff]  }
  0x1f   :  { %v1373_v24 = vld [vmem:[%s1694_s1 + $0x200] sm:$0xff]  }
  0x20   :  { %1151 = vmatpush3.bf16.msra.mxu0 %v1308_v30 }
  0x21   :  { %1179 = vmatpush3.bf16.msra.mxu1 %v1309_v31  ;;  %1192 = vmatprep.subr.bf16.mxu0 %v1316_v36 }
  0x22   :  { %1220 = vmatprep.subr.bf16.mxu1 %v1318_v38 }
  0x23   :  { %742 = vmatmul.mubr.bf16.vlgmr.msra.gmra.mxu0 %v1310_v32 }
  0x24   :  { %791 = vmatmul.mubr.bf16.vlgmr.msra.gmra.mxu1 %v1313_v34  ;;  %1193 = vmatpush3.bf16.msra.mxu0 %v1317_v37 }
  0x25   :  { %1221 = vmatpush3.bf16.msra.mxu1 %v1319_v39  ;;  %1194 = vmatprep.subr.bf16.mxu0 %v1320_v40 }
  0x26   :  { %1222 = vmatprep.subr.bf16.mxu1 %v1322_v42  ;;  %749 = vmatprep.mubr.bf16.mxu0 %v1334_v54 }
  0x27   :  { %798 = vmatprep.mubr.bf16.mxu1 %v1336_v55 }
  0x28   :  { %1195 = vmatpush3.bf16.msra.mxu0 %v1321_v41 }
  0x29   :  { %1223 = vmatpush3.bf16.msra.mxu1 %v1323_v43  ;;  %1196 = vmatprep.subr.bf16.mxu0 %v1324_v44 }
  0x2a   :  { %1224 = vmatprep.subr.bf16.mxu1 %v1326_v46 }
  0x2b   :  { %750 = vmatmul.mubr.bf16.gmra.mxu0 %v1339_v57 }
  0x2c   :  { %1197 = vmatpush3.bf16.msra.mxu0 %v1325_v45  ;;  %799 = vmatmul.mubr.bf16.gmra.mxu1 %v1340_v58 }
  0x2d   :  { %1225 = vmatpush3.bf16.msra.mxu1 %v1327_v47  ;;  %1198 = vmatprep.subr.bf16.mxu0 %v1328_v48 }
  0x2e   :  { %1226 = vmatprep.subr.bf16.mxu1 %v1330_v50  ;;  %839 = vmatprep.mubr.bf16.mxu0 %v1355_v8 }
  0x2f   :  { %888 = vmatprep.mubr.bf16.mxu1 %v1360_v12 }
  0x30   :  { %1199 = vmatpush3.bf16.msra.mxu0 %v1329_v49 }
  0x31   :  { %1227 = vmatpush3.bf16.msra.mxu1 %v1331_v51  ;;  %1200 = vmatprep.subr.bf16.mxu0 %v1332_v52 }
  0x32   :  { %1228 = vmatprep.subr.bf16.mxu1 %v1338_v56 }
  0x34   :  { %1201 = vmatpush3.bf16.msra.mxu0 %v1333_v53 }
  0x35   :  { %1229 = vmatpush3.bf16.msra.mxu1 %v1341_v59  ;;  %1202 = vmatprep.subr.bf16.mxu0 %v1342_v60 }
  0x36   :  { %1230 = vmatprep.subr.bf16.mxu1 %v1344_v62 }
  0x38   :  { %1203 = vmatpush3.bf16.msra.mxu0 %v1343_v61 }
  0x39   :  { %1231 = vmatpush3.bf16.msra.mxu1 %v1345_v63  ;;  %1204 = vmatprep.subr.bf16.mxu0 %v1346_v0 }
  0x3a   :  { %1232 = vmatprep.subr.bf16.mxu1 %v1348_v2 }
  0x3c   :  { %1205 = vmatpush3.bf16.msra.mxu0 %v1347_v1 }
  0x3d   :  { %1233 = vmatpush3.bf16.msra.mxu1 %v1349_v3  ;;  %1206 = vmatprep.subr.bf16.mxu0 %v1350_v4 }
  0x3e   :  { %1234 = vmatprep.subr.bf16.mxu1 %v1352_v6 }
  0x40   :  { %1207 = vmatpush3.bf16.msra.mxu0 %v1351_v5 }
  0x41   :  { %1235 = vmatpush3.bf16.msra.mxu1 %v1356_v9  ;;  %1258 = vmatprep.subr.bf16.mxu0 %v1357_v10 }
  0x43   :  { %840 = vmatmul.mubr.bf16.vlgmr.msra.gmra.mxu0 %v1353_v7 }
  0x44   :  { %1259 = vmatpush3.bf16.msra.mxu0 %v1357_v10  ;;  %889 = vmatmul.mubr.bf16.vlgmr.msra.gmra.mxu1 %v1358_v11 }
  0x45   :  { %1260 = vmatprep.subr.bf16.mxu0 %v1361_v13  ;;  %847 = vmatprep.mubr.bf16.mxu0 %v1362_v14 }
  0x46   :  { %896 = vmatprep.mubr.bf16.mxu1 %v1366_v17 }
  0x48   :  { %1261 = vmatpush3.bf16.msra.mxu0 %v1361_v13 }
  0x49   :  { %1262 = vmatprep.subr.bf16.mxu0 %v1365_v16 }
  0x4b   :  { %848 = vmatmul.mubr.bf16.gmra.mxu0 %v1364_v15 }
  0x4c   :  { %1263 = vmatpush3.bf16.msra.mxu0 %v1365_v16  ;;  %897 = vmatmul.mubr.bf16.gmra.mxu1 %v1368_v18  ;;  %v1106_v18 = vld [vmem:[%s1696_s2] ss:$0 sm:$0xff] }
  0x4d   :  { %1264 = vmatprep.subr.bf16.mxu0 %v1369_v19  ;;  %1274 = vmatprep.mubr.bf16.mxu0 %v1374_v21 }
  0x50   :  { %1265 = vmatpush3.bf16.msra.mxu0 %v1369_v19 }
  0x51   :  { %1266 = vmatprep.subr.bf16.mxu0 %v1370_v20 }
  0x54   :  { %1267 = vmatpush3.bf16.msra.mxu0 %v1370_v20 }
  0x55   :  { %1268 = vmatprep.subr.bf16.mxu0 %v1371_v22 }
  0x58   :  { %1269 = vmatpush3.bf16.msra.mxu0 %v1371_v22  ;;  %v1134_v22 = vld [vmem:[%s1697_s4 + $0x8] sm:$0xff]  }
  0x59   :  { %1270 = vmatprep.subr.bf16.mxu0 %v1372_v23 }
  0x5c   :  { %1271 = vmatpush3.bf16.msra.mxu0 %v1372_v23 }
  0x5d   :  { %1272 = vmatprep.subr.bf16.mxu0 %v1373_v24 }
  0x60   :  { %1273 = vmatpush3.bf16.msra.mxu0 %v1373_v24  ;;  %v1107_v24 = vld [vmem:[%s1698_s3] ss:$0 sm:$0xff] }
  0x63   :  { %1275 = vmatmul.mubr.bf16.vlgmr.msra.gmra.mxu0 %v1375_v25 }
  0xe3   :  { %v1152_v26 = vpop.f32.mrf.mxu0 }
  0xe4   :  { %v1180_v27 = vpop.f32.mrf.mxu1 }
  0xe5   :  { %v1153_v28 = vpop.f32.mrf.mxu0 }
  0xe6   :  { %v1181_v29 = vpop.f32.mrf.mxu1  ;;  %v1154_v57 = vadd.f32 %v1153_v28, %v1152_v26  ;;  %v1117_v28 = vld [vmem:[%s1697_s4] sm:$0xff]  }
  0xe7   :  { %v1155_v30 = vpop.f32.mrf.mxu0  ;;  %v1182_v58 = vadd.f32 %v1181_v29, %v1180_v27 }
  0xe8   :  { %v1183_v31 = vpop.f32.mrf.mxu1 }
  0xe9   :  { %v1156_v32 = vpop.f32.mrf.mxu0  ;;  %v793_v2 = vadd.f32 %v1182_v58, %v1154_v57 }
  0xea   :  { %v1184_v34 = vpop.f32.mrf.mxu1  ;;  %v1157_v3 = vadd.f32 %v1156_v32, %v1155_v30  ;;  %v1122_v30 = vunpack.c.l.bf16 %v1134_v22 }
  0xeb   :  { %v1158_v33 = vpop.f32.mrf.mxu0  ;;  %v1185_v4 = vadd.f32 %v1184_v34, %v1183_v31 }
  0xec   :  { %v1186_v35 = vpop.f32.mrf.mxu1 }
  0xed   :  { %v1159_v36 = vpop.f32.mrf.mxu0  ;;  %v796_v13 = vadd.f32 %v1185_v4, %v1157_v3 }
  0xee   :  { %v1187_v37 = vpop.f32.mrf.mxu1  ;;  %v1160_v55 = vadd.f32 %v1159_v36, %v1158_v33  ;;  %v1118_v36 = vunpack.c.l.bf16 %v1117_v28 }
  0xef   :  { %v1161_v38 = vpop.f32.mrf.mxu0  ;;  %v1188_v56 = vadd.f32 %v1187_v37, %v1186_v35 }
  0xf0   :  { %v1189_v39 = vpop.f32.mrf.mxu1 }
  0xf1   :  { %v1162_v40 = vpop.f32.mrf.mxu0  ;;  %v801_v62 = vadd.f32 %v1188_v56, %v1160_v55 }
  0xf2   :  { %v1190_v42 = vpop.f32.mrf.mxu1  ;;  %v1163_v63 = vadd.f32 %v1162_v40, %v1161_v38  ;;  %v1123_v40 = vunpack.c.h.bf16 %v1134_v22 }
  0xf3   :  { %v1191_v0 = vadd.f32 %v1190_v42, %v1189_v39 }
  0xf5   :  { %v804_v9 = vadd.f32 %v1191_v0, %v1163_v63 }
 0x103   :  { %v1208_v41 = vpop.f32.mrf.mxu0 }
 0x104   :  { %v1236_v44 = vpop.f32.mrf.mxu1 }
 0x105   :  { %v1209_v43 = vpop.f32.mrf.mxu0 }
 0x106   :  { %v1237_v46 = vpop.f32.mrf.mxu1  ;;  %v1210_v1 = vadd.f32 %v1209_v43, %v1208_v41 }
 0x107   :  { %v1211_v45 = vpop.f32.mrf.mxu0  ;;  %v1238_v11 = vadd.f32 %v1237_v46, %v1236_v44 }
 0x108   :  { %v1239_v48 = vpop.f32.mrf.mxu1  ;;  %v842_v10 = vadd.f32 %v1210_v1, %v793_v2 }
 0x109   :  { %v1212_v47 = vpop.f32.mrf.mxu0 }
 0x10a   :  { %v1240_v50 = vpop.f32.mrf.mxu1  ;;  %v1213_v12 = vadd.f32 %v1212_v47, %v1211_v45  ;;  %v891_v23 = vadd.f32 %v1238_v11, %v842_v10  ;;  %v1119_v45 = vunpack.c.h.bf16 %v1117_v28 }
 0x10b   :  { %v1214_v49 = vpop.f32.mrf.mxu0  ;;  %v1241_v20 = vadd.f32 %v1240_v50, %v1239_v48 }
 0x10c   :  { %v1242_v52 = vpop.f32.mrf.mxu1  ;;  %v845_v19 = vadd.f32 %v1213_v12, %v796_v13 }
 0x10d   :  { %v1215_v51 = vpop.f32.mrf.mxu0 }
 0x10e   :  { %v1243_v54 = vpop.f32.mrf.mxu1  ;;  %v1216_v59 = vadd.f32 %v1215_v51, %v1214_v49  ;;  %v894_v35 = vadd.f32 %v1241_v20, %v845_v19 }
 0x10f   :  { %v1217_v53 = vpop.f32.mrf.mxu0  ;;  %v1244_v6 = vadd.f32 %v1243_v54, %v1242_v52 }
 0x110   :  { %v1245_v61 = vpop.f32.mrf.mxu1  ;;  %v850_v5 = vadd.f32 %v1216_v59, %v801_v62 }
 0x111   :  { %v1218_v60 = vpop.f32.mrf.mxu0 }
 0x112   :  { %v1219_v7 = vadd.f32 %v1218_v60, %v1217_v53  ;;  %v1246_v8 = vpop.f32.mrf.mxu1  ;;  %v899_v16 = vadd.f32 %v1244_v6, %v850_v5 }
 0x113   :  { %v1247_v15 = vadd.f32 %v1246_v8, %v1245_v61 }
 0x114   :  { %v853_v14 = vadd.f32 %v1219_v7, %v804_v9 }
 0x116   :  { %v902_v29 = vadd.f32 %v1247_v15, %v853_v14 }
 0x123   :  { %v1276_v17 = vpop.f32.mrf.mxu0 }
 0x124   :  { %v948_v21 = vadd.f32 %v1276_v17, %v899_v16 }
 0x125   :  { %v939_v25 = vpop.f32.mrf.mxu0 }
 0x126   :  { %v963_v26 = vmul.f32 %v1106_v18, %v948_v21  ;;  %v940_v27 = vadd.f32 %v939_v25, %v891_v23 }
 0x127   :  { %v1277_v31 = vpop.f32.mrf.mxu0 }
 0x128   :  { %v974_v32 = vadd.f32 %v1107_v24, %v963_v26  ;;  %v961_v33 = vmul.f32 %v1106_v18, %v940_v27  ;;  %v951_v34 = vadd.f32 %v1277_v31, %v902_v29 }
 0x129   :  { %v942_v37 = vpop.f32.mrf.mxu0 }
 0x12a   :  { %v972_v38 = vadd.f32 %v1107_v24, %v961_v33  ;;  %v964_v39 = vmul.f32 %v1106_v18, %v951_v34  ;;  %v943_v41 = vadd.f32 %v942_v37, %v894_v35  ;;  %v986_v42 = vadd.f32 %v1122_v30, %v974_v32 }
 0x12c   :  { %v975_v43 = vadd.f32 %v1107_v24, %v964_v39  ;;  %v962_v44 = vmul.f32 %v1106_v18, %v943_v41  ;;  %v984_v46 = vadd.f32 %v1118_v36, %v972_v38  ;;  %v990_v49 = vmax.f32 %v986_v42, 0.0 }
 0x12e   :  { %v987_v47 = vadd.f32 %v1123_v40, %v975_v43  ;;  %v973_v48 = vadd.f32 %v1107_v24, %v962_v44  ;;  %v988_v52 = vmax.f32 %v984_v46, 0.0 }
 0x130   :  { %v991_v50 = vmax.f32 %v987_v47, 0.0  ;;  %v985_v51 = vadd.f32 %v1119_v45, %v973_v48 }
 0x132   :  { %v1132_v53 = vpack.c.bf16 %v991_v50, %v990_v49  ;;  %v989_v54 = vmax.f32 %v985_v51, 0.0 }
 0x134   :  { %1135 = vst [vmem:[%s1699_s5 + $0x8] sm:$0xff] %v1132_v53   ;;  %v1127_v55 = vpack.c.bf16 %v989_v54, %v988_v52 }
 0x136   :  { %1128 = vst [vmem:[%s1699_s5] sm:$0xff] %v1127_v55  }

// kernel: resnet_simple_forward.21
= control target key start
LH: loop header
LB: loop body
LE: loop exit
PB: predicated region body
PF: predicated region fallthrough
CT: control target
= control target key end

     0   :  { %vm1138_vm0 = vmmov 0   ;;  %s1404_s1 = inlined_call_operand.vmem [shape: bf16[1152,128], index: 1, kind: input, shape index: {}]   ;;  %s1405_s0 = inlined_call_operand.vmem [shape: bf16[8,1152], index: 0, kind: input, shape index: {}]   ;;  %s1406_s2 = inlined_call_operand.vmem [shape: f32[1,128], index: 2, kind: input, shape index: {}]   ;;  %s1407_s3 = inlined_call_operand.vmem [shape: f32[1,128], index: 3, kind: input, shape index: {}]   ;;  %s1408_s4 = inlined_call_operand.vmem [shape: bf16[8,128], index: 4, kind: output, shape index: {}]  }
   0x1   :  { %v1056_v0 = vld [vmem:[%s1404_s1 + $0x78] sm:$0xff]   ;;  %v1060_v4 = vld [vmem:[%s1404_s1 + $0x70] sm:$0xff]   ;;  %v1064_v8 = vld [vmem:[%s1404_s1 + $0x68] sm:$0xff]  }
   0x2   :  { %v1057_v1 = vld [vmem:[%s1404_s1 + $0xf8] sm:$0xff]   ;;  %937 = vmatprep.subr.bf16.mxu0 %v1056_v0  ;;  %v1061_v5 = vld [vmem:[%s1404_s1 + $0xf0] sm:$0xff]   ;;  %v1065_v9 = vld [vmem:[%s1404_s1 + $0xe8] sm:$0xff]  }
   0x3   :  { %v1058_v2 = vld [vmem:[%s1404_s1 + $0x38] sm:$0xff]   ;;  %959 = vmatprep.subr.bf16.mxu1 %v1057_v1  ;;  %v1062_v6 = vld [vmem:[%s1404_s1 + $0x30] sm:$0xff]   ;;  %v1066_v10 = vld [vmem:[%s1404_s1 + $0x28] sm:$0xff]  }
   0x4   :  { %v1059_v3 = vld [vmem:[%s1404_s1 + $0xb8] sm:$0xff]   ;;  %938 = vmatpush3.bf16.msra.mxu0 %v1058_v2  ;;  %v1063_v7 = vld [vmem:[%s1404_s1 + $0xb0] sm:$0xff]   ;;  %v1067_v11 = vld [vmem:[%s1404_s1 + $0xa8] sm:$0xff]  }
   0x5   :  { %960 = vmatpush3.bf16.msra.mxu1 %v1059_v3  ;;  %939 = vmatprep.subr.bf16.mxu0 %v1060_v4  ;;  %v1068_v12 = vld [vmem:[%s1404_s1 + $0x60] sm:$0xff]   ;;  %v1072_v16 = vld [vmem:[%s1404_s1 + $0x58] sm:$0xff]   ;;  %v1076_v20 = vld [vmem:[%s1404_s1 + $0x50] sm:$0xff]  }
   0x6   :  { %961 = vmatprep.subr.bf16.mxu1 %v1061_v5  ;;  %v1069_v13 = vld [vmem:[%s1404_s1 + $0xe0] sm:$0xff]   ;;  %v1073_v17 = vld [vmem:[%s1404_s1 + $0xd8] sm:$0xff]   ;;  %v1077_v21 = vld [vmem:[%s1404_s1 + $0xd0] sm:$0xff]  }
   0x7   :  { %v1070_v14 = vld [vmem:[%s1404_s1 + $0x20] sm:$0xff]   ;;  %v1074_v18 = vld [vmem:[%s1404_s1 + $0x18] sm:$0xff]   ;;  %v1078_v22 = vld [vmem:[%s1404_s1 + $0x10] sm:$0xff]  }
   0x8   :  { %940 = vmatpush3.bf16.msra.mxu0 %v1062_v6  ;;  %v1071_v15 = vld [vmem:[%s1404_s1 + $0xa0] sm:$0xff]   ;;  %v1075_v19 = vld [vmem:[%s1404_s1 + $0x98] sm:$0xff]   ;;  %v1079_v23 = vld [vmem:[%s1404_s1 + $0x90] sm:$0xff]  }
   0x9   :  { %962 = vmatpush3.bf16.msra.mxu1 %v1063_v7  ;;  %941 = vmatprep.subr.bf16.mxu0 %v1064_v8  ;;  %v1080_v24 = vld [vmem:[%s1404_s1 + $0x48] sm:$0xff]   ;;  %v1084_v28 = vld [vmem:[%s1404_s1 + $0x40] sm:$0xff]   ;;  %v1092_v38 = vld [vmem:[%s1404_s1 + $0x178] sm:$0xff]  }
   0xa   :  { %963 = vmatprep.subr.bf16.mxu1 %v1065_v9  ;;  %v1081_v25 = vld [vmem:[%s1404_s1 + $0xc8] sm:$0xff]   ;;  %v1085_v29 = vld [vmem:[%s1404_s1 + $0xc0] sm:$0xff]   ;;  %v1093_v39 = vld [vmem:[%s1404_s1 + $0x138] sm:$0xff]  }
   0xb   :  { %v1082_v26 = vld [vmem:[%s1404_s1 + $0x8] sm:$0xff]   ;;  %v1086_v30 = vld [vmem:[%s1404_s1] sm:$0xff]   ;;  %v1094_v40 = vld [vmem:[%s1404_s1 + $0x1f8] sm:$0xff]  }
   0xc   :  { %942 = vmatpush3.bf16.msra.mxu0 %v1066_v10  ;;  %v1083_v27 = vld [vmem:[%s1404_s1 + $0x88] sm:$0xff]   ;;  %v1087_v31 = vld [vmem:[%s1404_s1 + $0x80] sm:$0xff]   ;;  %v1095_v41 = vld [vmem:[%s1404_s1 + $0x1b8] sm:$0xff]  }
   0xd   :  { %964 = vmatpush3.bf16.msra.mxu1 %v1067_v11  ;;  %943 = vmatprep.subr.bf16.mxu0 %v1068_v12  ;;  %v18_v32 = vld [vmem:[%s1405_s0] sm:$0xff]  ;;  %v19_v33 = vld [vmem:[%s1405_s0 + $0x8] sm:$0xff]  ;;  %v1096_v42 = vld [vmem:[%s1404_s1 + $0x170] sm:$0xff]  }
   0xe   :  { %965 = vmatprep.subr.bf16.mxu1 %v1069_v13  ;;  %v854_v34 = vcombine.low %v18_v32, %v18_v32  ;;  %v855_v35 = vcombine.high %v18_v32, %v18_v32  ;;  %v856_v36 = vcombine.low %v19_v33, %v19_v33  ;;  %v857_v37 = vcombine.high %v19_v33, %v19_v33  ;;  %v1097_v43 = vld [vmem:[%s1404_s1 + $0x130] sm:$0xff]   ;;  %v1100_v46 = vld [vmem:[%s1404_s1 + $0x168] sm:$0xff]   ;;  %v1104_v50 = vld [vmem:[%s1404_s1 + $0x160] sm:$0xff]  }
   0xf   :  { %v1098_v44 = vld [vmem:[%s1404_s1 + $0x1f0] sm:$0xff]   ;;  %v1101_v47 = vld [vmem:[%s1404_s1 + $0x128] sm:$0xff]   ;;  %v1105_v51 = vld [vmem:[%s1404_s1 + $0x120] sm:$0xff]   ;;  %v1137_v13 = vmov 0.0  }
  0x10   :  { %944 = vmatpush3.bf16.msra.mxu0 %v1070_v14  ;;  %663 = vmatprep.mubr.bf16.mxu0 %v855_v35  ;;  %v1099_v45 = vld [vmem:[%s1404_s1 + $0x1b0] sm:$0xff]   ;;  %v1102_v48 = vld [vmem:[%s1404_s1 + $0x1e8] sm:$0xff]   ;;  %v1106_v52 = vld [vmem:[%s1404_s1 + $0x1e0] sm:$0xff]  }
  0x11   :  { %966 = vmatpush3.bf16.msra.mxu1 %v1071_v15  ;;  %945 = vmatprep.subr.bf16.mxu0 %v1072_v16  ;;  %v1103_v49 = vld [vmem:[%s1404_s1 + $0x1a8] sm:$0xff]   ;;  %v1107_v53 = vld [vmem:[%s1404_s1 + $0x1a0] sm:$0xff]   ;;  %v1108_v54 = vld [vmem:[%s1404_s1 + $0x158] sm:$0xff]  }
  0x12   :  { %967 = vmatprep.subr.bf16.mxu1 %v1073_v17  ;;  %703 = vmatprep.mubr.bf16.mxu1 %v857_v37  ;;  %v1109_v55 = vld [vmem:[%s1404_s1 + $0x118] sm:$0xff]   ;;  %v1112_v58 = vld [vmem:[%s1404_s1 + $0x150] sm:$0xff]   ;;  %v1116_v62 = vld [vmem:[%s1404_s1 + $0x148] sm:$0xff]  }
  0x13   :  { %v1110_v56 = vld [vmem:[%s1404_s1 + $0x1d8] sm:$0xff]   ;;  %v1113_v59 = vld [vmem:[%s1404_s1 + $0x110] sm:$0xff]   ;;  %v1117_v63 = vld [vmem:[%s1404_s1 + $0x108] sm:$0xff]  }
  0x14   :  { %946 = vmatpush3.bf16.msra.mxu0 %v1074_v18  ;;  %v1111_v57 = vld [vmem:[%s1404_s1 + $0x198] sm:$0xff]   ;;  %v1114_v60 = vld [vmem:[%s1404_s1 + $0x1d0] sm:$0xff]   ;;  %v1118_v0 = vld [vmem:[%s1404_s1 + $0x1c8] sm:$0xff]  }
  0x15   :  { %968 = vmatpush3.bf16.msra.mxu1 %v1075_v19  ;;  %947 = vmatprep.subr.bf16.mxu0 %v1076_v20  ;;  %v1115_v61 = vld [vmem:[%s1404_s1 + $0x190] sm:$0xff]   ;;  %v1119_v1 = vld [vmem:[%s1404_s1 + $0x188] sm:$0xff]   ;;  %v1120_v2 = vld [vmem:[%s1404_s1 + $0x140] sm:$0xff]  }
  0x16   :  { %969 = vmatprep.subr.bf16.mxu1 %v1077_v21  ;;  %v1121_v3 = vld [vmem:[%s1404_s1 + $0x100] sm:$0xff]   ;;  %v20_v5 = vld [vmem:[%s1405_s0 + $0x10] sm:$0xff]  ;;  %v21_v9 = vld [vmem:[%s1405_s0 + $0x18] sm:$0xff] }
  0x17   :  { %v1122_v4 = vld [vmem:[%s1404_s1 + $0x1c0] sm:$0xff]   ;;  %v859_v6 = vcombine.high %v20_v5, %v20_v5  ;;  %v858_v8 = vcombine.low %v20_v5, %v20_v5  ;;  %v860_v10 = vcombine.low %v21_v9, %v21_v9  ;;  %v861_v11 = vcombine.high %v21_v9, %v21_v9  ;;  %v1128_v12 = vld [vmem:[%s1404_s1 + $0x238] sm:$0xff]   ;;  %v1129_v14 = vld [vmem:[%s1404_s1 + $0x230] sm:$0xff]  }
  0x18   :  { %948 = vmatpush3.bf16.msra.mxu0 %v1078_v22  ;;  %v1125_v7 = vld [vmem:[%s1404_s1 + $0x180] sm:$0xff]   ;;  %v1130_v15 = vld [vmem:[%s1404_s1 + $0x228] sm:$0xff]   ;;  %v1132_v17 = vld [vmem:[%s1404_s1 + $0x218] sm:$0xff]  }
  0x19   :  { %970 = vmatpush3.bf16.msra.mxu1 %v1079_v23  ;;  %949 = vmatprep.subr.bf16.mxu0 %v1080_v24  ;;  %v1131_v16 = vld [vmem:[%s1404_s1 + $0x220] sm:$0xff]   ;;  %v1133_v18 = vld [vmem:[%s1404_s1 + $0x210] sm:$0xff]   ;;  %v1134_v19 = vld [vmem:[%s1404_s1 + $0x208] sm:$0xff]  }
  0x1a   :  { %971 = vmatprep.subr.bf16.mxu1 %v1081_v25  ;;  %v1135_v20 = vld [vmem:[%s1404_s1 + $0x200] sm:$0xff]  }
  0x1b   :  { %v1136_v21 = vld [vmem:[%s1405_s0 + $0x20] ss:$0 sps:$4 sm:$0xff]  }
  0x1c   :  { %950 = vmatpush3.bf16.msra.mxu0 %v1082_v26 }
  0x1d   :  { %972 = vmatpush3.bf16.msra.mxu1 %v1083_v27  ;;  %951 = vmatprep.subr.bf16.mxu0 %v1084_v28 }
  0x1e   :  { %973 = vmatprep.subr.bf16.mxu1 %v1085_v29 }
  0x20   :  { %952 = vmatpush3.bf16.msra.mxu0 %v1086_v30 }
  0x21   :  { %974 = vmatpush3.bf16.msra.mxu1 %v1087_v31  ;;  %981 = vmatprep.subr.bf16.mxu0 %v1092_v38 }
  0x22   :  { %1003 = vmatprep.subr.bf16.mxu1 %v1094_v40 }
  0x23   :  { %664 = vmatmul.mubr.bf16.vlgmr.msra.gmra.mxu0 %v854_v34 }
  0x24   :  { %704 = vmatmul.mubr.bf16.vlgmr.msra.gmra.mxu1 %v856_v36  ;;  %982 = vmatpush3.bf16.msra.mxu0 %v1093_v39 }
  0x25   :  { %1004 = vmatpush3.bf16.msra.mxu1 %v1095_v41  ;;  %983 = vmatprep.subr.bf16.mxu0 %v1096_v42 }
  0x26   :  { %1005 = vmatprep.subr.bf16.mxu1 %v1098_v44  ;;  %743 = vmatprep.mubr.bf16.mxu0 %v859_v6 }
  0x27   :  { %783 = vmatprep.mubr.bf16.mxu1 %v861_v11 }
  0x28   :  { %984 = vmatpush3.bf16.msra.mxu0 %v1097_v43 }
  0x29   :  { %1006 = vmatpush3.bf16.msra.mxu1 %v1099_v45  ;;  %985 = vmatprep.subr.bf16.mxu0 %v1100_v46  ;;  %v935_v46 = vld [vmem:[%s1406_s2] ss:$0 sm:$0xff] }
  0x2a   :  { %1007 = vmatprep.subr.bf16.mxu1 %v1102_v48  ;;  %v936_v48 = vld [vmem:[%s1407_s3] ss:$0 sm:$0xff] }
  0x2c   :  { %986 = vmatpush3.bf16.msra.mxu0 %v1101_v47 }
  0x2d   :  { %1008 = vmatpush3.bf16.msra.mxu1 %v1103_v49  ;;  %987 = vmatprep.subr.bf16.mxu0 %v1104_v50 }
  0x2e   :  { %1009 = vmatprep.subr.bf16.mxu1 %v1106_v52 }
  0x30   :  { %988 = vmatpush3.bf16.msra.mxu0 %v1105_v51 }
  0x31   :  { %1010 = vmatpush3.bf16.msra.mxu1 %v1107_v53  ;;  %989 = vmatprep.subr.bf16.mxu0 %v1108_v54 }
  0x32   :  { %1011 = vmatprep.subr.bf16.mxu1 %v1110_v56 }
  0x34   :  { %990 = vmatpush3.bf16.msra.mxu0 %v1109_v55 }
  0x35   :  { %1012 = vmatpush3.bf16.msra.mxu1 %v1111_v57  ;;  %991 = vmatprep.subr.bf16.mxu0 %v1112_v58 }
  0x36   :  { %1013 = vmatprep.subr.bf16.mxu1 %v1114_v60 }
  0x38   :  { %992 = vmatpush3.bf16.msra.mxu0 %v1113_v59 }
  0x39   :  { %1014 = vmatpush3.bf16.msra.mxu1 %v1115_v61  ;;  %993 = vmatprep.subr.bf16.mxu0 %v1116_v62 }
  0x3a   :  { %1015 = vmatprep.subr.bf16.mxu1 %v1118_v0 }
  0x3c   :  { %994 = vmatpush3.bf16.msra.mxu0 %v1117_v63 }
  0x3d   :  { %1016 = vmatpush3.bf16.msra.mxu1 %v1119_v1  ;;  %995 = vmatprep.subr.bf16.mxu0 %v1120_v2 }
  0x3e   :  { %1017 = vmatprep.subr.bf16.mxu1 %v1122_v4 }
  0x40   :  { %996 = vmatpush3.bf16.msra.mxu0 %v1121_v3 }
  0x41   :  { %1018 = vmatpush3.bf16.msra.mxu1 %v1125_v7  ;;  %1034 = vmatprep.subr.bf16.mxu0 %v1137_v13 }
  0x43   :  { %744 = vmatmul.mubr.bf16.vlgmr.msra.gmra.mxu0 %v858_v8 }
  0x44   :  { %1035 = vmatpush3.bf16.msra.mxu0 %v1128_v12  ;;  %784 = vmatmul.mubr.bf16.vlgmr.msra.gmra.mxu1 %v860_v10 }
  0x45   :  { %1036 = vmatprep.subr.bf16.mxu0 %v1137_v13  ;;  %1050 = vmatprep.mubr.msk.bf16.mxu0 %vm1138_vm0, %v1137_v13 }
  0x48   :  { %1037 = vmatpush3.bf16.msra.mxu0 %v1129_v14 }
  0x49   :  { %1038 = vmatprep.subr.bf16.mxu0 %v1137_v13 }
  0x4c   :  { %1039 = vmatpush3.bf16.msra.mxu0 %v1130_v15 }
  0x4d   :  { %1040 = vmatprep.subr.bf16.mxu0 %v1137_v13 }
  0x50   :  { %1041 = vmatpush3.bf16.msra.mxu0 %v1131_v16 }
  0x51   :  { %1042 = vmatprep.subr.bf16.mxu0 %v1137_v13 }
  0x54   :  { %1043 = vmatpush3.bf16.msra.mxu0 %v1132_v17 }
  0x55   :  { %1044 = vmatprep.subr.bf16.mxu0 %v1137_v13 }
  0x58   :  { %1045 = vmatpush3.bf16.msra.mxu0 %v1133_v18 }
  0x59   :  { %1046 = vmatprep.subr.bf16.mxu0 %v1137_v13 }
  0x5c   :  { %1047 = vmatpush3.bf16.msra.mxu0 %v1134_v19 }
  0x5d   :  { %1048 = vmatprep.subr.bf16.mxu0 %v1137_v13 }
  0x60   :  { %1049 = vmatpush3.bf16.msra.mxu0 %v1135_v20 }
  0x63   :  { %1051 = vmatmul.mubr.bf16.vlgmr.msra.gmra.mxu0 %v1136_v21 }
  0xe3   :  { %v953_v22 = vpop.f32.mrf.mxu0 }
  0xe4   :  { %v975_v23 = vpop.f32.mrf.mxu1 }
  0xe5   :  { %v954_v24 = vpop.f32.mrf.mxu0 }
  0xe6   :  { %v976_v25 = vpop.f32.mrf.mxu1  ;;  %v955_v38 = vadd.f32 %v954_v24, %v953_v22 }
  0xe7   :  { %v956_v26 = vpop.f32.mrf.mxu0  ;;  %v977_v39 = vadd.f32 %v976_v25, %v975_v23 }
  0xe8   :  { %v978_v27 = vpop.f32.mrf.mxu1 }
  0xe9   :  { %v957_v28 = vpop.f32.mrf.mxu0  ;;  %v706_v41 = vadd.f32 %v977_v39, %v955_v38 }
  0xea   :  { %v979_v29 = vpop.f32.mrf.mxu1 }
 0x103   :  { %v997_v30 = vpop.f32.mrf.mxu0 }
 0x104   :  { %v1019_v31 = vpop.f32.mrf.mxu1 }
 0x105   :  { %v998_v32 = vpop.f32.mrf.mxu0 }
 0x106   :  { %v1020_v33 = vpop.f32.mrf.mxu1  ;;  %v999_v40 = vadd.f32 %v998_v32, %v997_v30 }
 0x107   :  { %v1000_v34 = vpop.f32.mrf.mxu0  ;;  %v1021_v43 = vadd.f32 %v1020_v33, %v1019_v31 }
 0x108   :  { %v1022_v35 = vpop.f32.mrf.mxu1  ;;  %v746_v42 = vadd.f32 %v999_v40, %v706_v41 }
 0x109   :  { %v1001_v36 = vpop.f32.mrf.mxu0 }
 0x10a   :  { %v1023_v37 = vpop.f32.mrf.mxu1  ;;  %v786_v44 = vadd.f32 %v1021_v43, %v746_v42 }
 0x123   :  { %v825_v45 = vpop.f32.mrf.mxu0 }
 0x124   :  { %v826_v47 = vadd.f32 %v825_v45, %v786_v44 }
 0x125   :  { %v1052_v49 = vpop.f32.mrf.mxu0 }
 0x126   :  { %v838_v50 = vmul.f32 %v935_v46, %v826_v47 }
 0x127   :  { %v828_v51 = vpop.f32.mrf.mxu0 }
 0x128   :  { %v846_v52 = vadd.f32 %v936_v48, %v838_v50 }
 0x129   :  { %v1053_v53 = vpop.f32.mrf.mxu0 }
 0x12a   :  { %v847_v54 = vmax.f32 %v846_v52, 0.0 }
 0x12c   :  { %v848_v55 = vpack.c.bf16 %v847_v54, %v847_v54 }
 0x12e   :  { %849 = vst [vmem:[%s1408_s4] sm:$0xf] %v848_v55 }

// kernel: resnet_simple_forward.22
= control target key start
LH: loop header
LB: loop body
LE: loop exit
PB: predicated region body
PF: predicated region fallthrough
CT: control target
= control target key end

     0   :  { %v194_v0 = vmov 0.0   ;;  %vm195_vm0 = vmmov 0   ;;  %s257_s1 = inlined_call_operand.vmem [shape: bf16[128,128], index: 1, kind: input, shape index: {}]   ;;  %s258_s0 = inlined_call_operand.vmem [shape: bf16[8,128], index: 0, kind: input, shape index: {}]   ;;  %s259_s2 = inlined_call_operand.vmem [shape: f32[1,128], index: 2, kind: input, shape index: {}]   ;;  %s260_s3 = inlined_call_operand.vmem [shape: f32[1,128], index: 3, kind: input, shape index: {}]   ;;  %s261_s4 = inlined_call_operand.vmem [shape: bf16[8,128], index: 4, kind: output, shape index: {}]  }
   0x1   :  { %164 = vmatprep.subr.bf16.mxu0 %v194_v0  ;;  %v186_v1 = vld [vmem:[%s257_s1 + $0x38] sm:$0xff]   ;;  %180 = vmatprep.mubr.msk.bf16.mxu0 %vm195_vm0, %v194_v0  ;;  %v187_v2 = vld [vmem:[%s257_s1 + $0x30] sm:$0xff]   ;;  %v188_v3 = vld [vmem:[%s257_s1 + $0x28] sm:$0xff]  }
   0x2   :  { %165 = vmatpush3.bf16.msra.mxu0 %v186_v1  ;;  %v189_v4 = vld [vmem:[%s257_s1 + $0x20] sm:$0xff]   ;;  %v190_v5 = vld [vmem:[%s257_s1 + $0x18] sm:$0xff]   ;;  %v191_v6 = vld [vmem:[%s257_s1 + $0x10] sm:$0xff]  }
   0x3   :  { %166 = vmatprep.subr.bf16.mxu0 %v194_v0  ;;  %v192_v7 = vld [vmem:[%s257_s1 + $0x8] sm:$0xff]   ;;  %v193_v8 = vld [vmem:[%s257_s1] sm:$0xff]  }
   0x4   :  { %v18_v9 = vld [vmem:[%s258_s0] sm:$0xf] }
   0x5   :  { %v153_v10 = vld [vmem:[%s259_s2] ss:$0 sm:$0xff] }
   0x6   :  { %167 = vmatpush3.bf16.msra.mxu0 %v187_v2  ;;  %v154_v12 = vld [vmem:[%s260_s3] ss:$0 sm:$0xff] }
   0x7   :  { %168 = vmatprep.subr.bf16.mxu0 %v194_v0 }
   0xa   :  { %169 = vmatpush3.bf16.msra.mxu0 %v188_v3 }
   0xb   :  { %170 = vmatprep.subr.bf16.mxu0 %v194_v0 }
   0xe   :  { %171 = vmatpush3.bf16.msra.mxu0 %v189_v4 }
   0xf   :  { %172 = vmatprep.subr.bf16.mxu0 %v194_v0 }
  0x12   :  { %173 = vmatpush3.bf16.msra.mxu0 %v190_v5 }
  0x13   :  { %174 = vmatprep.subr.bf16.mxu0 %v194_v0 }
  0x16   :  { %175 = vmatpush3.bf16.msra.mxu0 %v191_v6 }
  0x17   :  { %176 = vmatprep.subr.bf16.mxu0 %v194_v0 }
  0x1a   :  { %177 = vmatpush3.bf16.msra.mxu0 %v192_v7 }
  0x1b   :  { %178 = vmatprep.subr.bf16.mxu0 %v194_v0 }
  0x1e   :  { %179 = vmatpush3.bf16.msra.mxu0 %v193_v8 }
  0x21   :  { %181 = vmatmul.mubr.bf16.vlgmr.msra.gmra.mxu0 %v18_v9 }
  0xe1   :  { %v117_v11 = vpop.f32.mrf.mxu0 }
  0xe2   :  { %v130_v13 = vmul.f32 %v153_v10, %v117_v11 }
  0xe3   :  { %v182_v14 = vpop.f32.mrf.mxu0 }
  0xe4   :  { %v138_v15 = vadd.f32 %v154_v12, %v130_v13 }
  0xe5   :  { %v120_v16 = vpop.f32.mrf.mxu0 }
  0xe6   :  { %v139_v17 = vpack.c.bf16 %v138_v15, %v138_v15 }
  0xe7   :  { %v183_v18 = vpop.f32.mrf.mxu0 }
  0xe8   :  { %140 = vst [vmem:[%s261_s4] sm:$0xf] %v139_v17 }

// kernel: resnet_simple_forward.23
= control target key start
LH: loop header
LB: loop body
LE: loop exit
PB: predicated region body
PF: predicated region fallthrough
CT: control target
= control target key end

     0   :  { %vm1144_vm0 = vmmov 0   ;;  %s1418_s1 = inlined_call_operand.vmem [shape: bf16[1152,128], index: 1, kind: input, shape index: {}]   ;;  %s1419_s0 = inlined_call_operand.vmem [shape: bf16[8,1152], index: 0, kind: input, shape index: {}]   ;;  %s1420_s2 = inlined_call_operand.vmem [shape: f32[1,128], index: 2, kind: input, shape index: {}]   ;;  %s1421_s4 = inlined_call_operand.vmem [shape: bf16[8,128], index: 4, kind: input, shape index: {}]   ;;  %s1422_s3 = inlined_call_operand.vmem [shape: f32[1,128], index: 3, kind: input, shape index: {}]   ;;  %s1423_s5 = inlined_call_operand.vmem [shape: bf16[8,128], index: 5, kind: output, shape index: {}]  }
   0x1   :  { %v1062_v0 = vld [vmem:[%s1418_s1 + $0x78] sm:$0xff]   ;;  %v1066_v4 = vld [vmem:[%s1418_s1 + $0x70] sm:$0xff]   ;;  %v1070_v8 = vld [vmem:[%s1418_s1 + $0x68] sm:$0xff]  }
   0x2   :  { %v1063_v1 = vld [vmem:[%s1418_s1 + $0xf8] sm:$0xff]   ;;  %943 = vmatprep.subr.bf16.mxu0 %v1062_v0  ;;  %v1067_v5 = vld [vmem:[%s1418_s1 + $0xf0] sm:$0xff]   ;;  %v1071_v9 = vld [vmem:[%s1418_s1 + $0xe8] sm:$0xff]  }
   0x3   :  { %v1064_v2 = vld [vmem:[%s1418_s1 + $0x38] sm:$0xff]   ;;  %965 = vmatprep.subr.bf16.mxu1 %v1063_v1  ;;  %v1068_v6 = vld [vmem:[%s1418_s1 + $0x30] sm:$0xff]   ;;  %v1072_v10 = vld [vmem:[%s1418_s1 + $0x28] sm:$0xff]  }
   0x4   :  { %v1065_v3 = vld [vmem:[%s1418_s1 + $0xb8] sm:$0xff]   ;;  %944 = vmatpush3.bf16.msra.mxu0 %v1064_v2  ;;  %v1069_v7 = vld [vmem:[%s1418_s1 + $0xb0] sm:$0xff]   ;;  %v1073_v11 = vld [vmem:[%s1418_s1 + $0xa8] sm:$0xff]  }
   0x5   :  { %966 = vmatpush3.bf16.msra.mxu1 %v1065_v3  ;;  %945 = vmatprep.subr.bf16.mxu0 %v1066_v4  ;;  %v1074_v12 = vld [vmem:[%s1418_s1 + $0x60] sm:$0xff]   ;;  %v1078_v16 = vld [vmem:[%s1418_s1 + $0x58] sm:$0xff]   ;;  %v1082_v20 = vld [vmem:[%s1418_s1 + $0x50] sm:$0xff]  }
   0x6   :  { %967 = vmatprep.subr.bf16.mxu1 %v1067_v5  ;;  %v1075_v13 = vld [vmem:[%s1418_s1 + $0xe0] sm:$0xff]   ;;  %v1079_v17 = vld [vmem:[%s1418_s1 + $0xd8] sm:$0xff]   ;;  %v1083_v21 = vld [vmem:[%s1418_s1 + $0xd0] sm:$0xff]  }
   0x7   :  { %v1076_v14 = vld [vmem:[%s1418_s1 + $0x20] sm:$0xff]   ;;  %v1080_v18 = vld [vmem:[%s1418_s1 + $0x18] sm:$0xff]   ;;  %v1084_v22 = vld [vmem:[%s1418_s1 + $0x10] sm:$0xff]  }
   0x8   :  { %946 = vmatpush3.bf16.msra.mxu0 %v1068_v6  ;;  %v1077_v15 = vld [vmem:[%s1418_s1 + $0xa0] sm:$0xff]   ;;  %v1081_v19 = vld [vmem:[%s1418_s1 + $0x98] sm:$0xff]   ;;  %v1085_v23 = vld [vmem:[%s1418_s1 + $0x90] sm:$0xff]  }
   0x9   :  { %968 = vmatpush3.bf16.msra.mxu1 %v1069_v7  ;;  %947 = vmatprep.subr.bf16.mxu0 %v1070_v8  ;;  %v1086_v24 = vld [vmem:[%s1418_s1 + $0x48] sm:$0xff]   ;;  %v1090_v28 = vld [vmem:[%s1418_s1 + $0x40] sm:$0xff]   ;;  %v1098_v38 = vld [vmem:[%s1418_s1 + $0x178] sm:$0xff]  }
   0xa   :  { %969 = vmatprep.subr.bf16.mxu1 %v1071_v9  ;;  %v1087_v25 = vld [vmem:[%s1418_s1 + $0xc8] sm:$0xff]   ;;  %v1091_v29 = vld [vmem:[%s1418_s1 + $0xc0] sm:$0xff]   ;;  %v1099_v39 = vld [vmem:[%s1418_s1 + $0x138] sm:$0xff]  }
   0xb   :  { %v1088_v26 = vld [vmem:[%s1418_s1 + $0x8] sm:$0xff]   ;;  %v1092_v30 = vld [vmem:[%s1418_s1] sm:$0xff]   ;;  %v1100_v40 = vld [vmem:[%s1418_s1 + $0x1f8] sm:$0xff]  }
   0xc   :  { %948 = vmatpush3.bf16.msra.mxu0 %v1072_v10  ;;  %v1089_v27 = vld [vmem:[%s1418_s1 + $0x88] sm:$0xff]   ;;  %v1093_v31 = vld [vmem:[%s1418_s1 + $0x80] sm:$0xff]   ;;  %v1101_v41 = vld [vmem:[%s1418_s1 + $0x1b8] sm:$0xff]  }
   0xd   :  { %970 = vmatpush3.bf16.msra.mxu1 %v1073_v11  ;;  %949 = vmatprep.subr.bf16.mxu0 %v1074_v12  ;;  %v21_v32 = vld [vmem:[%s1419_s0] sm:$0xff]  ;;  %v22_v33 = vld [vmem:[%s1419_s0 + $0x8] sm:$0xff]  ;;  %v1102_v42 = vld [vmem:[%s1418_s1 + $0x170] sm:$0xff]  }
   0xe   :  { %971 = vmatprep.subr.bf16.mxu1 %v1075_v13  ;;  %v860_v34 = vcombine.low %v21_v32, %v21_v32  ;;  %v861_v35 = vcombine.high %v21_v32, %v21_v32  ;;  %v862_v36 = vcombine.low %v22_v33, %v22_v33  ;;  %v863_v37 = vcombine.high %v22_v33, %v22_v33  ;;  %v1103_v43 = vld [vmem:[%s1418_s1 + $0x130] sm:$0xff]   ;;  %v1106_v46 = vld [vmem:[%s1418_s1 + $0x168] sm:$0xff]   ;;  %v1110_v50 = vld [vmem:[%s1418_s1 + $0x160] sm:$0xff]  }
   0xf   :  { %v1104_v44 = vld [vmem:[%s1418_s1 + $0x1f0] sm:$0xff]   ;;  %v1107_v47 = vld [vmem:[%s1418_s1 + $0x128] sm:$0xff]   ;;  %v1111_v51 = vld [vmem:[%s1418_s1 + $0x120] sm:$0xff]   ;;  %v1143_v13 = vmov 0.0  }
  0x10   :  { %950 = vmatpush3.bf16.msra.mxu0 %v1076_v14  ;;  %666 = vmatprep.mubr.bf16.mxu0 %v861_v35  ;;  %v1105_v45 = vld [vmem:[%s1418_s1 + $0x1b0] sm:$0xff]   ;;  %v1108_v48 = vld [vmem:[%s1418_s1 + $0x1e8] sm:$0xff]   ;;  %v1112_v52 = vld [vmem:[%s1418_s1 + $0x1e0] sm:$0xff]  }
  0x11   :  { %972 = vmatpush3.bf16.msra.mxu1 %v1077_v15  ;;  %951 = vmatprep.subr.bf16.mxu0 %v1078_v16  ;;  %v1109_v49 = vld [vmem:[%s1418_s1 + $0x1a8] sm:$0xff]   ;;  %v1113_v53 = vld [vmem:[%s1418_s1 + $0x1a0] sm:$0xff]   ;;  %v1114_v54 = vld [vmem:[%s1418_s1 + $0x158] sm:$0xff]  }
  0x12   :  { %973 = vmatprep.subr.bf16.mxu1 %v1079_v17  ;;  %706 = vmatprep.mubr.bf16.mxu1 %v863_v37  ;;  %v1115_v55 = vld [vmem:[%s1418_s1 + $0x118] sm:$0xff]   ;;  %v1118_v58 = vld [vmem:[%s1418_s1 + $0x150] sm:$0xff]   ;;  %v1122_v62 = vld [vmem:[%s1418_s1 + $0x148] sm:$0xff]  }
  0x13   :  { %v1116_v56 = vld [vmem:[%s1418_s1 + $0x1d8] sm:$0xff]   ;;  %v1119_v59 = vld [vmem:[%s1418_s1 + $0x110] sm:$0xff]   ;;  %v1123_v63 = vld [vmem:[%s1418_s1 + $0x108] sm:$0xff]  }
  0x14   :  { %952 = vmatpush3.bf16.msra.mxu0 %v1080_v18  ;;  %v1117_v57 = vld [vmem:[%s1418_s1 + $0x198] sm:$0xff]   ;;  %v1120_v60 = vld [vmem:[%s1418_s1 + $0x1d0] sm:$0xff]   ;;  %v1124_v0 = vld [vmem:[%s1418_s1 + $0x1c8] sm:$0xff]  }
  0x15   :  { %974 = vmatpush3.bf16.msra.mxu1 %v1081_v19  ;;  %953 = vmatprep.subr.bf16.mxu0 %v1082_v20  ;;  %v1121_v61 = vld [vmem:[%s1418_s1 + $0x190] sm:$0xff]   ;;  %v1125_v1 = vld [vmem:[%s1418_s1 + $0x188] sm:$0xff]   ;;  %v1126_v2 = vld [vmem:[%s1418_s1 + $0x140] sm:$0xff]  }
  0x16   :  { %975 = vmatprep.subr.bf16.mxu1 %v1083_v21  ;;  %v1127_v3 = vld [vmem:[%s1418_s1 + $0x100] sm:$0xff]   ;;  %v23_v5 = vld [vmem:[%s1419_s0 + $0x10] sm:$0xff]  ;;  %v24_v9 = vld [vmem:[%s1419_s0 + $0x18] sm:$0xff] }
  0x17   :  { %v1128_v4 = vld [vmem:[%s1418_s1 + $0x1c0] sm:$0xff]   ;;  %v865_v6 = vcombine.high %v23_v5, %v23_v5  ;;  %v864_v8 = vcombine.low %v23_v5, %v23_v5  ;;  %v866_v10 = vcombine.low %v24_v9, %v24_v9  ;;  %v867_v11 = vcombine.high %v24_v9, %v24_v9  ;;  %v1134_v12 = vld [vmem:[%s1418_s1 + $0x238] sm:$0xff]   ;;  %v1135_v14 = vld [vmem:[%s1418_s1 + $0x230] sm:$0xff]  }
  0x18   :  { %954 = vmatpush3.bf16.msra.mxu0 %v1084_v22  ;;  %v1131_v7 = vld [vmem:[%s1418_s1 + $0x180] sm:$0xff]   ;;  %v1136_v15 = vld [vmem:[%s1418_s1 + $0x228] sm:$0xff]   ;;  %v1138_v17 = vld [vmem:[%s1418_s1 + $0x218] sm:$0xff]  }
  0x19   :  { %976 = vmatpush3.bf16.msra.mxu1 %v1085_v23  ;;  %955 = vmatprep.subr.bf16.mxu0 %v1086_v24  ;;  %v1137_v16 = vld [vmem:[%s1418_s1 + $0x220] sm:$0xff]   ;;  %v1139_v18 = vld [vmem:[%s1418_s1 + $0x210] sm:$0xff]   ;;  %v1140_v19 = vld [vmem:[%s1418_s1 + $0x208] sm:$0xff]  }
  0x1a   :  { %977 = vmatprep.subr.bf16.mxu1 %v1087_v25  ;;  %v1141_v20 = vld [vmem:[%s1418_s1 + $0x200] sm:$0xff]  }
  0x1b   :  { %v1142_v21 = vld [vmem:[%s1419_s0 + $0x20] ss:$0 sps:$4 sm:$0xff]  }
  0x1c   :  { %956 = vmatpush3.bf16.msra.mxu0 %v1088_v26 }
  0x1d   :  { %978 = vmatpush3.bf16.msra.mxu1 %v1089_v27  ;;  %957 = vmatprep.subr.bf16.mxu0 %v1090_v28 }
  0x1e   :  { %979 = vmatprep.subr.bf16.mxu1 %v1091_v29 }
  0x20   :  { %958 = vmatpush3.bf16.msra.mxu0 %v1092_v30 }
  0x21   :  { %980 = vmatpush3.bf16.msra.mxu1 %v1093_v31  ;;  %987 = vmatprep.subr.bf16.mxu0 %v1098_v38 }
  0x22   :  { %1009 = vmatprep.subr.bf16.mxu1 %v1100_v40 }
  0x23   :  { %667 = vmatmul.mubr.bf16.vlgmr.msra.gmra.mxu0 %v860_v34 }
  0x24   :  { %707 = vmatmul.mubr.bf16.vlgmr.msra.gmra.mxu1 %v862_v36  ;;  %988 = vmatpush3.bf16.msra.mxu0 %v1099_v39 }
  0x25   :  { %1010 = vmatpush3.bf16.msra.mxu1 %v1101_v41  ;;  %989 = vmatprep.subr.bf16.mxu0 %v1102_v42 }
  0x26   :  { %1011 = vmatprep.subr.bf16.mxu1 %v1104_v44  ;;  %746 = vmatprep.mubr.bf16.mxu0 %v865_v6 }
  0x27   :  { %786 = vmatprep.mubr.bf16.mxu1 %v867_v11 }
  0x28   :  { %990 = vmatpush3.bf16.msra.mxu0 %v1103_v43 }
  0x29   :  { %1012 = vmatpush3.bf16.msra.mxu1 %v1105_v45  ;;  %991 = vmatprep.subr.bf16.mxu0 %v1106_v46  ;;  %v941_v46 = vld [vmem:[%s1420_s2] ss:$0 sm:$0xff] }
  0x2a   :  { %1013 = vmatprep.subr.bf16.mxu1 %v1108_v48 }
  0x2c   :  { %992 = vmatpush3.bf16.msra.mxu0 %v1107_v47  ;;  %v850_v47 = vld [vmem:[%s1421_s4] sm:$0xf] }
  0x2d   :  { %1014 = vmatpush3.bf16.msra.mxu1 %v1109_v49  ;;  %993 = vmatprep.subr.bf16.mxu0 %v1110_v50  ;;  %v942_v49 = vld [vmem:[%s1422_s3] ss:$0 sm:$0xff] }
  0x2e   :  { %1015 = vmatprep.subr.bf16.mxu1 %v1112_v52  ;;  %v851_v52 = vunpack.c.l.bf16 %v850_v47 }
  0x30   :  { %994 = vmatpush3.bf16.msra.mxu0 %v1111_v51 }
  0x31   :  { %1016 = vmatpush3.bf16.msra.mxu1 %v1113_v53  ;;  %995 = vmatprep.subr.bf16.mxu0 %v1114_v54 }
  0x32   :  { %1017 = vmatprep.subr.bf16.mxu1 %v1116_v56 }
  0x34   :  { %996 = vmatpush3.bf16.msra.mxu0 %v1115_v55 }
  0x35   :  { %1018 = vmatpush3.bf16.msra.mxu1 %v1117_v57  ;;  %997 = vmatprep.subr.bf16.mxu0 %v1118_v58 }
  0x36   :  { %1019 = vmatprep.subr.bf16.mxu1 %v1120_v60 }
  0x38   :  { %998 = vmatpush3.bf16.msra.mxu0 %v1119_v59 }
  0x39   :  { %1020 = vmatpush3.bf16.msra.mxu1 %v1121_v61  ;;  %999 = vmatprep.subr.bf16.mxu0 %v1122_v62 }
  0x3a   :  { %1021 = vmatprep.subr.bf16.mxu1 %v1124_v0 }
  0x3c   :  { %1000 = vmatpush3.bf16.msra.mxu0 %v1123_v63 }
  0x3d   :  { %1022 = vmatpush3.bf16.msra.mxu1 %v1125_v1  ;;  %1001 = vmatprep.subr.bf16.mxu0 %v1126_v2 }
  0x3e   :  { %1023 = vmatprep.subr.bf16.mxu1 %v1128_v4 }
  0x40   :  { %1002 = vmatpush3.bf16.msra.mxu0 %v1127_v3 }
  0x41   :  { %1024 = vmatpush3.bf16.msra.mxu1 %v1131_v7  ;;  %1040 = vmatprep.subr.bf16.mxu0 %v1143_v13 }
  0x43   :  { %747 = vmatmul.mubr.bf16.vlgmr.msra.gmra.mxu0 %v864_v8 }
  0x44   :  { %1041 = vmatpush3.bf16.msra.mxu0 %v1134_v12  ;;  %787 = vmatmul.mubr.bf16.vlgmr.msra.gmra.mxu1 %v866_v10 }
  0x45   :  { %1042 = vmatprep.subr.bf16.mxu0 %v1143_v13  ;;  %1056 = vmatprep.mubr.msk.bf16.mxu0 %vm1144_vm0, %v1143_v13 }
  0x48   :  { %1043 = vmatpush3.bf16.msra.mxu0 %v1135_v14 }
  0x49   :  { %1044 = vmatprep.subr.bf16.mxu0 %v1143_v13 }
  0x4c   :  { %1045 = vmatpush3.bf16.msra.mxu0 %v1136_v15 }
  0x4d   :  { %1046 = vmatprep.subr.bf16.mxu0 %v1143_v13 }
  0x50   :  { %1047 = vmatpush3.bf16.msra.mxu0 %v1137_v16 }
  0x51   :  { %1048 = vmatprep.subr.bf16.mxu0 %v1143_v13 }
  0x54   :  { %1049 = vmatpush3.bf16.msra.mxu0 %v1138_v17 }
  0x55   :  { %1050 = vmatprep.subr.bf16.mxu0 %v1143_v13 }
  0x58   :  { %1051 = vmatpush3.bf16.msra.mxu0 %v1139_v18 }
  0x59   :  { %1052 = vmatprep.subr.bf16.mxu0 %v1143_v13 }
  0x5c   :  { %1053 = vmatpush3.bf16.msra.mxu0 %v1140_v19 }
  0x5d   :  { %1054 = vmatprep.subr.bf16.mxu0 %v1143_v13 }
  0x60   :  { %1055 = vmatpush3.bf16.msra.mxu0 %v1141_v20 }
  0x63   :  { %1057 = vmatmul.mubr.bf16.vlgmr.msra.gmra.mxu0 %v1142_v21 }
  0xe3   :  { %v959_v22 = vpop.f32.mrf.mxu0 }
  0xe4   :  { %v981_v23 = vpop.f32.mrf.mxu1 }
  0xe5   :  { %v960_v24 = vpop.f32.mrf.mxu0 }
  0xe6   :  { %v982_v25 = vpop.f32.mrf.mxu1  ;;  %v961_v38 = vadd.f32 %v960_v24, %v959_v22 }
  0xe7   :  { %v962_v26 = vpop.f32.mrf.mxu0  ;;  %v983_v39 = vadd.f32 %v982_v25, %v981_v23 }
  0xe8   :  { %v984_v27 = vpop.f32.mrf.mxu1 }
  0xe9   :  { %v963_v28 = vpop.f32.mrf.mxu0  ;;  %v709_v41 = vadd.f32 %v983_v39, %v961_v38 }
  0xea   :  { %v985_v29 = vpop.f32.mrf.mxu1 }
 0x103   :  { %v1003_v30 = vpop.f32.mrf.mxu0 }
 0x104   :  { %v1025_v31 = vpop.f32.mrf.mxu1 }
 0x105   :  { %v1004_v32 = vpop.f32.mrf.mxu0 }
 0x106   :  { %v1026_v33 = vpop.f32.mrf.mxu1  ;;  %v1005_v40 = vadd.f32 %v1004_v32, %v1003_v30 }
 0x107   :  { %v1006_v34 = vpop.f32.mrf.mxu0  ;;  %v1027_v43 = vadd.f32 %v1026_v33, %v1025_v31 }
 0x108   :  { %v1028_v35 = vpop.f32.mrf.mxu1  ;;  %v749_v42 = vadd.f32 %v1005_v40, %v709_v41 }
 0x109   :  { %v1007_v36 = vpop.f32.mrf.mxu0 }
 0x10a   :  { %v1029_v37 = vpop.f32.mrf.mxu1  ;;  %v789_v44 = vadd.f32 %v1027_v43, %v749_v42 }
 0x123   :  { %v828_v45 = vpop.f32.mrf.mxu0 }
 0x124   :  { %v829_v48 = vadd.f32 %v828_v45, %v789_v44 }
 0x125   :  { %v1058_v50 = vpop.f32.mrf.mxu0 }
 0x126   :  { %v841_v51 = vmul.f32 %v941_v46, %v829_v48 }
 0x127   :  { %v831_v53 = vpop.f32.mrf.mxu0 }
 0x128   :  { %v849_v54 = vadd.f32 %v942_v49, %v841_v51 }
 0x129   :  { %v1059_v55 = vpop.f32.mrf.mxu0 }
 0x12a   :  { %v852_v56 = vadd.f32 %v851_v52, %v849_v54 }
 0x12c   :  { %v853_v57 = vmax.f32 %v852_v56, 0.0 }
 0x12e   :  { %v854_v58 = vpack.c.bf16 %v853_v57, %v853_v57 }
 0x130   :  { %855 = vst [vmem:[%s1423_s5] sm:$0xf] %v854_v58 }

// kernel: resnet_simple_forward.27
= control target key start
LH: loop header
LB: loop body
LE: loop exit
PB: predicated region body
PF: predicated region fallthrough
CT: control target
= control target key end

     0   :  { %v291_v0 = vmov 0.0   ;;  %vm292_vm0 = vmmov 0   ;;  %vm116_vm1 = vcmask 1041409   ;;  %vm118_vm2 = vcmask 1042434   ;;  %s358_s1 = inlined_call_operand.vmem [shape: bf16[128,128], index: 1, kind: input, shape index: {}]   ;;  %s359_s0 = inlined_call_operand.vmem [shape: bf16[8,8,128], index: 0, kind: input, shape index: {}]   ;;  %s360_s2 = inlined_call_operand.vmem [shape: f32[8,128], index: 2, kind: output, shape index: {}]  }
   0x1   :  { %261 = vmatprep.subr.bf16.mxu0 %v291_v0  ;;  %v283_v1 = vld [vmem:[%s358_s1 + $0x38] sm:$0xff]   ;;  %277 = vmatprep.mubr.msk.bf16.mxu0 %vm292_vm0, %v291_v0  ;;  %v284_v2 = vld [vmem:[%s358_s1 + $0x30] sm:$0xff]   ;;  %v285_v3 = vld [vmem:[%s358_s1 + $0x28] sm:$0xff]   ;;  %vm120_vm3 = vcmask 1043459   ;;  %vm122_vm4 = vcmask 1044484   ;;  %vm124_vm5 = vcmask 1045509  }
   0x2   :  { %262 = vmatpush3.bf16.msra.mxu0 %v283_v1  ;;  %v234_v4 = vld [vmem:[%s359_s0] sm:$0xff]   ;;  %v249_v5 = vld [vmem:[%s359_s0 + $0x8] sm:$0xff]   ;;  %v250_v6 = vld [vmem:[%s359_s0 + $0x10] sm:$0xff]   ;;  %vm126_vm6 = vcmask 1046534   ;;  %vm128_vm7 = vcmask 1047559  }
   0x3   :  { %263 = vmatprep.subr.bf16.mxu0 %v291_v0  ;;  %v235_v7 = vunpack.c.l.bf16 %v234_v4  ;;  %v236_v8 = vunpack.c.h.bf16 %v234_v4  ;;  %v239_v9 = vunpack.c.l.bf16 %v249_v5  ;;  %v240_v10 = vunpack.c.h.bf16 %v249_v5  ;;  %v251_v11 = vld [vmem:[%s359_s0 + $0x18] sm:$0xff]   ;;  %v286_v12 = vld [vmem:[%s358_s1 + $0x20] sm:$0xff]   ;;  %v288_v46 = vld [vmem:[%s358_s1 + $0x10] sm:$0xff]  }
   0x4   :  { %v243_v13 = vunpack.c.l.bf16 %v250_v6  ;;  %v244_v14 = vunpack.c.h.bf16 %v250_v6  ;;  %v247_v15 = vunpack.c.l.bf16 %v251_v11  ;;  %v248_v16 = vunpack.c.h.bf16 %v251_v11  ;;  %v287_v29 = vld [vmem:[%s358_s1 + $0x18] sm:$0xff]   ;;  %v289_v63 = vld [vmem:[%s358_s1 + $0x8] sm:$0xff]  }
   0x5   :  { %v28_v17 = vrot.slane %v235_v7, 4  ;;  %v34_v18 = vrot.slane %v236_v8, 4  ;;  %v40_v19 = vrot.slane %v239_v9, 4  ;;  %v46_v20 = vrot.slane %v240_v10, 4 }
   0x6   :  { %264 = vmatpush3.bf16.msra.mxu0 %v284_v2  ;;  %v52_v21 = vrot.slane %v243_v13, 4  ;;  %v58_v22 = vrot.slane %v244_v14, 4  ;;  %v64_v23 = vrot.slane %v247_v15, 4  ;;  %v70_v24 = vrot.slane %v248_v16, 4 }
   0x7   :  { %265 = vmatprep.subr.bf16.mxu0 %v291_v0  ;;  %v29_v25 = vadd.f32 %v235_v7, %v28_v17  ;;  %v35_v26 = vadd.f32 %v236_v8, %v34_v18  ;;  %v41_v27 = vadd.f32 %v239_v9, %v40_v19  ;;  %v47_v28 = vadd.f32 %v240_v10, %v46_v20  ;;  %v290_v17 = vld [vmem:[%s358_s1] sm:$0xff]  }
   0x8   :  { %v53_v30 = vadd.f32 %v243_v13, %v52_v21  ;;  %v59_v31 = vadd.f32 %v244_v14, %v58_v22  ;;  %v65_v32 = vadd.f32 %v247_v15, %v64_v23  ;;  %v71_v33 = vadd.f32 %v248_v16, %v70_v24 }
   0x9   :  { %v30_v34 = vrot.slane %v29_v25, 2  ;;  %v36_v35 = vrot.slane %v35_v26, 2  ;;  %v42_v36 = vrot.slane %v41_v27, 2  ;;  %v48_v37 = vrot.slane %v47_v28, 2 }
   0xa   :  { %266 = vmatpush3.bf16.msra.mxu0 %v285_v3  ;;  %v54_v38 = vrot.slane %v53_v30, 2  ;;  %v60_v39 = vrot.slane %v59_v31, 2  ;;  %v66_v40 = vrot.slane %v65_v32, 2  ;;  %v72_v41 = vrot.slane %v71_v33, 2 }
   0xb   :  { %267 = vmatprep.subr.bf16.mxu0 %v291_v0  ;;  %v31_v42 = vadd.f32 %v30_v34, %v29_v25  ;;  %v37_v43 = vadd.f32 %v36_v35, %v35_v26  ;;  %v43_v44 = vadd.f32 %v42_v36, %v41_v27  ;;  %v49_v45 = vadd.f32 %v48_v37, %v47_v28 }
   0xc   :  { %v55_v47 = vadd.f32 %v54_v38, %v53_v30  ;;  %v61_v48 = vadd.f32 %v60_v39, %v59_v31  ;;  %v67_v49 = vadd.f32 %v66_v40, %v65_v32  ;;  %v73_v50 = vadd.f32 %v72_v41, %v71_v33 }
   0xd   :  { %v32_v51 = vrot.slane %v31_v42, 1  ;;  %v38_v52 = vrot.slane %v37_v43, 1  ;;  %v44_v53 = vrot.slane %v43_v44, 1  ;;  %v50_v54 = vrot.slane %v49_v45, 1 }
   0xe   :  { %268 = vmatpush3.bf16.msra.mxu0 %v286_v12  ;;  %v56_v55 = vrot.slane %v55_v47, 1  ;;  %v62_v56 = vrot.slane %v61_v48, 1  ;;  %v68_v57 = vrot.slane %v67_v49, 1  ;;  %v74_v58 = vrot.slane %v73_v50, 1 }
   0xf   :  { %269 = vmatprep.subr.bf16.mxu0 %v291_v0  ;;  %v33_v59 = vadd.f32 %v32_v51, %v31_v42  ;;  %v39_v60 = vadd.f32 %v38_v52, %v37_v43  ;;  %v45_v61 = vadd.f32 %v44_v53, %v43_v44  ;;  %v51_v62 = vadd.f32 %v50_v54, %v49_v45 }
  0x10   :  { %v57_v1 = vadd.f32 %v56_v55, %v55_v47  ;;  %v63_v2 = vadd.f32 %v62_v56, %v61_v48  ;;  %v69_v3 = vadd.f32 %v68_v57, %v67_v49  ;;  %v75_v4 = vadd.f32 %v74_v58, %v73_v50 }
  0x11   :  { %v76_v5 = vpack.c.bf16 %v33_v59, %v33_v59  ;;  %v77_v6 = vpack.c.bf16 %v39_v60, %v39_v60  ;;  %v78_v7 = vpack.c.bf16 %v45_v61, %v45_v61  ;;  %v79_v8 = vpack.c.bf16 %v51_v62, %v51_v62 }
  0x12   :  { %270 = vmatpush3.bf16.msra.mxu0 %v287_v29  ;;  %v80_v9 = vpack.c.bf16 %v57_v1, %v57_v1  ;;  %v81_v10 = vpack.c.bf16 %v63_v2, %v63_v2  ;;  %v82_v11 = vpack.c.bf16 %v69_v3, %v69_v3  ;;  %v83_v12 = vpack.c.bf16 %v75_v4, %v75_v4 }
  0x13   :  { %271 = vmatprep.subr.bf16.mxu0 %v291_v0  ;;  %v108_v13 = vunpack.c.l.b16 %v76_v5  ;;  %v109_v14 = vunpack.c.l.b16 %v77_v6  ;;  %v110_v15 = vunpack.c.l.b16 %v78_v7  ;;  %v111_v16 = vunpack.c.l.b16 %v79_v8 }
  0x14   :  { %v112_v18 = vunpack.c.l.b16 %v80_v9  ;;  %v113_v19 = vunpack.c.l.b16 %v81_v10  ;;  %v114_v21 = vunpack.c.l.b16 %v82_v11  ;;  %v115_v23 = vunpack.c.l.b16 %v83_v12 }
  0x15   :  { %v117_v20 = vsel %vm116_vm1, %v109_v14, %v108_v13 }
  0x16   :  { %272 = vmatpush3.bf16.msra.mxu0 %v288_v46  ;;  %v119_v22 = vsel %vm118_vm2, %v110_v15, %v117_v20 }
  0x17   :  { %273 = vmatprep.subr.bf16.mxu0 %v291_v0  ;;  %v121_v24 = vsel %vm120_vm3, %v111_v16, %v119_v22 }
  0x18   :  { %v123_v25 = vsel %vm122_vm4, %v112_v18, %v121_v24 }
  0x19   :  { %v125_v26 = vsel %vm124_vm5, %v113_v19, %v123_v25 }
  0x1a   :  { %274 = vmatpush3.bf16.msra.mxu0 %v289_v63  ;;  %v127_v27 = vsel %vm126_vm6, %v114_v21, %v125_v26 }
  0x1b   :  { %275 = vmatprep.subr.bf16.mxu0 %v291_v0  ;;  %v129_v28 = vsel %vm128_vm7, %v115_v23, %v127_v27 }
  0x1c   :  { %v130_v29 = vpack.c.b16 %v129_v28, %v129_v28 }
  0x1e   :  { %276 = vmatpush3.bf16.msra.mxu0 %v290_v17 }
  0x21   :  { %278 = vmatmul.mubr.bf16.vlgmr.msra.gmra.mxu0 %v130_v29 }
  0xe1   :  { %v214_v0 = vpop.f32.mrf.mxu0 }
  0xe2   :  { %220 = vst [vmem:[%s360_s2] sm:$0xff] %v214_v0 }
  0xe3   :  { %v279_v30 = vpop.f32.mrf.mxu0 }
  0xe5   :  { %v217_v31 = vpop.f32.mrf.mxu0 }
  0xe7   :  { %v280_v32 = vpop.f32.mrf.mxu0 }

</bundles_post_ra>
